<compile_context>
chip_gen: v7x
topology: tpu7x:2x2x1
jax: 0.10.0
libtpu: 0.0.40
codegen_flags: <defaults>
</compile_context>

<pallas_src>
import functools
import math

import numpy as np
import jax
import jax.numpy as jnp
from jax import lax
from jax.experimental import pallas as pl
from jax.experimental.pallas import tpu as pltpu


# ------------------------------ fused kernel -------------------------------

def _attention_kernel(rgb_ref, d_ref, t_ref, f5_ref, masks_ref,
                      w1t_ref, w2_ref, wqkv_ref, bqkv_ref,
                      c1_ref, c2_ref, s1_ref, b1_ref, s2_ref, b2_ref,
                      o_ref, *, C, H, W, Cqp, n):
    HW = H * W
    L = n * HW
    x_refs = (rgb_ref, d_ref, t_ref)            # modality order: rgb, d, t

    # ---- per image: CA gate + stacked QKV projection + 3 cross-attentions ----
    outs = ([], [], [])                          # per attention branch, images on lanes
    for i in range(n):
        qs, ks, vs = [], [], []
        for m in range(3):
            x = x_refs[m][i]                                         # (C, HW) f32
            mx = jnp.max(x, axis=1, keepdims=True)                   # AdaptiveMaxPool2d(1)
            # CA fc1/fc2 on VPU/XLU (RHS is a single column -> skip the MXU pass).
            h = jnp.maximum(
                jnp.sum(w1t_ref[m] * mx, axis=0, keepdims=True), 0.0)        # (1, C/16)
            gate = jax.nn.sigmoid(
                jnp.sum(w2_ref[m] * h, axis=1, keepdims=True))               # (C, 1)
            xg = (x * gate).astype(jnp.bfloat16)
            qkv = jnp.dot(wqkv_ref[m], xg,
                          preferred_element_type=jnp.float32) + bqkv_ref[m]
            # padded q/k rows (zero weights AND bias) stay exactly zero, so the
            # 8-row padded slices feed the energy contraction directly.
            qs.append(qkv[:Cqp].astype(jnp.bfloat16))
            ks.append(qkv[Cqp:2 * Cqp].astype(jnp.bfloat16))
            vs.append(qkv[2 * Cqp:].astype(jnp.bfloat16))

        for g, (qi, ki, vi) in enumerate(((1, 2, 0), (2, 0, 1), (0, 1, 2))):
            # energy^T[j, i] = sum_c k[c, j] * q[c, i]  (lane-axis softmax).
            # TODO(synk): flash-style tile this (HW,HW) energy for large HW.
            et = lax.dot_general(ks[ki], qs[qi], (((0,), (0,)), ((), ())),
                                 preferred_element_type=jnp.float32)   # (HW, HW)
            et = et - jnp.max(et, axis=-1, keepdims=True)
            p = jnp.exp(et)                                            # f32
            att_t = (p * pl.reciprocal(jnp.sum(p, axis=-1, keepdims=True),
                                       approx=True)).astype(jnp.bfloat16)
            out = jnp.dot(vs[vi], att_t, preferred_element_type=jnp.float32)
            # (1 + gamma_g) is folded into conv1's taps at pack time (linearity).
            outs[g].append(out.astype(jnp.bfloat16))

    cat = jnp.concatenate(
        [jnp.concatenate(outs[g], axis=1) for g in range(3)], axis=0)  # (3C, L) bf16

    masks = masks_ref[...]                                             # (9, L) f32

    def conv3x3_bn_relu(slab, taps_ref, scale, shift):
        # 3x3 / pad=1 / stride=1 conv as 9 bf16 tap matmuls (f32 acc); the +-1
        # pixel shifts are pltpu.roll on the lane axis + boundary masks, so the
        # cross-image / wrap-around lanes are zeroed exactly.
        acc = jnp.dot(taps_ref[4], slab, preferred_element_type=jnp.float32)
        for tt in range(9):
            if tt == 4:
                continue                                   # center tap, no shift
            dy, dx = tt // 3 - 1, tt % 3 - 1
            off = dy * W + dx
            y = jnp.dot(taps_ref[tt], slab, preferred_element_type=jnp.float32)
            acc = acc + pltpu.roll(y, shift=(-off) % L, axis=1) * masks[tt:tt + 1]
        return jnp.maximum(acc * scale + shift, 0.0)       # eval-mode BN + ReLU

    out = conv3x3_bn_relu(cat, c1_ref, s1_ref[...], b1_ref[...])       # (C, L) f32
    f5 = jnp.concatenate([f5_ref[i] for i in range(n)], axis=1)        # (C, L) f32
    d5_in = jnp.concatenate([f5 * out, f5 + out], axis=0).astype(jnp.bfloat16)
    o_ref[0] = conv3x3_bn_relu(d5_in, c2_ref, s2_ref[...], b2_ref[...])


# ------------------------------- JAX wrapper --------------------------------

def _pick_group(B, HW):
    """Images per grid step so conv/output slabs are lane-dense (>=128 lanes)."""
    if HW % 128 == 0:
        return 1
    for cand in range(2, B + 1):
        if B % cand == 0 and (cand * HW) % 128 == 0 and cand * HW <= 4096:
            return cand
    return 1


def _tap_masks(H, W, n):
    """(9, n*HW) validity masks for the 3x3 conv taps (zero-padding boundaries)."""
    idx = np.arange(H * W)
    r, c = idx // W, idx % W
    rows = []
    for tt in range(9):
        dy, dx = tt // 3 - 1, tt % 3 - 1
        ok = (r + dy >= 0) & (r + dy < H) & (c + dx >= 0) & (c + dx < W)
        rows.append(ok.astype(np.float32))
    return jnp.asarray(np.tile(np.stack(rows, axis=0), (1, n)))


def pack_params(p, C):
    """Re-layout the PyTorch-style parameters into the fused kernel's format."""
    mods = ("rgb", "d", "t")
    Cq = C // 8
    Cqp = ((Cq + 7) // 8) * 8                 # pad q/k rows to a sublane multiple

    def pad_rows(a, rows):
        if a.shape[0] == rows:
            return a
        pad = jnp.zeros((rows - a.shape[0],) + a.shape[1:], a.dtype)
        return jnp.concatenate([a, pad], axis=0)

    wqkv, bqkv = [], []
    for m in mods:
        wqkv.append(jnp.concatenate([
            pad_rows(p[f"{m}_q_w"], Cqp),
            pad_rows(p[f"{m}_k_w"], Cqp),
            p[f"{m}_v_w"]], axis=0))
        bqkv.append(jnp.concatenate([
            pad_rows(p[f"{m}_q_b"][:, None], Cqp),
            pad_rows(p[f"{m}_k_b"][:, None], Cqp),
            p[f"{m}_v_b"][:, None]], axis=0))

    # Fold (1 + gamma_g) into conv1's input-channel columns (conv1 is linear).
    gscale = jnp.concatenate([
        (1.0 + p["gamma_1"][0]) * jnp.ones((C,), jnp.float32),
        (1.0 + p["gamma_2"][0]) * jnp.ones((C,), jnp.float32),
        (1.0 + p["gamma_3"][0]) * jnp.ones((C,), jnp.float32)])
    conv1_w = p["conv1_w"] * gscale[None, :, None, None]

    return {
        "ca_w1t": jnp.stack([p[f"{m}_ca_w1"].T for m in mods]),   # (3, C, C//16)
        "ca_w2": jnp.stack([p[f"{m}_ca_w2"] for m in mods]),      # (3, C, C//16)
        "wqkv": jnp.stack(wqkv).astype(jnp.bfloat16),
        "bqkv": jnp.stack(bqkv),
        "conv1_taps": jnp.transpose(conv1_w, (2, 3, 0, 1))
                         .reshape(9, C, 3 * C).astype(jnp.bfloat16),
        "conv2_taps": jnp.transpose(p["conv2_w"], (2, 3, 0, 1))
                         .reshape(9, C, 2 * C).astype(jnp.bfloat16),
        "bn1_scale": p["bn1_scale"], "bn1_shift": p["bn1_shift"],
        "bn2_scale": p["bn2_scale"], "bn2_shift": p["bn2_shift"],
    }


def attention_forward(packed, rgb, d, t, f5):
    B, C, H, W = rgb.shape
    HW = H * W
    Cqp = (packed["wqkv"].shape[1] - C) // 2
    n = _pick_group(B, HW)
    L = n * HW
    G = B // n

    def flat(a):                                   # free reshape, no HBM copy
        return a.reshape(B, C, HW)

    masks = _tap_masks(H, W, n)
    kernel = functools.partial(_attention_kernel, C=C, H=H, W=W, Cqp=Cqp, n=n)

    def act_spec():
        return pl.BlockSpec((n, C, HW), lambda b: (b, 0, 0))

    def full(shape):
        return pl.BlockSpec(shape, lambda b: (0,) * len(shape))

    # Rough in-kernel live set (double-buffered activation blocks + temporaries).
    est = 4 * (8 * 2 * n * C * HW + 2 * C * L + 3 * (2 * Cqp + C) * HW
               + 3 * HW * HW + 10 * C * L + 9 * C * 5 * C)
    vmem_limit = int(min(max(2 * est, 32 * 1024 * 1024), 64 * 1024 * 1024))

    out = pl.pallas_call(
        kernel,
        out_shape=jax.ShapeDtypeStruct((G, C, L), jnp.float32),
        grid=(G,),
        in_specs=[
            act_spec(), act_spec(), act_spec(), act_spec(),   # rgb, d, t, f5
            full((9, L)),                                     # conv-tap boundary masks
            full((3, C, C // 16)),                            # CA fc1^T (stacked)
            full((3, C, C // 16)),                            # CA fc2   (stacked)
            full((3, 2 * Cqp + C, C)),                        # stacked QKV weights (bf16)
            full((3, 2 * Cqp + C, 1)),                        # stacked QKV bias
            full((9, C, 3 * C)),                              # conv1 taps (bf16, gamma folded)
            full((9, C, 2 * C)),                              # conv2 taps (bf16)
            full((C, 1)), full((C, 1)),                       # BN1 scale/shift
            full((C, 1)), full((C, 1)),                       # BN2 scale/shift
        ],
        out_specs=pl.BlockSpec((1, C, L), lambda b: (b, 0, 0)),   # lane-dense store
        compiler_params=pltpu.CompilerParams(
            dimension_semantics=("parallel",),
            vmem_limit_bytes=vmem_limit),
    )(flat(rgb), flat(d), flat(t), flat(f5), masks,
      packed["ca_w1t"], packed["ca_w2"], packed["wqkv"], packed["bqkv"],
      packed["conv1_taps"], packed["conv2_taps"],
      packed["bn1_scale"], packed["bn1_shift"],
      packed["bn2_scale"], packed["bn2_shift"])

    # (G, C, n*HW) -> (B, C, H, W): layout plumbing outside the kernel.
    return out.reshape(G, C, n, HW).transpose(0, 2, 1, 3).reshape(B, C, H, W)


# ------------------------------- parameters --------------------------------

def _uniform(key, shape, fan_in):
    bound = 1.0 / math.sqrt(fan_in)
    return jax.random.uniform(key, shape, jnp.float32, -bound, bound)


def init_params(key, C):
    C16 = C // 16
    C8 = C // 8
    ks = iter(jax.random.split(key, 64))
    p = {}
    for m in ("rgb", "d", "t"):
        p[f"{m}_ca_w1"] = _uniform(next(ks), (C16, C), C)       # fc1, no bias
        p[f"{m}_ca_w2"] = _uniform(next(ks), (C, C16), C16)     # fc2, no bias
        p[f"{m}_q_w"] = _uniform(next(ks), (C8, C), C)
        p[f"{m}_q_b"] = _uniform(next(ks), (C8,), C)
        p[f"{m}_k_w"] = _uniform(next(ks), (C8, C), C)
        p[f"{m}_k_b"] = _uniform(next(ks), (C8,), C)
        p[f"{m}_v_w"] = _uniform(next(ks), (C, C), C)
        p[f"{m}_v_b"] = _uniform(next(ks), (C,), C)
    p["gamma_1"] = 0.1 * jax.random.normal(next(ks), (1,), jnp.float32)
    p["gamma_2"] = 0.1 * jax.random.normal(next(ks), (1,), jnp.float32)
    p["gamma_3"] = 0.1 * jax.random.normal(next(ks), (1,), jnp.float32)
    p["conv1_w"] = _uniform(next(ks), (C, 3 * C, 3, 3), 3 * C * 9)
    p["conv2_w"] = _uniform(next(ks), (C, 2 * C, 3, 3), 2 * C * 9)
    eps = 1e-5  # BatchNorm2d eval-mode with default running stats
    p["bn1_scale"] = jnp.full((C, 1), 1.0 / math.sqrt(1.0 + eps), jnp.float32)
    p["bn1_shift"] = jnp.zeros((C, 1), jnp.float32)
    p["bn2_scale"] = jnp.full((C, 1), 1.0 / math.sqrt(1.0 + eps), jnp.float32)
    p["bn2_shift"] = jnp.zeros((C, 1), jnp.float32)
    return p


# ---------------------------- pure-JAX reference ----------------------------

def reference_forward(p, rgb, d, t, f5):
    hp = lax.Precision.HIGHEST
    inv = 1.0 / math.sqrt(1.0 + 1e-5)

    def ca(x, w1, w2):
        m = jnp.max(x, axis=(2, 3), keepdims=True)
        h = jnp.maximum(jnp.einsum("oc,bcij->boij", w1, m, precision=hp), 0.0)
        s = jax.nn.sigmoid(jnp.einsum("oc,bcij->boij", w2, h, precision=hp))
        return s * x

    def conv1x1(x, w, b):
        return jnp.einsum("oc,bchw->bohw", w, x, precision=hp) + b[None, :, None, None]

    def conv3x3_bn_relu(x, w):
        y = lax.conv_general_dilated(x, w, (1, 1), ((1, 1), (1, 1)),
                                     dimension_numbers=("NCHW", "OIHW", "NCHW"),
                                     precision=hp)
        return jnp.maximum(y * inv, 0.0)

    def xattn(q, k, v, gamma):
        B, Cq, H, W = q.shape
        C = v.shape[1]
        qf = q.reshape(B, Cq, H * W)
        kf = k.reshape(B, Cq, H * W)
        vf = v.reshape(B, C, H * W)
        energy = jnp.einsum("bci,bcj->bij", qf, kf, precision=hp)
        att = jax.nn.softmax(energy, axis=1)
        out = jnp.einsum("bcj,bmj->bcm", vf, att, precision=hp).reshape(B, C, H, W)
        return gamma[0] * out + out

    rgb = ca(rgb, p["rgb_ca_w1"], p["rgb_ca_w2"])
    d = ca(d, p["d_ca_w1"], p["d_ca_w2"])
    t = ca(t, p["t_ca_w1"], p["t_ca_w2"])

    rgb_q = conv1x1(rgb, p["rgb_q_w"], p["rgb_q_b"]); rgb_k = conv1x1(rgb, p["rgb_k_w"], p["rgb_k_b"]); rgb_v = conv1x1(rgb, p["rgb_v_w"], p["rgb_v_b"])
    d_q = conv1x1(d, p["d_q_w"], p["d_q_b"]); d_k = conv1x1(d, p["d_k_w"], p["d_k_b"]); d_v = conv1x1(d, p["d_v_w"], p["d_v_b"])
    t_q = conv1x1(t, p["t_q_w"], p["t_q_b"]); t_k = conv1x1(t, p["t_k_w"], p["t_k_b"]); t_v = conv1x1(t, p["t_v_w"], p["t_v_b"])

    out1 = xattn(d_q, t_k, rgb_v, p["gamma_1"])
    out2 = xattn(t_q, rgb_k, d_v, p["gamma_2"])
    out3 = xattn(rgb_q, d_k, t_v, p["gamma_3"])

    out = conv3x3_bn_relu(jnp.concatenate([out1, out2, out3], axis=1), p["conv1_w"])
    d5 = conv3x3_bn_relu(jnp.concatenate([f5 * out, f5 + out], axis=1), p["conv2_w"])
    return d5


# ---------------------------------- main ------------------------------------

if __name__ == "__main__":
    B, C, H, W = 2, 32, 8, 8
    key = jax.random.PRNGKey(0)
    kp, k1, k2, k3, k4 = jax.random.split(key, 5)
    params = init_params(kp, C)
    rgb = jax.random.normal(k1, (B, C, H, W), jnp.float32)
    d = jax.random.normal(k2, (B, C, H, W), jnp.float32)
    t = jax.random.normal(k3, (B, C, H, W), jnp.float32)
    f5 = jax.random.normal(k4, (B, C, H, W), jnp.float32)

    packed = pack_params(params, C)
    fwd = jax.jit(attention_forward)
    out = jax.block_until_ready(fwd(packed, rgb, d, t, f5))
    ref = jax.block_until_ready(reference_forward(params, rgb, d, t, f5))

    assert out.shape == (B, C, H, W)
    assert bool(jnp.all(jnp.isfinite(out)))
    err = float(jnp.max(jnp.abs(out - ref)))
    assert err < 5e-2, f"mismatch vs reference: {err}"
    print("KERNEL_OK")
</pallas_src>

<mosaic_0001>
module attributes {stable_mosaic.version = 11 : i64} {
  func.func @_attention_kernel(%arg0: i32, %arg1: memref<2x32x64xf32, #tpu.memory_space<vmem>>, %arg2: memref<2x32x64xf32, #tpu.memory_space<vmem>>, %arg3: memref<2x32x64xf32, #tpu.memory_space<vmem>>, %arg4: memref<2x32x64xf32, #tpu.memory_space<vmem>>, %arg5: memref<9x128xf32, #tpu.memory_space<vmem>>, %arg6: memref<3x32x2xf32, #tpu.memory_space<vmem>>, %arg7: memref<3x32x2xf32, #tpu.memory_space<vmem>>, %arg8: memref<3x48x32xbf16, #tpu.memory_space<vmem>>, %arg9: memref<3x48x1xf32, #tpu.memory_space<vmem>>, %arg10: memref<9x32x96xbf16, #tpu.memory_space<vmem>>, %arg11: memref<9x32x64xbf16, #tpu.memory_space<vmem>>, %arg12: memref<32x1xf32, #tpu.memory_space<vmem>>, %arg13: memref<32x1xf32, #tpu.memory_space<vmem>>, %arg14: memref<32x1xf32, #tpu.memory_space<vmem>>, %arg15: memref<32x1xf32, #tpu.memory_space<vmem>>, %arg16: memref<1x32x128xf32, #tpu.memory_space<vmem>>) attributes {dimension_semantics = [#tpu.dimension_semantics<parallel>], iteration_bounds = array<i64: 1>, scalar_prefetch = 0 : i64, scratch_operands = 0 : i64, tpu.core_type = #tpu.core_type<tc>, window_params = [{transform_indices = @transform_0, window_bounds = array<i64: 2, 32, 64>}, {transform_indices = @transform_1, window_bounds = array<i64: 2, 32, 64>}, {transform_indices = @transform_2, window_bounds = array<i64: 2, 32, 64>}, {transform_indices = @transform_3, window_bounds = array<i64: 2, 32, 64>}, {pipeline_mode = #tpu.pipeline_mode<synchronous>, transform_indices = @transform_4, window_bounds = array<i64: 9, 128>}, {pipeline_mode = #tpu.pipeline_mode<synchronous>, transform_indices = @transform_5, window_bounds = array<i64: 3, 32, 2>}, {pipeline_mode = #tpu.pipeline_mode<synchronous>, transform_indices = @transform_6, window_bounds = array<i64: 3, 32, 2>}, {pipeline_mode = #tpu.pipeline_mode<synchronous>, transform_indices = @transform_7, window_bounds = array<i64: 3, 48, 32>}, {pipeline_mode = #tpu.pipeline_mode<synchronous>, transform_indices = @transform_8, window_bounds = array<i64: 3, 48, 1>}, {pipeline_mode = #tpu.pipeline_mode<synchronous>, transform_indices = @transform_9, window_bounds = array<i64: 9, 32, 96>}, {pipeline_mode = #tpu.pipeline_mode<synchronous>, transform_indices = @transform_10, window_bounds = array<i64: 9, 32, 64>}, {pipeline_mode = #tpu.pipeline_mode<synchronous>, transform_indices = @transform_11, window_bounds = array<i64: 32, 1>}, {pipeline_mode = #tpu.pipeline_mode<synchronous>, transform_indices = @transform_12, window_bounds = array<i64: 32, 1>}, {pipeline_mode = #tpu.pipeline_mode<synchronous>, transform_indices = @transform_13, window_bounds = array<i64: 32, 1>}, {pipeline_mode = #tpu.pipeline_mode<synchronous>, transform_indices = @transform_14, window_bounds = array<i64: 32, 1>}, {transform_indices = @transform_15, window_bounds = array<i64: 1, 32, 128>}]} {
    %c0 = arith.constant 0 : index
    %c0_0 = arith.constant 0 : index
    %c0_1 = arith.constant 0 : index
    %0 = vector.load %arg1[%c0, %c0_0, %c0_1] : memref<2x32x64xf32, #tpu.memory_space<vmem>>, vector<1x32x64xf32>
    %1 = vector.shape_cast %0 : vector<1x32x64xf32> to vector<32x64xf32>
    %cst = arith.constant dense<0xFF800000> : vector<32xf32>
    %2 = vector.multi_reduction <maximumf>, %1, %cst [1] : vector<32x64xf32> to vector<32xf32>
    %3 = vector.shape_cast %2 : vector<32xf32> to vector<32x1xf32>
    %c0_2 = arith.constant 0 : index
    %c0_3 = arith.constant 0 : index
    %c0_4 = arith.constant 0 : index
    %4 = vector.load %arg6[%c0_2, %c0_3, %c0_4] : memref<3x32x2xf32, #tpu.memory_space<vmem>>, vector<1x32x2xf32>
    %5 = vector.shape_cast %4 : vector<1x32x2xf32> to vector<32x2xf32>
    %6 = vector.broadcast %3 : vector<32x1xf32> to vector<32x2xf32>
    %7 = arith.mulf %5, %6 : vector<32x2xf32>
    %cst_5 = arith.constant dense<0.000000e+00> : vector<2xf32>
    %8 = vector.multi_reduction <add>, %7, %cst_5 [0] : vector<32x2xf32> to vector<2xf32>
    %9 = vector.shape_cast %8 : vector<2xf32> to vector<1x2xf32>
    %cst_6 = arith.constant 0.000000e+00 : f32
    %10 = vector.broadcast %cst_6 : f32 to vector<1x2xf32>
    %11 = arith.maximumf %9, %10 : vector<1x2xf32>
    %c0_7 = arith.constant 0 : index
    %c0_8 = arith.constant 0 : index
    %c0_9 = arith.constant 0 : index
    %12 = vector.load %arg7[%c0_7, %c0_8, %c0_9] : memref<3x32x2xf32, #tpu.memory_space<vmem>>, vector<1x32x2xf32>
    %13 = vector.shape_cast %12 : vector<1x32x2xf32> to vector<32x2xf32>
    %14 = vector.broadcast %11 : vector<1x2xf32> to vector<32x2xf32>
    %15 = arith.mulf %13, %14 : vector<32x2xf32>
    %cst_10 = arith.constant dense<0.000000e+00> : vector<32xf32>
    %16 = vector.multi_reduction <add>, %15, %cst_10 [1] : vector<32x2xf32> to vector<32xf32>
    %17 = vector.shape_cast %16 : vector<32xf32> to vector<32x1xf32>
    %18 = arith.negf %17 : vector<32x1xf32>
    %19 = math.exp %18 : vector<32x1xf32>
    %cst_11 = arith.constant 1.000000e+00 : f32
    %20 = vector.broadcast %cst_11 : f32 to vector<32x1xf32>
    %21 = arith.addf %20, %19 : vector<32x1xf32>
    %22 = arith.divf %20, %21 : vector<32x1xf32>
    %23 = vector.broadcast %22 : vector<32x1xf32> to vector<32x64xf32>
    %24 = arith.mulf %1, %23 : vector<32x64xf32>
    %25 = arith.truncf %24 : vector<32x64xf32> to vector<32x64xbf16>
    %c0_12 = arith.constant 0 : index
    %c0_13 = arith.constant 0 : index
    %c0_14 = arith.constant 0 : index
    %26 = vector.load %arg8[%c0_12, %c0_13, %c0_14] : memref<3x48x32xbf16, #tpu.memory_space<vmem>>, vector<1x48x32xbf16>
    %27 = vector.shape_cast %26 : vector<1x48x32xbf16> to vector<48x32xbf16>
    %cst_15 = arith.constant dense<0.000000e+00> : vector<48x64xf32>
    %28 = tpu.matmul %27, %25, %cst_15 {dimension_numbers = #tpu.dot_dimension_numbers<[1], [0], [0], [1], [0, 0, 1, 1], [], []>} : vector<48x32xbf16>, vector<32x64xbf16>, vector<48x64xf32> -> vector<48x64xf32>
    %c0_16 = arith.constant 0 : index
    %c0_17 = arith.constant 0 : index
    %c0_18 = arith.constant 0 : index
    %29 = vector.load %arg9[%c0_16, %c0_17, %c0_18] : memref<3x48x1xf32, #tpu.memory_space<vmem>>, vector<1x48x1xf32>
    %30 = vector.shape_cast %29 : vector<1x48x1xf32> to vector<48x1xf32>
    %31 = vector.broadcast %30 : vector<48x1xf32> to vector<48x64xf32>
    %32 = arith.addf %28, %31 : vector<48x64xf32>
    %33 = vector.extract_strided_slice %32 {offsets = [0, 0], sizes = [8, 64], strides = [1, 1]} : vector<48x64xf32> to vector<8x64xf32>
    %34 = arith.truncf %33 : vector<8x64xf32> to vector<8x64xbf16>
    %35 = vector.extract_strided_slice %32 {offsets = [8, 0], sizes = [8, 64], strides = [1, 1]} : vector<48x64xf32> to vector<8x64xf32>
    %36 = arith.truncf %35 : vector<8x64xf32> to vector<8x64xbf16>
    %37 = vector.extract_strided_slice %32 {offsets = [16, 0], sizes = [32, 64], strides = [1, 1]} : vector<48x64xf32> to vector<32x64xf32>
    %38 = arith.truncf %37 : vector<32x64xf32> to vector<32x64xbf16>
    %c0_19 = arith.constant 0 : index
    %c0_20 = arith.constant 0 : index
    %c0_21 = arith.constant 0 : index
    %39 = vector.load %arg2[%c0_19, %c0_20, %c0_21] : memref<2x32x64xf32, #tpu.memory_space<vmem>>, vector<1x32x64xf32>
    %40 = vector.shape_cast %39 : vector<1x32x64xf32> to vector<32x64xf32>
    %cst_22 = arith.constant dense<0xFF800000> : vector<32xf32>
    %41 = vector.multi_reduction <maximumf>, %40, %cst_22 [1] : vector<32x64xf32> to vector<32xf32>
    %42 = vector.shape_cast %41 : vector<32xf32> to vector<32x1xf32>
    %c1 = arith.constant 1 : index
    %c0_23 = arith.constant 0 : index
    %c0_24 = arith.constant 0 : index
    %43 = vector.load %arg6[%c1, %c0_23, %c0_24] : memref<3x32x2xf32, #tpu.memory_space<vmem>>, vector<1x32x2xf32>
    %44 = vector.shape_cast %43 : vector<1x32x2xf32> to vector<32x2xf32>
    %45 = vector.broadcast %42 : vector<32x1xf32> to vector<32x2xf32>
    %46 = arith.mulf %44, %45 : vector<32x2xf32>
    %cst_25 = arith.constant dense<0.000000e+00> : vector<2xf32>
    %47 = vector.multi_reduction <add>, %46, %cst_25 [0] : vector<32x2xf32> to vector<2xf32>
    %48 = vector.shape_cast %47 : vector<2xf32> to vector<1x2xf32>
    %cst_26 = arith.constant 0.000000e+00 : f32
    %49 = vector.broadcast %cst_26 : f32 to vector<1x2xf32>
    %50 = arith.maximumf %48, %49 : vector<1x2xf32>
    %c1_27 = arith.constant 1 : index
    %c0_28 = arith.constant 0 : index
    %c0_29 = arith.constant 0 : index
    %51 = vector.load %arg7[%c1_27, %c0_28, %c0_29] : memref<3x32x2xf32, #tpu.memory_space<vmem>>, vector<1x32x2xf32>
    %52 = vector.shape_cast %51 : vector<1x32x2xf32> to vector<32x2xf32>
    %53 = vector.broadcast %50 : vector<1x2xf32> to vector<32x2xf32>
    %54 = arith.mulf %52, %53 : vector<32x2xf32>
    %cst_30 = arith.constant dense<0.000000e+00> : vector<32xf32>
    %55 = vector.multi_reduction <add>, %54, %cst_30 [1] : vector<32x2xf32> to vector<32xf32>
    %56 = vector.shape_cast %55 : vector<32xf32> to vector<32x1xf32>
    %57 = arith.negf %56 : vector<32x1xf32>
    %58 = math.exp %57 : vector<32x1xf32>
    %cst_31 = arith.constant 1.000000e+00 : f32
    %59 = vector.broadcast %cst_31 : f32 to vector<32x1xf32>
    %60 = arith.addf %59, %58 : vector<32x1xf32>
    %61 = arith.divf %59, %60 : vector<32x1xf32>
    %62 = vector.broadcast %61 : vector<32x1xf32> to vector<32x64xf32>
    %63 = arith.mulf %40, %62 : vector<32x64xf32>
    %64 = arith.truncf %63 : vector<32x64xf32> to vector<32x64xbf16>
    %c1_32 = arith.constant 1 : index
    %c0_33 = arith.constant 0 : index
    %c0_34 = arith.constant 0 : index
    %65 = vector.load %arg8[%c1_32, %c0_33, %c0_34] : memref<3x48x32xbf16, #tpu.memory_space<vmem>>, vector<1x48x32xbf16>
    %66 = vector.shape_cast %65 : vector<1x48x32xbf16> to vector<48x32xbf16>
    %cst_35 = arith.constant dense<0.000000e+00> : vector<48x64xf32>
    %67 = tpu.matmul %66, %64, %cst_35 {dimension_numbers = #tpu.dot_dimension_numbers<[1], [0], [0], [1], [0, 0, 1, 1], [], []>} : vector<48x32xbf16>, vector<32x64xbf16>, vector<48x64xf32> -> vector<48x64xf32>
    %c1_36 = arith.constant 1 : index
    %c0_37 = arith.constant 0 : index
    %c0_38 = arith.constant 0 : index
    %68 = vector.load %arg9[%c1_36, %c0_37, %c0_38] : memref<3x48x1xf32, #tpu.memory_space<vmem>>, vector<1x48x1xf32>
    %69 = vector.shape_cast %68 : vector<1x48x1xf32> to vector<48x1xf32>
    %70 = vector.broadcast %69 : vector<48x1xf32> to vector<48x64xf32>
    %71 = arith.addf %67, %70 : vector<48x64xf32>
    %72 = vector.extract_strided_slice %71 {offsets = [0, 0], sizes = [8, 64], strides = [1, 1]} : vector<48x64xf32> to vector<8x64xf32>
    %73 = arith.truncf %72 : vector<8x64xf32> to vector<8x64xbf16>
    %74 = vector.extract_strided_slice %71 {offsets = [8, 0], sizes = [8, 64], strides = [1, 1]} : vector<48x64xf32> to vector<8x64xf32>
    %75 = arith.truncf %74 : vector<8x64xf32> to vector<8x64xbf16>
    %76 = vector.extract_strided_slice %71 {offsets = [16, 0], sizes = [32, 64], strides = [1, 1]} : vector<48x64xf32> to vector<32x64xf32>
    %77 = arith.truncf %76 : vector<32x64xf32> to vector<32x64xbf16>
    %c0_39 = arith.constant 0 : index
    %c0_40 = arith.constant 0 : index
    %c0_41 = arith.constant 0 : index
    %78 = vector.load %arg3[%c0_39, %c0_40, %c0_41] : memref<2x32x64xf32, #tpu.memory_space<vmem>>, vector<1x32x64xf32>
    %79 = vector.shape_cast %78 : vector<1x32x64xf32> to vector<32x64xf32>
    %cst_42 = arith.constant dense<0xFF800000> : vector<32xf32>
    %80 = vector.multi_reduction <maximumf>, %79, %cst_42 [1] : vector<32x64xf32> to vector<32xf32>
    %81 = vector.shape_cast %80 : vector<32xf32> to vector<32x1xf32>
    %c2 = arith.constant 2 : index
    %c0_43 = arith.constant 0 : index
    %c0_44 = arith.constant 0 : index
    %82 = vector.load %arg6[%c2, %c0_43, %c0_44] : memref<3x32x2xf32, #tpu.memory_space<vmem>>, vector<1x32x2xf32>
    %83 = vector.shape_cast %82 : vector<1x32x2xf32> to vector<32x2xf32>
    %84 = vector.broadcast %81 : vector<32x1xf32> to vector<32x2xf32>
    %85 = arith.mulf %83, %84 : vector<32x2xf32>
    %cst_45 = arith.constant dense<0.000000e+00> : vector<2xf32>
    %86 = vector.multi_reduction <add>, %85, %cst_45 [0] : vector<32x2xf32> to vector<2xf32>
    %87 = vector.shape_cast %86 : vector<2xf32> to vector<1x2xf32>
    %cst_46 = arith.constant 0.000000e+00 : f32
    %88 = vector.broadcast %cst_46 : f32 to vector<1x2xf32>
    %89 = arith.maximumf %87, %88 : vector<1x2xf32>
    %c2_47 = arith.constant 2 : index
    %c0_48 = arith.constant 0 : index
    %c0_49 = arith.constant 0 : index
    %90 = vector.load %arg7[%c2_47, %c0_48, %c0_49] : memref<3x32x2xf32, #tpu.memory_space<vmem>>, vector<1x32x2xf32>
    %91 = vector.shape_cast %90 : vector<1x32x2xf32> to vector<32x2xf32>
    %92 = vector.broadcast %89 : vector<1x2xf32> to vector<32x2xf32>
    %93 = arith.mulf %91, %92 : vector<32x2xf32>
    %cst_50 = arith.constant dense<0.000000e+00> : vector<32xf32>
    %94 = vector.multi_reduction <add>, %93, %cst_50 [1] : vector<32x2xf32> to vector<32xf32>
    %95 = vector.shape_cast %94 : vector<32xf32> to vector<32x1xf32>
    %96 = arith.negf %95 : vector<32x1xf32>
    %97 = math.exp %96 : vector<32x1xf32>
    %cst_51 = arith.constant 1.000000e+00 : f32
    %98 = vector.broadcast %cst_51 : f32 to vector<32x1xf32>
    %99 = arith.addf %98, %97 : vector<32x1xf32>
    %100 = arith.divf %98, %99 : vector<32x1xf32>
    %101 = vector.broadcast %100 : vector<32x1xf32> to vector<32x64xf32>
    %102 = arith.mulf %79, %101 : vector<32x64xf32>
    %103 = arith.truncf %102 : vector<32x64xf32> to vector<32x64xbf16>
    %c2_52 = arith.constant 2 : index
    %c0_53 = arith.constant 0 : index
    %c0_54 = arith.constant 0 : index
    %104 = vector.load %arg8[%c2_52, %c0_53, %c0_54] : memref<3x48x32xbf16, #tpu.memory_space<vmem>>, vector<1x48x32xbf16>
    %105 = vector.shape_cast %104 : vector<1x48x32xbf16> to vector<48x32xbf16>
    %cst_55 = arith.constant dense<0.000000e+00> : vector<48x64xf32>
    %106 = tpu.matmul %105, %103, %cst_55 {dimension_numbers = #tpu.dot_dimension_numbers<[1], [0], [0], [1], [0, 0, 1, 1], [], []>} : vector<48x32xbf16>, vector<32x64xbf16>, vector<48x64xf32> -> vector<48x64xf32>
    %c2_56 = arith.constant 2 : index
    %c0_57 = arith.constant 0 : index
    %c0_58 = arith.constant 0 : index
    %107 = vector.load %arg9[%c2_56, %c0_57, %c0_58] : memref<3x48x1xf32, #tpu.memory_space<vmem>>, vector<1x48x1xf32>
    %108 = vector.shape_cast %107 : vector<1x48x1xf32> to vector<48x1xf32>
    %109 = vector.broadcast %108 : vector<48x1xf32> to vector<48x64xf32>
    %110 = arith.addf %106, %109 : vector<48x64xf32>
    %111 = vector.extract_strided_slice %110 {offsets = [0, 0], sizes = [8, 64], strides = [1, 1]} : vector<48x64xf32> to vector<8x64xf32>
    %112 = arith.truncf %111 : vector<8x64xf32> to vector<8x64xbf16>
    %113 = vector.extract_strided_slice %110 {offsets = [8, 0], sizes = [8, 64], strides = [1, 1]} : vector<48x64xf32> to vector<8x64xf32>
    %114 = arith.truncf %113 : vector<8x64xf32> to vector<8x64xbf16>
    %115 = vector.extract_strided_slice %110 {offsets = [16, 0], sizes = [32, 64], strides = [1, 1]} : vector<48x64xf32> to vector<32x64xf32>
    %116 = arith.truncf %115 : vector<32x64xf32> to vector<32x64xbf16>
    %cst_59 = arith.constant dense<0.000000e+00> : vector<64x64xf32>
    %117 = tpu.matmul %114, %73, %cst_59 {dimension_numbers = #tpu.dot_dimension_numbers<[0], [0], [1], [1], [0, 1, 1, 1], [], []>} : vector<8x64xbf16>, vector<8x64xbf16>, vector<64x64xf32> -> vector<64x64xf32>
    %cst_60 = arith.constant dense<0xFF800000> : vector<64xf32>
    %118 = vector.multi_reduction <maximumf>, %117, %cst_60 [1] : vector<64x64xf32> to vector<64xf32>
    %119 = vector.shape_cast %118 : vector<64xf32> to vector<64x1xf32>
    %120 = vector.broadcast %119 : vector<64x1xf32> to vector<64x64xf32>
    %121 = arith.subf %117, %120 : vector<64x64xf32>
    %122 = math.exp %121 : vector<64x64xf32>
    %cst_61 = arith.constant dense<0.000000e+00> : vector<64xf32>
    %123 = vector.multi_reduction <add>, %122, %cst_61 [1] : vector<64x64xf32> to vector<64xf32>
    %124 = vector.shape_cast %123 : vector<64xf32> to vector<64x1xf32>
    %125 = tpu.reciprocal %124 {approx = true} : vector<64x1xf32> -> vector<64x1xf32>
    %126 = vector.broadcast %125 : vector<64x1xf32> to vector<64x64xf32>
    %127 = arith.mulf %122, %126 : vector<64x64xf32>
    %128 = arith.truncf %127 : vector<64x64xf32> to vector<64x64xbf16>
    %cst_62 = arith.constant dense<0.000000e+00> : vector<32x64xf32>
    %129 = tpu.matmul %38, %128, %cst_62 {dimension_numbers = #tpu.dot_dimension_numbers<[1], [0], [0], [1], [0, 0, 1, 1], [], []>} : vector<32x64xbf16>, vector<64x64xbf16>, vector<32x64xf32> -> vector<32x64xf32>
    %130 = arith.truncf %129 : vector<32x64xf32> to vector<32x64xbf16>
    %cst_63 = arith.constant dense<0.000000e+00> : vector<64x64xf32>
    %131 = tpu.matmul %36, %112, %cst_63 {dimension_numbers = #tpu.dot_dimension_numbers<[0], [0], [1], [1], [0, 1, 1, 1], [], []>} : vector<8x64xbf16>, vector<8x64xbf16>, vector<64x64xf32> -> vector<64x64xf32>
    %cst_64 = arith.constant dense<0xFF800000> : vector<64xf32>
    %132 = vector.multi_reduction <maximumf>, %131, %cst_64 [1] : vector<64x64xf32> to vector<64xf32>
    %133 = vector.shape_cast %132 : vector<64xf32> to vector<64x1xf32>
    %134 = vector.broadcast %133 : vector<64x1xf32> to vector<64x64xf32>
    %135 = arith.subf %131, %134 : vector<64x64xf32>
    %136 = math.exp %135 : vector<64x64xf32>
    %cst_65 = arith.constant dense<0.000000e+00> : vector<64xf32>
    %137 = vector.multi_reduction <add>, %136, %cst_65 [1] : vector<64x64xf32> to vector<64xf32>
    %138 = vector.shape_cast %137 : vector<64xf32> to vector<64x1xf32>
    %139 = tpu.reciprocal %138 {approx = true} : vector<64x1xf32> -> vector<64x1xf32>
    %140 = vector.broadcast %139 : vector<64x1xf32> to vector<64x64xf32>
    %141 = arith.mulf %136, %140 : vector<64x64xf32>
    %142 = arith.truncf %141 : vector<64x64xf32> to vector<64x64xbf16>
    %cst_66 = arith.constant dense<0.000000e+00> : vector<32x64xf32>
    %143 = tpu.matmul %77, %142, %cst_66 {dimension_numbers = #tpu.dot_dimension_numbers<[1], [0], [0], [1], [0, 0, 1, 1], [], []>} : vector<32x64xbf16>, vector<64x64xbf16>, vector<32x64xf32> -> vector<32x64xf32>
    %144 = arith.truncf %143 : vector<32x64xf32> to vector<32x64xbf16>
    %cst_67 = arith.constant dense<0.000000e+00> : vector<64x64xf32>
    %145 = tpu.matmul %75, %34, %cst_67 {dimension_numbers = #tpu.dot_dimension_numbers<[0], [0], [1], [1], [0, 1, 1, 1], [], []>} : vector<8x64xbf16>, vector<8x64xbf16>, vector<64x64xf32> -> vector<64x64xf32>
    %cst_68 = arith.constant dense<0xFF800000> : vector<64xf32>
    %146 = vector.multi_reduction <maximumf>, %145, %cst_68 [1] : vector<64x64xf32> to vector<64xf32>
    %147 = vector.shape_cast %146 : vector<64xf32> to vector<64x1xf32>
    %148 = vector.broadcast %147 : vector<64x1xf32> to vector<64x64xf32>
    %149 = arith.subf %145, %148 : vector<64x64xf32>
    %150 = math.exp %149 : vector<64x64xf32>
    %cst_69 = arith.constant dense<0.000000e+00> : vector<64xf32>
    %151 = vector.multi_reduction <add>, %150, %cst_69 [1] : vector<64x64xf32> to vector<64xf32>
    %152 = vector.shape_cast %151 : vector<64xf32> to vector<64x1xf32>
    %153 = tpu.reciprocal %152 {approx = true} : vector<64x1xf32> -> vector<64x1xf32>
    %154 = vector.broadcast %153 : vector<64x1xf32> to vector<64x64xf32>
    %155 = arith.mulf %150, %154 : vector<64x64xf32>
    %156 = arith.truncf %155 : vector<64x64xf32> to vector<64x64xbf16>
    %cst_70 = arith.constant dense<0.000000e+00> : vector<32x64xf32>
    %157 = tpu.matmul %116, %156, %cst_70 {dimension_numbers = #tpu.dot_dimension_numbers<[1], [0], [0], [1], [0, 0, 1, 1], [], []>} : vector<32x64xbf16>, vector<64x64xbf16>, vector<32x64xf32> -> vector<32x64xf32>
    %158 = arith.truncf %157 : vector<32x64xf32> to vector<32x64xbf16>
    %c1_71 = arith.constant 1 : index
    %c0_72 = arith.constant 0 : index
    %c0_73 = arith.constant 0 : index
    %159 = vector.load %arg1[%c1_71, %c0_72, %c0_73] : memref<2x32x64xf32, #tpu.memory_space<vmem>>, vector<1x32x64xf32>
    %160 = vector.shape_cast %159 : vector<1x32x64xf32> to vector<32x64xf32>
    %cst_74 = arith.constant dense<0xFF800000> : vector<32xf32>
    %161 = vector.multi_reduction <maximumf>, %160, %cst_74 [1] : vector<32x64xf32> to vector<32xf32>
    %162 = vector.shape_cast %161 : vector<32xf32> to vector<32x1xf32>
    %c0_75 = arith.constant 0 : index
    %c0_76 = arith.constant 0 : index
    %c0_77 = arith.constant 0 : index
    %163 = vector.load %arg6[%c0_75, %c0_76, %c0_77] : memref<3x32x2xf32, #tpu.memory_space<vmem>>, vector<1x32x2xf32>
    %164 = vector.shape_cast %163 : vector<1x32x2xf32> to vector<32x2xf32>
    %165 = vector.broadcast %162 : vector<32x1xf32> to vector<32x2xf32>
    %166 = arith.mulf %164, %165 : vector<32x2xf32>
    %cst_78 = arith.constant dense<0.000000e+00> : vector<2xf32>
    %167 = vector.multi_reduction <add>, %166, %cst_78 [0] : vector<32x2xf32> to vector<2xf32>
    %168 = vector.shape_cast %167 : vector<2xf32> to vector<1x2xf32>
    %cst_79 = arith.constant 0.000000e+00 : f32
    %169 = vector.broadcast %cst_79 : f32 to vector<1x2xf32>
    %170 = arith.maximumf %168, %169 : vector<1x2xf32>
    %c0_80 = arith.constant 0 : index
    %c0_81 = arith.constant 0 : index
    %c0_82 = arith.constant 0 : index
    %171 = vector.load %arg7[%c0_80, %c0_81, %c0_82] : memref<3x32x2xf32, #tpu.memory_space<vmem>>, vector<1x32x2xf32>
    %172 = vector.shape_cast %171 : vector<1x32x2xf32> to vector<32x2xf32>
    %173 = vector.broadcast %170 : vector<1x2xf32> to vector<32x2xf32>
    %174 = arith.mulf %172, %173 : vector<32x2xf32>
    %cst_83 = arith.constant dense<0.000000e+00> : vector<32xf32>
    %175 = vector.multi_reduction <add>, %174, %cst_83 [1] : vector<32x2xf32> to vector<32xf32>
    %176 = vector.shape_cast %175 : vector<32xf32> to vector<32x1xf32>
    %177 = arith.negf %176 : vector<32x1xf32>
    %178 = math.exp %177 : vector<32x1xf32>
    %cst_84 = arith.constant 1.000000e+00 : f32
    %179 = vector.broadcast %cst_84 : f32 to vector<32x1xf32>
    %180 = arith.addf %179, %178 : vector<32x1xf32>
    %181 = arith.divf %179, %180 : vector<32x1xf32>
    %182 = vector.broadcast %181 : vector<32x1xf32> to vector<32x64xf32>
    %183 = arith.mulf %160, %182 : vector<32x64xf32>
    %184 = arith.truncf %183 : vector<32x64xf32> to vector<32x64xbf16>
    %c0_85 = arith.constant 0 : index
    %c0_86 = arith.constant 0 : index
    %c0_87 = arith.constant 0 : index
    %185 = vector.load %arg8[%c0_85, %c0_86, %c0_87] : memref<3x48x32xbf16, #tpu.memory_space<vmem>>, vector<1x48x32xbf16>
    %186 = vector.shape_cast %185 : vector<1x48x32xbf16> to vector<48x32xbf16>
    %cst_88 = arith.constant dense<0.000000e+00> : vector<48x64xf32>
    %187 = tpu.matmul %186, %184, %cst_88 {dimension_numbers = #tpu.dot_dimension_numbers<[1], [0], [0], [1], [0, 0, 1, 1], [], []>} : vector<48x32xbf16>, vector<32x64xbf16>, vector<48x64xf32> -> vector<48x64xf32>
    %c0_89 = arith.constant 0 : index
    %c0_90 = arith.constant 0 : index
    %c0_91 = arith.constant 0 : index
    %188 = vector.load %arg9[%c0_89, %c0_90, %c0_91] : memref<3x48x1xf32, #tpu.memory_space<vmem>>, vector<1x48x1xf32>
    %189 = vector.shape_cast %188 : vector<1x48x1xf32> to vector<48x1xf32>
    %190 = vector.broadcast %189 : vector<48x1xf32> to vector<48x64xf32>
    %191 = arith.addf %187, %190 : vector<48x64xf32>
    %192 = vector.extract_strided_slice %191 {offsets = [0, 0], sizes = [8, 64], strides = [1, 1]} : vector<48x64xf32> to vector<8x64xf32>
    %193 = arith.truncf %192 : vector<8x64xf32> to vector<8x64xbf16>
    %194 = vector.extract_strided_slice %191 {offsets = [8, 0], sizes = [8, 64], strides = [1, 1]} : vector<48x64xf32> to vector<8x64xf32>
    %195 = arith.truncf %194 : vector<8x64xf32> to vector<8x64xbf16>
    %196 = vector.extract_strided_slice %191 {offsets = [16, 0], sizes = [32, 64], strides = [1, 1]} : vector<48x64xf32> to vector<32x64xf32>
    %197 = arith.truncf %196 : vector<32x64xf32> to vector<32x64xbf16>
    %c1_92 = arith.constant 1 : index
    %c0_93 = arith.constant 0 : index
    %c0_94 = arith.constant 0 : index
    %198 = vector.load %arg2[%c1_92, %c0_93, %c0_94] : memref<2x32x64xf32, #tpu.memory_space<vmem>>, vector<1x32x64xf32>
    %199 = vector.shape_cast %198 : vector<1x32x64xf32> to vector<32x64xf32>
    %cst_95 = arith.constant dense<0xFF800000> : vector<32xf32>
    %200 = vector.multi_reduction <maximumf>, %199, %cst_95 [1] : vector<32x64xf32> to vector<32xf32>
    %201 = vector.shape_cast %200 : vector<32xf32> to vector<32x1xf32>
    %c1_96 = arith.constant 1 : index
    %c0_97 = arith.constant 0 : index
    %c0_98 = arith.constant 0 : index
    %202 = vector.load %arg6[%c1_96, %c0_97, %c0_98] : memref<3x32x2xf32, #tpu.memory_space<vmem>>, vector<1x32x2xf32>
    %203 = vector.shape_cast %202 : vector<1x32x2xf32> to vector<32x2xf32>
    %204 = vector.broadcast %201 : vector<32x1xf32> to vector<32x2xf32>
    %205 = arith.mulf %203, %204 : vector<32x2xf32>
    %cst_99 = arith.constant dense<0.000000e+00> : vector<2xf32>
    %206 = vector.multi_reduction <add>, %205, %cst_99 [0] : vector<32x2xf32> to vector<2xf32>
    %207 = vector.shape_cast %206 : vector<2xf32> to vector<1x2xf32>
    %cst_100 = arith.constant 0.000000e+00 : f32
    %208 = vector.broadcast %cst_100 : f32 to vector<1x2xf32>
    %209 = arith.maximumf %207, %208 : vector<1x2xf32>
    %c1_101 = arith.constant 1 : index
    %c0_102 = arith.constant 0 : index
    %c0_103 = arith.constant 0 : index
    %210 = vector.load %arg7[%c1_101, %c0_102, %c0_103] : memref<3x32x2xf32, #tpu.memory_space<vmem>>, vector<1x32x2xf32>
    %211 = vector.shape_cast %210 : vector<1x32x2xf32> to vector<32x2xf32>
    %212 = vector.broadcast %209 : vector<1x2xf32> to vector<32x2xf32>
    %213 = arith.mulf %211, %212 : vector<32x2xf32>
    %cst_104 = arith.constant dense<0.000000e+00> : vector<32xf32>
    %214 = vector.multi_reduction <add>, %213, %cst_104 [1] : vector<32x2xf32> to vector<32xf32>
    %215 = vector.shape_cast %214 : vector<32xf32> to vector<32x1xf32>
    %216 = arith.negf %215 : vector<32x1xf32>
    %217 = math.exp %216 : vector<32x1xf32>
    %cst_105 = arith.constant 1.000000e+00 : f32
    %218 = vector.broadcast %cst_105 : f32 to vector<32x1xf32>
    %219 = arith.addf %218, %217 : vector<32x1xf32>
    %220 = arith.divf %218, %219 : vector<32x1xf32>
    %221 = vector.broadcast %220 : vector<32x1xf32> to vector<32x64xf32>
    %222 = arith.mulf %199, %221 : vector<32x64xf32>
    %223 = arith.truncf %222 : vector<32x64xf32> to vector<32x64xbf16>
    %c1_106 = arith.constant 1 : index
    %c0_107 = arith.constant 0 : index
    %c0_108 = arith.constant 0 : index
    %224 = vector.load %arg8[%c1_106, %c0_107, %c0_108] : memref<3x48x32xbf16, #tpu.memory_space<vmem>>, vector<1x48x32xbf16>
    %225 = vector.shape_cast %224 : vector<1x48x32xbf16> to vector<48x32xbf16>
    %cst_109 = arith.constant dense<0.000000e+00> : vector<48x64xf32>
    %226 = tpu.matmul %225, %223, %cst_109 {dimension_numbers = #tpu.dot_dimension_numbers<[1], [0], [0], [1], [0, 0, 1, 1], [], []>} : vector<48x32xbf16>, vector<32x64xbf16>, vector<48x64xf32> -> vector<48x64xf32>
    %c1_110 = arith.constant 1 : index
    %c0_111 = arith.constant 0 : index
    %c0_112 = arith.constant 0 : index
    %227 = vector.load %arg9[%c1_110, %c0_111, %c0_112] : memref<3x48x1xf32, #tpu.memory_space<vmem>>, vector<1x48x1xf32>
    %228 = vector.shape_cast %227 : vector<1x48x1xf32> to vector<48x1xf32>
    %229 = vector.broadcast %228 : vector<48x1xf32> to vector<48x64xf32>
    %230 = arith.addf %226, %229 : vector<48x64xf32>
    %231 = vector.extract_strided_slice %230 {offsets = [0, 0], sizes = [8, 64], strides = [1, 1]} : vector<48x64xf32> to vector<8x64xf32>
    %232 = arith.truncf %231 : vector<8x64xf32> to vector<8x64xbf16>
    %233 = vector.extract_strided_slice %230 {offsets = [8, 0], sizes = [8, 64], strides = [1, 1]} : vector<48x64xf32> to vector<8x64xf32>
    %234 = arith.truncf %233 : vector<8x64xf32> to vector<8x64xbf16>
    %235 = vector.extract_strided_slice %230 {offsets = [16, 0], sizes = [32, 64], strides = [1, 1]} : vector<48x64xf32> to vector<32x64xf32>
    %236 = arith.truncf %235 : vector<32x64xf32> to vector<32x64xbf16>
    %c1_113 = arith.constant 1 : index
    %c0_114 = arith.constant 0 : index
    %c0_115 = arith.constant 0 : index
    %237 = vector.load %arg3[%c1_113, %c0_114, %c0_115] : memref<2x32x64xf32, #tpu.memory_space<vmem>>, vector<1x32x64xf32>
    %238 = vector.shape_cast %237 : vector<1x32x64xf32> to vector<32x64xf32>
    %cst_116 = arith.constant dense<0xFF800000> : vector<32xf32>
    %239 = vector.multi_reduction <maximumf>, %238, %cst_116 [1] : vector<32x64xf32> to vector<32xf32>
    %240 = vector.shape_cast %239 : vector<32xf32> to vector<32x1xf32>
    %c2_117 = arith.constant 2 : index
    %c0_118 = arith.constant 0 : index
    %c0_119 = arith.constant 0 : index
    %241 = vector.load %arg6[%c2_117, %c0_118, %c0_119] : memref<3x32x2xf32, #tpu.memory_space<vmem>>, vector<1x32x2xf32>
    %242 = vector.shape_cast %241 : vector<1x32x2xf32> to vector<32x2xf32>
    %243 = vector.broadcast %240 : vector<32x1xf32> to vector<32x2xf32>
    %244 = arith.mulf %242, %243 : vector<32x2xf32>
    %cst_120 = arith.constant dense<0.000000e+00> : vector<2xf32>
    %245 = vector.multi_reduction <add>, %244, %cst_120 [0] : vector<32x2xf32> to vector<2xf32>
    %246 = vector.shape_cast %245 : vector<2xf32> to vector<1x2xf32>
    %cst_121 = arith.constant 0.000000e+00 : f32
    %247 = vector.broadcast %cst_121 : f32 to vector<1x2xf32>
    %248 = arith.maximumf %246, %247 : vector<1x2xf32>
    %c2_122 = arith.constant 2 : index
    %c0_123 = arith.constant 0 : index
    %c0_124 = arith.constant 0 : index
    %249 = vector.load %arg7[%c2_122, %c0_123, %c0_124] : memref<3x32x2xf32, #tpu.memory_space<vmem>>, vector<1x32x2xf32>
    %250 = vector.shape_cast %249 : vector<1x32x2xf32> to vector<32x2xf32>
    %251 = vector.broadcast %248 : vector<1x2xf32> to vector<32x2xf32>
    %252 = arith.mulf %250, %251 : vector<32x2xf32>
    %cst_125 = arith.constant dense<0.000000e+00> : vector<32xf32>
    %253 = vector.multi_reduction <add>, %252, %cst_125 [1] : vector<32x2xf32> to vector<32xf32>
    %254 = vector.shape_cast %253 : vector<32xf32> to vector<32x1xf32>
    %255 = arith.negf %254 : vector<32x1xf32>
    %256 = math.exp %255 : vector<32x1xf32>
    %cst_126 = arith.constant 1.000000e+00 : f32
    %257 = vector.broadcast %cst_126 : f32 to vector<32x1xf32>
    %258 = arith.addf %257, %256 : vector<32x1xf32>
    %259 = arith.divf %257, %258 : vector<32x1xf32>
    %260 = vector.broadcast %259 : vector<32x1xf32> to vector<32x64xf32>
    %261 = arith.mulf %238, %260 : vector<32x64xf32>
    %262 = arith.truncf %261 : vector<32x64xf32> to vector<32x64xbf16>
    %c2_127 = arith.constant 2 : index
    %c0_128 = arith.constant 0 : index
    %c0_129 = arith.constant 0 : index
    %263 = vector.load %arg8[%c2_127, %c0_128, %c0_129] : memref<3x48x32xbf16, #tpu.memory_space<vmem>>, vector<1x48x32xbf16>
    %264 = vector.shape_cast %263 : vector<1x48x32xbf16> to vector<48x32xbf16>
    %cst_130 = arith.constant dense<0.000000e+00> : vector<48x64xf32>
    %265 = tpu.matmul %264, %262, %cst_130 {dimension_numbers = #tpu.dot_dimension_numbers<[1], [0], [0], [1], [0, 0, 1, 1], [], []>} : vector<48x32xbf16>, vector<32x64xbf16>, vector<48x64xf32> -> vector<48x64xf32>
    %c2_131 = arith.constant 2 : index
    %c0_132 = arith.constant 0 : index
    %c0_133 = arith.constant 0 : index
    %266 = vector.load %arg9[%c2_131, %c0_132, %c0_133] : memref<3x48x1xf32, #tpu.memory_space<vmem>>, vector<1x48x1xf32>
    %267 = vector.shape_cast %266 : vector<1x48x1xf32> to vector<48x1xf32>
    %268 = vector.broadcast %267 : vector<48x1xf32> to vector<48x64xf32>
    %269 = arith.addf %265, %268 : vector<48x64xf32>
    %270 = vector.extract_strided_slice %269 {offsets = [0, 0], sizes = [8, 64], strides = [1, 1]} : vector<48x64xf32> to vector<8x64xf32>
    %271 = arith.truncf %270 : vector<8x64xf32> to vector<8x64xbf16>
    %272 = vector.extract_strided_slice %269 {offsets = [8, 0], sizes = [8, 64], strides = [1, 1]} : vector<48x64xf32> to vector<8x64xf32>
    %273 = arith.truncf %272 : vector<8x64xf32> to vector<8x64xbf16>
    %274 = vector.extract_strided_slice %269 {offsets = [16, 0], sizes = [32, 64], strides = [1, 1]} : vector<48x64xf32> to vector<32x64xf32>
    %275 = arith.truncf %274 : vector<32x64xf32> to vector<32x64xbf16>
    %cst_134 = arith.constant dense<0.000000e+00> : vector<64x64xf32>
    %276 = tpu.matmul %273, %232, %cst_134 {dimension_numbers = #tpu.dot_dimension_numbers<[0], [0], [1], [1], [0, 1, 1, 1], [], []>} : vector<8x64xbf16>, vector<8x64xbf16>, vector<64x64xf32> -> vector<64x64xf32>
    %cst_135 = arith.constant dense<0xFF800000> : vector<64xf32>
    %277 = vector.multi_reduction <maximumf>, %276, %cst_135 [1] : vector<64x64xf32> to vector<64xf32>
    %278 = vector.shape_cast %277 : vector<64xf32> to vector<64x1xf32>
    %279 = vector.broadcast %278 : vector<64x1xf32> to vector<64x64xf32>
    %280 = arith.subf %276, %279 : vector<64x64xf32>
    %281 = math.exp %280 : vector<64x64xf32>
    %cst_136 = arith.constant dense<0.000000e+00> : vector<64xf32>
    %282 = vector.multi_reduction <add>, %281, %cst_136 [1] : vector<64x64xf32> to vector<64xf32>
    %283 = vector.shape_cast %282 : vector<64xf32> to vector<64x1xf32>
    %284 = tpu.reciprocal %283 {approx = true} : vector<64x1xf32> -> vector<64x1xf32>
    %285 = vector.broadcast %284 : vector<64x1xf32> to vector<64x64xf32>
    %286 = arith.mulf %281, %285 : vector<64x64xf32>
    %287 = arith.truncf %286 : vector<64x64xf32> to vector<64x64xbf16>
    %cst_137 = arith.constant dense<0.000000e+00> : vector<32x64xf32>
    %288 = tpu.matmul %197, %287, %cst_137 {dimension_numbers = #tpu.dot_dimension_numbers<[1], [0], [0], [1], [0, 0, 1, 1], [], []>} : vector<32x64xbf16>, vector<64x64xbf16>, vector<32x64xf32> -> vector<32x64xf32>
    %289 = arith.truncf %288 : vector<32x64xf32> to vector<32x64xbf16>
    %cst_138 = arith.constant dense<0.000000e+00> : vector<64x64xf32>
    %290 = tpu.matmul %195, %271, %cst_138 {dimension_numbers = #tpu.dot_dimension_numbers<[0], [0], [1], [1], [0, 1, 1, 1], [], []>} : vector<8x64xbf16>, vector<8x64xbf16>, vector<64x64xf32> -> vector<64x64xf32>
    %cst_139 = arith.constant dense<0xFF800000> : vector<64xf32>
    %291 = vector.multi_reduction <maximumf>, %290, %cst_139 [1] : vector<64x64xf32> to vector<64xf32>
    %292 = vector.shape_cast %291 : vector<64xf32> to vector<64x1xf32>
    %293 = vector.broadcast %292 : vector<64x1xf32> to vector<64x64xf32>
    %294 = arith.subf %290, %293 : vector<64x64xf32>
    %295 = math.exp %294 : vector<64x64xf32>
    %cst_140 = arith.constant dense<0.000000e+00> : vector<64xf32>
    %296 = vector.multi_reduction <add>, %295, %cst_140 [1] : vector<64x64xf32> to vector<64xf32>
    %297 = vector.shape_cast %296 : vector<64xf32> to vector<64x1xf32>
    %298 = tpu.reciprocal %297 {approx = true} : vector<64x1xf32> -> vector<64x1xf32>
    %299 = vector.broadcast %298 : vector<64x1xf32> to vector<64x64xf32>
    %300 = arith.mulf %295, %299 : vector<64x64xf32>
    %301 = arith.truncf %300 : vector<64x64xf32> to vector<64x64xbf16>
    %cst_141 = arith.constant dense<0.000000e+00> : vector<32x64xf32>
    %302 = tpu.matmul %236, %301, %cst_141 {dimension_numbers = #tpu.dot_dimension_numbers<[1], [0], [0], [1], [0, 0, 1, 1], [], []>} : vector<32x64xbf16>, vector<64x64xbf16>, vector<32x64xf32> -> vector<32x64xf32>
    %303 = arith.truncf %302 : vector<32x64xf32> to vector<32x64xbf16>
    %cst_142 = arith.constant dense<0.000000e+00> : vector<64x64xf32>
    %304 = tpu.matmul %234, %193, %cst_142 {dimension_numbers = #tpu.dot_dimension_numbers<[0], [0], [1], [1], [0, 1, 1, 1], [], []>} : vector<8x64xbf16>, vector<8x64xbf16>, vector<64x64xf32> -> vector<64x64xf32>
    %cst_143 = arith.constant dense<0xFF800000> : vector<64xf32>
    %305 = vector.multi_reduction <maximumf>, %304, %cst_143 [1] : vector<64x64xf32> to vector<64xf32>
    %306 = vector.shape_cast %305 : vector<64xf32> to vector<64x1xf32>
    %307 = vector.broadcast %306 : vector<64x1xf32> to vector<64x64xf32>
    %308 = arith.subf %304, %307 : vector<64x64xf32>
    %309 = math.exp %308 : vector<64x64xf32>
    %cst_144 = arith.constant dense<0.000000e+00> : vector<64xf32>
    %310 = vector.multi_reduction <add>, %309, %cst_144 [1] : vector<64x64xf32> to vector<64xf32>
    %311 = vector.shape_cast %310 : vector<64xf32> to vector<64x1xf32>
    %312 = tpu.reciprocal %311 {approx = true} : vector<64x1xf32> -> vector<64x1xf32>
    %313 = vector.broadcast %312 : vector<64x1xf32> to vector<64x64xf32>
    %314 = arith.mulf %309, %313 : vector<64x64xf32>
    %315 = arith.truncf %314 : vector<64x64xf32> to vector<64x64xbf16>
    %cst_145 = arith.constant dense<0.000000e+00> : vector<32x64xf32>
    %316 = tpu.matmul %275, %315, %cst_145 {dimension_numbers = #tpu.dot_dimension_numbers<[1], [0], [0], [1], [0, 0, 1, 1], [], []>} : vector<32x64xbf16>, vector<64x64xbf16>, vector<32x64xf32> -> vector<32x64xf32>
    %317 = arith.truncf %316 : vector<32x64xf32> to vector<32x64xbf16>
    %318 = tpu.concatenate %130, %289 in 1 : vector<32x64xbf16>, vector<32x64xbf16> -> vector<32x128xbf16>
    %319 = tpu.concatenate %144, %303 in 1 : vector<32x64xbf16>, vector<32x64xbf16> -> vector<32x128xbf16>
    %320 = tpu.concatenate %158, %317 in 1 : vector<32x64xbf16>, vector<32x64xbf16> -> vector<32x128xbf16>
    %321 = tpu.concatenate %318, %319, %320 in 0 : vector<32x128xbf16>, vector<32x128xbf16>, vector<32x128xbf16> -> vector<96x128xbf16>
    %c0_146 = arith.constant 0 : index
    %c0_147 = arith.constant 0 : index
    %322 = vector.load %arg5[%c0_146, %c0_147] : memref<9x128xf32, #tpu.memory_space<vmem>>, vector<9x128xf32>
    %c0_148 = arith.constant 0 : index
    %c0_149 = arith.constant 0 : index
    %323 = vector.load %arg12[%c0_148, %c0_149] : memref<32x1xf32, #tpu.memory_space<vmem>>, vector<32x1xf32>
    %c0_150 = arith.constant 0 : index
    %c0_151 = arith.constant 0 : index
    %324 = vector.load %arg13[%c0_150, %c0_151] : memref<32x1xf32, #tpu.memory_space<vmem>>, vector<32x1xf32>
    %c4 = arith.constant 4 : index
    %c0_152 = arith.constant 0 : index
    %c0_153 = arith.constant 0 : index
    %325 = vector.load %arg10[%c4, %c0_152, %c0_153] : memref<9x32x96xbf16, #tpu.memory_space<vmem>>, vector<1x32x96xbf16>
    %326 = vector.shape_cast %325 : vector<1x32x96xbf16> to vector<32x96xbf16>
    %cst_154 = arith.constant dense<0.000000e+00> : vector<32x128xf32>
    %327 = tpu.matmul %326, %321, %cst_154 {dimension_numbers = #tpu.dot_dimension_numbers<[1], [0], [0], [1], [0, 0, 1, 1], [], []>} : vector<32x96xbf16>, vector<96x128xbf16>, vector<32x128xf32> -> vector<32x128xf32>
    %c0_155 = arith.constant 0 : index
    %c0_156 = arith.constant 0 : index
    %c0_157 = arith.constant 0 : index
    %328 = vector.load %arg10[%c0_155, %c0_156, %c0_157] : memref<9x32x96xbf16, #tpu.memory_space<vmem>>, vector<1x32x96xbf16>
    %329 = vector.shape_cast %328 : vector<1x32x96xbf16> to vector<32x96xbf16>
    %cst_158 = arith.constant dense<0.000000e+00> : vector<32x128xf32>
    %330 = tpu.matmul %329, %321, %cst_158 {dimension_numbers = #tpu.dot_dimension_numbers<[1], [0], [0], [1], [0, 0, 1, 1], [], []>} : vector<32x96xbf16>, vector<96x128xbf16>, vector<32x128xf32> -> vector<32x128xf32>
    %c9_i32 = arith.constant 9 : i32
    %331 = tpu.dynamic_rotate %330 by %c9_i32 dim 1 : vector<32x128xf32>, i32 -> vector<32x128xf32>
    %332 = vector.extract_strided_slice %322 {offsets = [0, 0], sizes = [1, 128], strides = [1, 1]} : vector<9x128xf32> to vector<1x128xf32>
    %333 = vector.broadcast %332 : vector<1x128xf32> to vector<32x128xf32>
    %334 = arith.mulf %331, %333 : vector<32x128xf32>
    %335 = arith.addf %327, %334 : vector<32x128xf32>
    %c1_159 = arith.constant 1 : index
    %c0_160 = arith.constant 0 : index
    %c0_161 = arith.constant 0 : index
    %336 = vector.load %arg10[%c1_159, %c0_160, %c0_161] : memref<9x32x96xbf16, #tpu.memory_space<vmem>>, vector<1x32x96xbf16>
    %337 = vector.shape_cast %336 : vector<1x32x96xbf16> to vector<32x96xbf16>
    %cst_162 = arith.constant dense<0.000000e+00> : vector<32x128xf32>
    %338 = tpu.matmul %337, %321, %cst_162 {dimension_numbers = #tpu.dot_dimension_numbers<[1], [0], [0], [1], [0, 0, 1, 1], [], []>} : vector<32x96xbf16>, vector<96x128xbf16>, vector<32x128xf32> -> vector<32x128xf32>
    %c8_i32 = arith.constant 8 : i32
    %339 = tpu.dynamic_rotate %338 by %c8_i32 dim 1 : vector<32x128xf32>, i32 -> vector<32x128xf32>
    %340 = vector.extract_strided_slice %322 {offsets = [1, 0], sizes = [1, 128], strides = [1, 1]} : vector<9x128xf32> to vector<1x128xf32>
    %341 = vector.broadcast %340 : vector<1x128xf32> to vector<32x128xf32>
    %342 = arith.mulf %339, %341 : vector<32x128xf32>
    %343 = arith.addf %335, %342 : vector<32x128xf32>
    %c2_163 = arith.constant 2 : index
    %c0_164 = arith.constant 0 : index
    %c0_165 = arith.constant 0 : index
    %344 = vector.load %arg10[%c2_163, %c0_164, %c0_165] : memref<9x32x96xbf16, #tpu.memory_space<vmem>>, vector<1x32x96xbf16>
    %345 = vector.shape_cast %344 : vector<1x32x96xbf16> to vector<32x96xbf16>
    %cst_166 = arith.constant dense<0.000000e+00> : vector<32x128xf32>
    %346 = tpu.matmul %345, %321, %cst_166 {dimension_numbers = #tpu.dot_dimension_numbers<[1], [0], [0], [1], [0, 0, 1, 1], [], []>} : vector<32x96xbf16>, vector<96x128xbf16>, vector<32x128xf32> -> vector<32x128xf32>
    %c7_i32 = arith.constant 7 : i32
    %347 = tpu.dynamic_rotate %346 by %c7_i32 dim 1 : vector<32x128xf32>, i32 -> vector<32x128xf32>
    %348 = vector.extract_strided_slice %322 {offsets = [2, 0], sizes = [1, 128], strides = [1, 1]} : vector<9x128xf32> to vector<1x128xf32>
    %349 = vector.broadcast %348 : vector<1x128xf32> to vector<32x128xf32>
    %350 = arith.mulf %347, %349 : vector<32x128xf32>
    %351 = arith.addf %343, %350 : vector<32x128xf32>
    %c3 = arith.constant 3 : index
    %c0_167 = arith.constant 0 : index
    %c0_168 = arith.constant 0 : index
    %352 = vector.load %arg10[%c3, %c0_167, %c0_168] : memref<9x32x96xbf16, #tpu.memory_space<vmem>>, vector<1x32x96xbf16>
    %353 = vector.shape_cast %352 : vector<1x32x96xbf16> to vector<32x96xbf16>
    %cst_169 = arith.constant dense<0.000000e+00> : vector<32x128xf32>
    %354 = tpu.matmul %353, %321, %cst_169 {dimension_numbers = #tpu.dot_dimension_numbers<[1], [0], [0], [1], [0, 0, 1, 1], [], []>} : vector<32x96xbf16>, vector<96x128xbf16>, vector<32x128xf32> -> vector<32x128xf32>
    %c1_i32 = arith.constant 1 : i32
    %355 = tpu.dynamic_rotate %354 by %c1_i32 dim 1 : vector<32x128xf32>, i32 -> vector<32x128xf32>
    %356 = vector.extract_strided_slice %322 {offsets = [3, 0], sizes = [1, 128], strides = [1, 1]} : vector<9x128xf32> to vector<1x128xf32>
    %357 = vector.broadcast %356 : vector<1x128xf32> to vector<32x128xf32>
    %358 = arith.mulf %355, %357 : vector<32x128xf32>
    %359 = arith.addf %351, %358 : vector<32x128xf32>
    %c5 = arith.constant 5 : index
    %c0_170 = arith.constant 0 : index
    %c0_171 = arith.constant 0 : index
    %360 = vector.load %arg10[%c5, %c0_170, %c0_171] : memref<9x32x96xbf16, #tpu.memory_space<vmem>>, vector<1x32x96xbf16>
    %361 = vector.shape_cast %360 : vector<1x32x96xbf16> to vector<32x96xbf16>
    %cst_172 = arith.constant dense<0.000000e+00> : vector<32x128xf32>
    %362 = tpu.matmul %361, %321, %cst_172 {dimension_numbers = #tpu.dot_dimension_numbers<[1], [0], [0], [1], [0, 0, 1, 1], [], []>} : vector<32x96xbf16>, vector<96x128xbf16>, vector<32x128xf32> -> vector<32x128xf32>
    %c127_i32 = arith.constant 127 : i32
    %363 = tpu.dynamic_rotate %362 by %c127_i32 dim 1 : vector<32x128xf32>, i32 -> vector<32x128xf32>
    %364 = vector.extract_strided_slice %322 {offsets = [5, 0], sizes = [1, 128], strides = [1, 1]} : vector<9x128xf32> to vector<1x128xf32>
    %365 = vector.broadcast %364 : vector<1x128xf32> to vector<32x128xf32>
    %366 = arith.mulf %363, %365 : vector<32x128xf32>
    %367 = arith.addf %359, %366 : vector<32x128xf32>
    %c6 = arith.constant 6 : index
    %c0_173 = arith.constant 0 : index
    %c0_174 = arith.constant 0 : index
    %368 = vector.load %arg10[%c6, %c0_173, %c0_174] : memref<9x32x96xbf16, #tpu.memory_space<vmem>>, vector<1x32x96xbf16>
    %369 = vector.shape_cast %368 : vector<1x32x96xbf16> to vector<32x96xbf16>
    %cst_175 = arith.constant dense<0.000000e+00> : vector<32x128xf32>
    %370 = tpu.matmul %369, %321, %cst_175 {dimension_numbers = #tpu.dot_dimension_numbers<[1], [0], [0], [1], [0, 0, 1, 1], [], []>} : vector<32x96xbf16>, vector<96x128xbf16>, vector<32x128xf32> -> vector<32x128xf32>
    %c121_i32 = arith.constant 121 : i32
    %371 = tpu.dynamic_rotate %370 by %c121_i32 dim 1 : vector<32x128xf32>, i32 -> vector<32x128xf32>
    %372 = vector.extract_strided_slice %322 {offsets = [6, 0], sizes = [1, 128], strides = [1, 1]} : vector<9x128xf32> to vector<1x128xf32>
    %373 = vector.broadcast %372 : vector<1x128xf32> to vector<32x128xf32>
    %374 = arith.mulf %371, %373 : vector<32x128xf32>
    %375 = arith.addf %367, %374 : vector<32x128xf32>
    %c7 = arith.constant 7 : index
    %c0_176 = arith.constant 0 : index
    %c0_177 = arith.constant 0 : index
    %376 = vector.load %arg10[%c7, %c0_176, %c0_177] : memref<9x32x96xbf16, #tpu.memory_space<vmem>>, vector<1x32x96xbf16>
    %377 = vector.shape_cast %376 : vector<1x32x96xbf16> to vector<32x96xbf16>
    %cst_178 = arith.constant dense<0.000000e+00> : vector<32x128xf32>
    %378 = tpu.matmul %377, %321, %cst_178 {dimension_numbers = #tpu.dot_dimension_numbers<[1], [0], [0], [1], [0, 0, 1, 1], [], []>} : vector<32x96xbf16>, vector<96x128xbf16>, vector<32x128xf32> -> vector<32x128xf32>
    %c120_i32 = arith.constant 120 : i32
    %379 = tpu.dynamic_rotate %378 by %c120_i32 dim 1 : vector<32x128xf32>, i32 -> vector<32x128xf32>
    %380 = vector.extract_strided_slice %322 {offsets = [7, 0], sizes = [1, 128], strides = [1, 1]} : vector<9x128xf32> to vector<1x128xf32>
    %381 = vector.broadcast %380 : vector<1x128xf32> to vector<32x128xf32>
    %382 = arith.mulf %379, %381 : vector<32x128xf32>
    %383 = arith.addf %375, %382 : vector<32x128xf32>
    %c8 = arith.constant 8 : index
    %c0_179 = arith.constant 0 : index
    %c0_180 = arith.constant 0 : index
    %384 = vector.load %arg10[%c8, %c0_179, %c0_180] : memref<9x32x96xbf16, #tpu.memory_space<vmem>>, vector<1x32x96xbf16>
    %385 = vector.shape_cast %384 : vector<1x32x96xbf16> to vector<32x96xbf16>
    %cst_181 = arith.constant dense<0.000000e+00> : vector<32x128xf32>
    %386 = tpu.matmul %385, %321, %cst_181 {dimension_numbers = #tpu.dot_dimension_numbers<[1], [0], [0], [1], [0, 0, 1, 1], [], []>} : vector<32x96xbf16>, vector<96x128xbf16>, vector<32x128xf32> -> vector<32x128xf32>
    %c119_i32 = arith.constant 119 : i32
    %387 = tpu.dynamic_rotate %386 by %c119_i32 dim 1 : vector<32x128xf32>, i32 -> vector<32x128xf32>
    %388 = vector.extract_strided_slice %322 {offsets = [8, 0], sizes = [1, 128], strides = [1, 1]} : vector<9x128xf32> to vector<1x128xf32>
    %389 = vector.broadcast %388 : vector<1x128xf32> to vector<32x128xf32>
    %390 = arith.mulf %387, %389 : vector<32x128xf32>
    %391 = arith.addf %383, %390 : vector<32x128xf32>
    %392 = vector.broadcast %323 : vector<32x1xf32> to vector<32x128xf32>
    %393 = arith.mulf %391, %392 : vector<32x128xf32>
    %394 = vector.broadcast %324 : vector<32x1xf32> to vector<32x128xf32>
    %395 = arith.addf %393, %394 : vector<32x128xf32>
    %cst_182 = arith.constant 0.000000e+00 : f32
    %396 = vector.broadcast %cst_182 : f32 to vector<32x128xf32>
    %397 = arith.maximumf %395, %396 : vector<32x128xf32>
    %c0_183 = arith.constant 0 : index
    %c0_184 = arith.constant 0 : index
    %c0_185 = arith.constant 0 : index
    %398 = vector.load %arg4[%c0_183, %c0_184, %c0_185] : memref<2x32x64xf32, #tpu.memory_space<vmem>>, vector<1x32x64xf32>
    %399 = vector.shape_cast %398 : vector<1x32x64xf32> to vector<32x64xf32>
    %c1_186 = arith.constant 1 : index
    %c0_187 = arith.constant 0 : index
    %c0_188 = arith.constant 0 : index
    %400 = vector.load %arg4[%c1_186, %c0_187, %c0_188] : memref<2x32x64xf32, #tpu.memory_space<vmem>>, vector<1x32x64xf32>
    %401 = vector.shape_cast %400 : vector<1x32x64xf32> to vector<32x64xf32>
    %402 = tpu.concatenate %399, %401 in 1 : vector<32x64xf32>, vector<32x64xf32> -> vector<32x128xf32>
    %403 = arith.mulf %402, %397 : vector<32x128xf32>
    %404 = arith.addf %402, %397 : vector<32x128xf32>
    %405 = tpu.concatenate %403, %404 in 0 : vector<32x128xf32>, vector<32x128xf32> -> vector<64x128xf32>
    %406 = arith.truncf %405 : vector<64x128xf32> to vector<64x128xbf16>
    %c0_189 = arith.constant 0 : index
    %c0_190 = arith.constant 0 : index
    %407 = vector.load %arg14[%c0_189, %c0_190] : memref<32x1xf32, #tpu.memory_space<vmem>>, vector<32x1xf32>
    %c0_191 = arith.constant 0 : index
    %c0_192 = arith.constant 0 : index
    %408 = vector.load %arg15[%c0_191, %c0_192] : memref<32x1xf32, #tpu.memory_space<vmem>>, vector<32x1xf32>
    %c4_193 = arith.constant 4 : index
    %c0_194 = arith.constant 0 : index
    %c0_195 = arith.constant 0 : index
    %409 = vector.load %arg11[%c4_193, %c0_194, %c0_195] : memref<9x32x64xbf16, #tpu.memory_space<vmem>>, vector<1x32x64xbf16>
    %410 = vector.shape_cast %409 : vector<1x32x64xbf16> to vector<32x64xbf16>
    %cst_196 = arith.constant dense<0.000000e+00> : vector<32x128xf32>
    %411 = tpu.matmul %410, %406, %cst_196 {dimension_numbers = #tpu.dot_dimension_numbers<[1], [0], [0], [1], [0, 0, 1, 1], [], []>} : vector<32x64xbf16>, vector<64x128xbf16>, vector<32x128xf32> -> vector<32x128xf32>
    %c0_197 = arith.constant 0 : index
    %c0_198 = arith.constant 0 : index
    %c0_199 = arith.constant 0 : index
    %412 = vector.load %arg11[%c0_197, %c0_198, %c0_199] : memref<9x32x64xbf16, #tpu.memory_space<vmem>>, vector<1x32x64xbf16>
    %413 = vector.shape_cast %412 : vector<1x32x64xbf16> to vector<32x64xbf16>
    %cst_200 = arith.constant dense<0.000000e+00> : vector<32x128xf32>
    %414 = tpu.matmul %413, %406, %cst_200 {dimension_numbers = #tpu.dot_dimension_numbers<[1], [0], [0], [1], [0, 0, 1, 1], [], []>} : vector<32x64xbf16>, vector<64x128xbf16>, vector<32x128xf32> -> vector<32x128xf32>
    %c9_i32_201 = arith.constant 9 : i32
    %415 = tpu.dynamic_rotate %414 by %c9_i32_201 dim 1 : vector<32x128xf32>, i32 -> vector<32x128xf32>
    %416 = vector.extract_strided_slice %322 {offsets = [0, 0], sizes = [1, 128], strides = [1, 1]} : vector<9x128xf32> to vector<1x128xf32>
    %417 = vector.broadcast %416 : vector<1x128xf32> to vector<32x128xf32>
    %418 = arith.mulf %415, %417 : vector<32x128xf32>
    %419 = arith.addf %411, %418 : vector<32x128xf32>
    %c1_202 = arith.constant 1 : index
    %c0_203 = arith.constant 0 : index
    %c0_204 = arith.constant 0 : index
    %420 = vector.load %arg11[%c1_202, %c0_203, %c0_204] : memref<9x32x64xbf16, #tpu.memory_space<vmem>>, vector<1x32x64xbf16>
    %421 = vector.shape_cast %420 : vector<1x32x64xbf16> to vector<32x64xbf16>
    %cst_205 = arith.constant dense<0.000000e+00> : vector<32x128xf32>
    %422 = tpu.matmul %421, %406, %cst_205 {dimension_numbers = #tpu.dot_dimension_numbers<[1], [0], [0], [1], [0, 0, 1, 1], [], []>} : vector<32x64xbf16>, vector<64x128xbf16>, vector<32x128xf32> -> vector<32x128xf32>
    %c8_i32_206 = arith.constant 8 : i32
    %423 = tpu.dynamic_rotate %422 by %c8_i32_206 dim 1 : vector<32x128xf32>, i32 -> vector<32x128xf32>
    %424 = vector.extract_strided_slice %322 {offsets = [1, 0], sizes = [1, 128], strides = [1, 1]} : vector<9x128xf32> to vector<1x128xf32>
    %425 = vector.broadcast %424 : vector<1x128xf32> to vector<32x128xf32>
    %426 = arith.mulf %423, %425 : vector<32x128xf32>
    %427 = arith.addf %419, %426 : vector<32x128xf32>
    %c2_207 = arith.constant 2 : index
    %c0_208 = arith.constant 0 : index
    %c0_209 = arith.constant 0 : index
    %428 = vector.load %arg11[%c2_207, %c0_208, %c0_209] : memref<9x32x64xbf16, #tpu.memory_space<vmem>>, vector<1x32x64xbf16>
    %429 = vector.shape_cast %428 : vector<1x32x64xbf16> to vector<32x64xbf16>
    %cst_210 = arith.constant dense<0.000000e+00> : vector<32x128xf32>
    %430 = tpu.matmul %429, %406, %cst_210 {dimension_numbers = #tpu.dot_dimension_numbers<[1], [0], [0], [1], [0, 0, 1, 1], [], []>} : vector<32x64xbf16>, vector<64x128xbf16>, vector<32x128xf32> -> vector<32x128xf32>
    %c7_i32_211 = arith.constant 7 : i32
    %431 = tpu.dynamic_rotate %430 by %c7_i32_211 dim 1 : vector<32x128xf32>, i32 -> vector<32x128xf32>
    %432 = vector.extract_strided_slice %322 {offsets = [2, 0], sizes = [1, 128], strides = [1, 1]} : vector<9x128xf32> to vector<1x128xf32>
    %433 = vector.broadcast %432 : vector<1x128xf32> to vector<32x128xf32>
    %434 = arith.mulf %431, %433 : vector<32x128xf32>
    %435 = arith.addf %427, %434 : vector<32x128xf32>
    %c3_212 = arith.constant 3 : index
    %c0_213 = arith.constant 0 : index
    %c0_214 = arith.constant 0 : index
    %436 = vector.load %arg11[%c3_212, %c0_213, %c0_214] : memref<9x32x64xbf16, #tpu.memory_space<vmem>>, vector<1x32x64xbf16>
    %437 = vector.shape_cast %436 : vector<1x32x64xbf16> to vector<32x64xbf16>
    %cst_215 = arith.constant dense<0.000000e+00> : vector<32x128xf32>
    %438 = tpu.matmul %437, %406, %cst_215 {dimension_numbers = #tpu.dot_dimension_numbers<[1], [0], [0], [1], [0, 0, 1, 1], [], []>} : vector<32x64xbf16>, vector<64x128xbf16>, vector<32x128xf32> -> vector<32x128xf32>
    %c1_i32_216 = arith.constant 1 : i32
    %439 = tpu.dynamic_rotate %438 by %c1_i32_216 dim 1 : vector<32x128xf32>, i32 -> vector<32x128xf32>
    %440 = vector.extract_strided_slice %322 {offsets = [3, 0], sizes = [1, 128], strides = [1, 1]} : vector<9x128xf32> to vector<1x128xf32>
    %441 = vector.broadcast %440 : vector<1x128xf32> to vector<32x128xf32>
    %442 = arith.mulf %439, %441 : vector<32x128xf32>
    %443 = arith.addf %435, %442 : vector<32x128xf32>
    %c5_217 = arith.constant 5 : index
    %c0_218 = arith.constant 0 : index
    %c0_219 = arith.constant 0 : index
    %444 = vector.load %arg11[%c5_217, %c0_218, %c0_219] : memref<9x32x64xbf16, #tpu.memory_space<vmem>>, vector<1x32x64xbf16>
    %445 = vector.shape_cast %444 : vector<1x32x64xbf16> to vector<32x64xbf16>
    %cst_220 = arith.constant dense<0.000000e+00> : vector<32x128xf32>
    %446 = tpu.matmul %445, %406, %cst_220 {dimension_numbers = #tpu.dot_dimension_numbers<[1], [0], [0], [1], [0, 0, 1, 1], [], []>} : vector<32x64xbf16>, vector<64x128xbf16>, vector<32x128xf32> -> vector<32x128xf32>
    %c127_i32_221 = arith.constant 127 : i32
    %447 = tpu.dynamic_rotate %446 by %c127_i32_221 dim 1 : vector<32x128xf32>, i32 -> vector<32x128xf32>
    %448 = vector.extract_strided_slice %322 {offsets = [5, 0], sizes = [1, 128], strides = [1, 1]} : vector<9x128xf32> to vector<1x128xf32>
    %449 = vector.broadcast %448 : vector<1x128xf32> to vector<32x128xf32>
    %450 = arith.mulf %447, %449 : vector<32x128xf32>
    %451 = arith.addf %443, %450 : vector<32x128xf32>
    %c6_222 = arith.constant 6 : index
    %c0_223 = arith.constant 0 : index
    %c0_224 = arith.constant 0 : index
    %452 = vector.load %arg11[%c6_222, %c0_223, %c0_224] : memref<9x32x64xbf16, #tpu.memory_space<vmem>>, vector<1x32x64xbf16>
    %453 = vector.shape_cast %452 : vector<1x32x64xbf16> to vector<32x64xbf16>
    %cst_225 = arith.constant dense<0.000000e+00> : vector<32x128xf32>
    %454 = tpu.matmul %453, %406, %cst_225 {dimension_numbers = #tpu.dot_dimension_numbers<[1], [0], [0], [1], [0, 0, 1, 1], [], []>} : vector<32x64xbf16>, vector<64x128xbf16>, vector<32x128xf32> -> vector<32x128xf32>
    %c121_i32_226 = arith.constant 121 : i32
    %455 = tpu.dynamic_rotate %454 by %c121_i32_226 dim 1 : vector<32x128xf32>, i32 -> vector<32x128xf32>
    %456 = vector.extract_strided_slice %322 {offsets = [6, 0], sizes = [1, 128], strides = [1, 1]} : vector<9x128xf32> to vector<1x128xf32>
    %457 = vector.broadcast %456 : vector<1x128xf32> to vector<32x128xf32>
    %458 = arith.mulf %455, %457 : vector<32x128xf32>
    %459 = arith.addf %451, %458 : vector<32x128xf32>
    %c7_227 = arith.constant 7 : index
    %c0_228 = arith.constant 0 : index
    %c0_229 = arith.constant 0 : index
    %460 = vector.load %arg11[%c7_227, %c0_228, %c0_229] : memref<9x32x64xbf16, #tpu.memory_space<vmem>>, vector<1x32x64xbf16>
    %461 = vector.shape_cast %460 : vector<1x32x64xbf16> to vector<32x64xbf16>
    %cst_230 = arith.constant dense<0.000000e+00> : vector<32x128xf32>
    %462 = tpu.matmul %461, %406, %cst_230 {dimension_numbers = #tpu.dot_dimension_numbers<[1], [0], [0], [1], [0, 0, 1, 1], [], []>} : vector<32x64xbf16>, vector<64x128xbf16>, vector<32x128xf32> -> vector<32x128xf32>
    %c120_i32_231 = arith.constant 120 : i32
    %463 = tpu.dynamic_rotate %462 by %c120_i32_231 dim 1 : vector<32x128xf32>, i32 -> vector<32x128xf32>
    %464 = vector.extract_strided_slice %322 {offsets = [7, 0], sizes = [1, 128], strides = [1, 1]} : vector<9x128xf32> to vector<1x128xf32>
    %465 = vector.broadcast %464 : vector<1x128xf32> to vector<32x128xf32>
    %466 = arith.mulf %463, %465 : vector<32x128xf32>
    %467 = arith.addf %459, %466 : vector<32x128xf32>
    %c8_232 = arith.constant 8 : index
    %c0_233 = arith.constant 0 : index
    %c0_234 = arith.constant 0 : index
    %468 = vector.load %arg11[%c8_232, %c0_233, %c0_234] : memref<9x32x64xbf16, #tpu.memory_space<vmem>>, vector<1x32x64xbf16>
    %469 = vector.shape_cast %468 : vector<1x32x64xbf16> to vector<32x64xbf16>
    %cst_235 = arith.constant dense<0.000000e+00> : vector<32x128xf32>
    %470 = tpu.matmul %469, %406, %cst_235 {dimension_numbers = #tpu.dot_dimension_numbers<[1], [0], [0], [1], [0, 0, 1, 1], [], []>} : vector<32x64xbf16>, vector<64x128xbf16>, vector<32x128xf32> -> vector<32x128xf32>
    %c119_i32_236 = arith.constant 119 : i32
    %471 = tpu.dynamic_rotate %470 by %c119_i32_236 dim 1 : vector<32x128xf32>, i32 -> vector<32x128xf32>
    %472 = vector.extract_strided_slice %322 {offsets = [8, 0], sizes = [1, 128], strides = [1, 1]} : vector<9x128xf32> to vector<1x128xf32>
    %473 = vector.broadcast %472 : vector<1x128xf32> to vector<32x128xf32>
    %474 = arith.mulf %471, %473 : vector<32x128xf32>
    %475 = arith.addf %467, %474 : vector<32x128xf32>
    %476 = vector.broadcast %407 : vector<32x1xf32> to vector<32x128xf32>
    %477 = arith.mulf %475, %476 : vector<32x128xf32>
    %478 = vector.broadcast %408 : vector<32x1xf32> to vector<32x128xf32>
    %479 = arith.addf %477, %478 : vector<32x128xf32>
    %cst_237 = arith.constant 0.000000e+00 : f32
    %480 = vector.broadcast %cst_237 : f32 to vector<32x128xf32>
    %481 = arith.maximumf %479, %480 : vector<32x128xf32>
    %c0_238 = arith.constant 0 : index
    %c0_239 = arith.constant 0 : index
    %c0_240 = arith.constant 0 : index
    %482 = vector.load %arg16[%c0_238, %c0_239, %c0_240] : memref<1x32x128xf32, #tpu.memory_space<vmem>>, vector<1x32x128xf32>
    %483 = vector.shape_cast %482 : vector<1x32x128xf32> to vector<32x128xf32>
    %484 = vector.shape_cast %481 : vector<32x128xf32> to vector<1x32x128xf32>
    tpu.vector_store %arg16[%c0_238, %c0_239, %c0_240], %484 {strides = array<i32>} : memref<1x32x128xf32, #tpu.memory_space<vmem>>, vector<1x32x128xf32>,
    return
  }
  func.func @transform_0(%arg0: i32) -> (i32, i32, i32) {
    %c0_i32 = arith.constant 0 : i32
    %c0_i32_0 = arith.constant 0 : i32
    %c0_i32_1 = arith.constant 0 : i32
    return %arg0, %c0_i32, %c0_i32_0 : i32, i32, i32
  }
  func.func @transform_1(%arg0: i32) -> (i32, i32, i32) {
    %c0_i32 = arith.constant 0 : i32
    %c0_i32_0 = arith.constant 0 : i32
    %c0_i32_1 = arith.constant 0 : i32
    return %arg0, %c0_i32, %c0_i32_0 : i32, i32, i32
  }
  func.func @transform_2(%arg0: i32) -> (i32, i32, i32) {
    %c0_i32 = arith.constant 0 : i32
    %c0_i32_0 = arith.constant 0 : i32
    %c0_i32_1 = arith.constant 0 : i32
    return %arg0, %c0_i32, %c0_i32_0 : i32, i32, i32
  }
  func.func @transform_3(%arg0: i32) -> (i32, i32, i32) {
    %c0_i32 = arith.constant 0 : i32
    %c0_i32_0 = arith.constant 0 : i32
    %c0_i32_1 = arith.constant 0 : i32
    return %arg0, %c0_i32, %c0_i32_0 : i32, i32, i32
  }
  func.func @transform_4(%arg0: i32) -> (i32, i32) {
    %c0_i32 = arith.constant 0 : i32
    %c0_i32_0 = arith.constant 0 : i32
    %c0_i32_1 = arith.constant 0 : i32
    return %c0_i32, %c0_i32_0 : i32, i32
  }
  func.func @transform_5(%arg0: i32) -> (i32, i32, i32) {
    %c0_i32 = arith.constant 0 : i32
    %c0_i32_0 = arith.constant 0 : i32
    %c0_i32_1 = arith.constant 0 : i32
    %c0_i32_2 = arith.constant 0 : i32
    return %c0_i32, %c0_i32_0, %c0_i32_1 : i32, i32, i32
  }
  func.func @transform_6(%arg0: i32) -> (i32, i32, i32) {
    %c0_i32 = arith.constant 0 : i32
    %c0_i32_0 = arith.constant 0 : i32
    %c0_i32_1 = arith.constant 0 : i32
    %c0_i32_2 = arith.constant 0 : i32
    return %c0_i32, %c0_i32_0, %c0_i32_1 : i32, i32, i32
  }
  func.func @transform_7(%arg0: i32) -> (i32, i32, i32) {
    %c0_i32 = arith.constant 0 : i32
    %c0_i32_0 = arith.constant 0 : i32
    %c0_i32_1 = arith.constant 0 : i32
    %c0_i32_2 = arith.constant 0 : i32
    return %c0_i32, %c0_i32_0, %c0_i32_1 : i32, i32, i32
  }
  func.func @transform_8(%arg0: i32) -> (i32, i32, i32) {
    %c0_i32 = arith.constant 0 : i32
    %c0_i32_0 = arith.constant 0 : i32
    %c0_i32_1 = arith.constant 0 : i32
    %c0_i32_2 = arith.constant 0 : i32
    return %c0_i32, %c0_i32_0, %c0_i32_1 : i32, i32, i32
  }
  func.func @transform_9(%arg0: i32) -> (i32, i32, i32) {
    %c0_i32 = arith.constant 0 : i32
    %c0_i32_0 = arith.constant 0 : i32
    %c0_i32_1 = arith.constant 0 : i32
    %c0_i32_2 = arith.constant 0 : i32
    return %c0_i32, %c0_i32_0, %c0_i32_1 : i32, i32, i32
  }
  func.func @transform_10(%arg0: i32) -> (i32, i32, i32) {
    %c0_i32 = arith.constant 0 : i32
    %c0_i32_0 = arith.constant 0 : i32
    %c0_i32_1 = arith.constant 0 : i32
    %c0_i32_2 = arith.constant 0 : i32
    return %c0_i32, %c0_i32_0, %c0_i32_1 : i32, i32, i32
  }
  func.func @transform_11(%arg0: i32) -> (i32, i32) {
    %c0_i32 = arith.constant 0 : i32
    %c0_i32_0 = arith.constant 0 : i32
    %c0_i32_1 = arith.constant 0 : i32
    return %c0_i32, %c0_i32_0 : i32, i32
  }
  func.func @transform_12(%arg0: i32) -> (i32, i32) {
    %c0_i32 = arith.constant 0 : i32
    %c0_i32_0 = arith.constant 0 : i32
    %c0_i32_1 = arith.constant 0 : i32
    return %c0_i32, %c0_i32_0 : i32, i32
  }
  func.func @transform_13(%arg0: i32) -> (i32, i32) {
    %c0_i32 = arith.constant 0 : i32
    %c0_i32_0 = arith.constant 0 : i32
    %c0_i32_1 = arith.constant 0 : i32
    return %c0_i32, %c0_i32_0 : i32, i32
  }
  func.func @transform_14(%arg0: i32) -> (i32, i32) {
    %c0_i32 = arith.constant 0 : i32
    %c0_i32_0 = arith.constant 0 : i32
    %c0_i32_1 = arith.constant 0 : i32
    return %c0_i32, %c0_i32_0 : i32, i32
  }
  func.func @transform_15(%arg0: i32) -> (i32, i32, i32) {
    %c0_i32 = arith.constant 0 : i32
    %c0_i32_0 = arith.constant 0 : i32
    %c0_i32_1 = arith.constant 0 : i32
    return %arg0, %c0_i32, %c0_i32_0 : i32, i32, i32
  }
}

</mosaic_0001>

<bundles_post_ra>
// kernel: attention_forward.1
= control target key start
LH: loop header
LB: loop body
LE: loop exit
PB: predicated region body
PF: predicated region fallthrough
CT: control target
= control target key end

     0   :  { %vm55_vm0 = vcmask 523264   ;;  %vm76_vm1 = vcmask 15360   ;;  %vm5702_vm2 = vmmov 0   ;;  %vm198_vm3 = vcmask 261120   ;;  %s5705_s24 = smov 9   ;;  %s5708_s25 = smov 1   ;;  %s7897_s0 = inlined_call_operand.vmem [shape: f32[2,32,64], index: 0, kind: input, shape index: {}]   ;;  %s7898_s2 = inlined_call_operand.vmem [shape: f32[2,32,64], index: 2, kind: input, shape index: {}]   ;;  %s7899_s1 = inlined_call_operand.vmem [shape: f32[2,32,64], index: 1, kind: input, shape index: {}]   ;;  %s7900_s5 = inlined_call_operand.vmem [shape: f32[3,32,2], index: 5, kind: input, shape index: {}]   ;;  %s7901_s6 = inlined_call_operand.vmem [shape: f32[3,32,2], index: 6, kind: input, shape index: {}]   ;;  %s7902_s7 = inlined_call_operand.vmem [shape: bf16[3,48,32], index: 7, kind: input, shape index: {}]   ;;  %s7903_s8 = inlined_call_operand.vmem [shape: f32[3,48,1], index: 8, kind: input, shape index: {}]   ;;  %s7904_s9 = inlined_call_operand.vmem [shape: bf16[9,32,96], index: 9, kind: input, shape index: {}]   ;;  %s7905_s11 = inlined_call_operand.vmem [shape: f32[32,1], index: 11, kind: input, shape index: {}]   ;;  %s7906_s12 = inlined_call_operand.vmem [shape: f32[32,1], index: 12, kind: input, shape index: {}]   ;;  %s7907_s3 = inlined_call_operand.vmem [shape: f32[2,32,64], index: 3, kind: input, shape index: {}]   ;;  %s7908_s13 = inlined_call_operand.vmem [shape: f32[32,1], index: 13, kind: input, shape index: {}]   ;;  %s7909_s14 = inlined_call_operand.vmem [shape: f32[32,1], index: 14, kind: input, shape index: {}]   ;;  %s7910_s10 = inlined_call_operand.vmem [shape: bf16[9,32,64], index: 10, kind: input, shape index: {}]   ;;  %s7911_s4 = inlined_call_operand.vmem [shape: f32[9,128], index: 4, kind: input, shape index: {}]   ;;  %s7912_s15 = inlined_call_operand.vmem [shape: f32[1,32,128], index: 15, kind: output, shape index: {}]  }
   0x1   :  { %v5796_v0 = vld [vmem:[%s7897_s0] sm:$0xff]  ;;  %v5801_v1 = vld [vmem:[%s7897_s0 + $0x10] sm:$0xff]  ;;  %v5806_v2 = vld [vmem:[%s7897_s0 + $0x8] sm:$0xff]  ;;  %vm736_vm4 = vcmask 1043456   ;;  %vm723_vm5 = vcmask 64512   ;;  %vm2676_vm6 = vcmask 785408  }
   0x2   :  { %v56_v3 = vsel %vm55_vm0, %v5796_v0, -inf  ;;  %v62_v4 = vsel %vm55_vm0, %v5801_v1, -inf  ;;  %v5815_v5 = vld [vmem:[%s7897_s0 + $0x18] sm:$0xff]  ;;  %v59_v6 = vsel %vm55_vm0, %v5806_v2, -inf  ;;  %v5824_v8 = vld [vmem:[%s7898_s2] sm:$0xff]  ;;  %v5829_v9 = vld [vmem:[%s7898_s2 + $0x8] sm:$0xff] }
   0x3   :  { %57 = vmax.xlane.f32.xlu0 %v56_v3  ;;  %63 = vmax.xlane.f32.xlu1 %v62_v4  ;;  %v65_v7 = vsel %vm55_vm0, %v5815_v5, -inf  ;;  %v492_v10 = vsel %vm55_vm0, %v5824_v8, -inf  ;;  %v495_v11 = vsel %vm55_vm0, %v5829_v9, -inf  ;;  %v5838_v12 = vld [vmem:[%s7898_s2 + $0x10] sm:$0xff]  ;;  %v5843_v13 = vld [vmem:[%s7898_s2 + $0x18] sm:$0xff]  ;;  %v5852_v16 = vld [vmem:[%s7899_s1] sm:$0xff] }
   0x4   :  { %v498_v14 = vsel %vm55_vm0, %v5838_v12, -inf  ;;  %v501_v15 = vsel %vm55_vm0, %v5843_v13, -inf  ;;  %v5857_v17 = vld [vmem:[%s7899_s1 + $0x8] sm:$0xff]  ;;  %v273_v18 = vsel %vm55_vm0, %v5852_v16, -inf  ;;  %v5866_v20 = vld [vmem:[%s7899_s1 + $0x10] sm:$0xff]  ;;  %v5871_v21 = vld [vmem:[%s7899_s1 + $0x18] sm:$0xff] }
   0x5   :  { %v276_v19 = vsel %vm55_vm0, %v5857_v17, -inf  ;;  %v279_v22 = vsel %vm55_vm0, %v5866_v20, -inf  ;;  %v282_v23 = vsel %vm55_vm0, %v5871_v21, -inf  ;;  %v5880_v24 = vld [vmem:[%s7900_s5] sm:$0xff]  ;;  %v5885_v27 = vld [vmem:[%s7900_s5 + $0x10] sm:$0xff]  ;;  %v5890_v28 = vld [vmem:[%s7900_s5 + $0x8] sm:$0xff] }
   0x6   :  { %v5895_v29 = vld [vmem:[%s7900_s5 + $0x18] sm:$0xff]  ;;  %v5904_v36 = vld [vmem:[%s7900_s5 + $0x40] sm:$0xff]  ;;  %v5909_v37 = vld [vmem:[%s7900_s5 + $0x48] sm:$0xff]  ;;  %s5709_s26 = smov 127   ;;  %s5710_s27 = smov 121  }
   0x7   :  { %60 = vmax.xlane.f32.xlu0 %v59_v6  ;;  %66 = vmax.xlane.f32.xlu1 %v65_v7  ;;  %v5920_v48 = vld [vmem:[%s7900_s5 + $0x50] sm:$0xff]  ;;  %v5925_v49 = vld [vmem:[%s7900_s5 + $0x58] sm:$0xff]  ;;  %v5934_v59 = vld [vmem:[%s7900_s5 + $0x20] sm:$0xff]  ;;  %s5712_s28 = smov 119  }
   0x8   :  { %v5939_v60 = vld [vmem:[%s7900_s5 + $0x28] sm:$0xff] }
   0xb   :  { %493 = vmax.xlane.f32.xlu0 %v492_v10  ;;  %496 = vmax.xlane.f32.xlu1 %v495_v11 }
   0xf   :  { %499 = vmax.xlane.f32.xlu0 %v498_v14  ;;  %502 = vmax.xlane.f32.xlu1 %v501_v15  ;;  %v5948_v15 = vld [vmem:[%s7900_s5 + $0x30] sm:$0xff] }
  0x13   :  { %274 = vmax.xlane.f32.xlu0 %v273_v18  ;;  %277 = vmax.xlane.f32.xlu1 %v276_v19  ;;  %v5953_v18 = vld [vmem:[%s7900_s5 + $0x38] sm:$0xff] }
  0x17   :  { %280 = vmax.xlane.f32.xlu0 %v279_v22  ;;  %283 = vmax.xlane.f32.xlu1 %v282_v23 }
  0x90   :  { %v58_v25 = vpop.xlane.xlu0 %57  ;;  %v64_v26 = vpop.xlane.xlu1 %63 }
  0x91   :  { %v72_v30 = vmul.f32 %v5880_v24, %v58_v25  ;;  %v74_v33 = vmul.f32 %v5885_v27, %v64_v26 }
  0x93   :  { %v77_v38 = vsel %vm76_vm1, %v72_v30, 0.0  ;;  %v80_v43 = vsel %vm76_vm1, %v74_v33, 0.0 }
  0x94   :  { %v61_v31 = vpop.xlane.xlu0 %60  ;;  %v67_v32 = vpop.xlane.xlu1 %66 }
  0x95   :  { %v73_v34 = vmul.f32 %v5890_v28, %v61_v31  ;;  %v75_v35 = vmul.f32 %v5895_v29, %v67_v32 }
  0x97   :  { %v78_v39 = vsel %vm76_vm1, %v73_v34, 0.0  ;;  %v82_v44 = vsel %vm76_vm1, %v75_v35, 0.0 }
  0x98   :  { %v79_v40 = vadd.f32 %v78_v39, %v77_v38  ;;  %v494_v41 = vpop.xlane.xlu0 %493  ;;  %v497_v42 = vpop.xlane.xlu1 %496 }
  0x99   :  { %v509_v45 = vmul.f32 %v5904_v36, %v494_v41  ;;  %v510_v46 = vmul.f32 %v5909_v37, %v497_v42 }
  0x9a   :  { %v81_v47 = vadd.f32 %v80_v43, %v79_v40  ;;  %v5964_v43 = vld [vmem:[%s7901_s6 + $0x8] sm:$0xff] }
  0x9b   :  { %v513_v50 = vsel %vm76_vm1, %v509_v45, 0.0  ;;  %v514_v51 = vsel %vm76_vm1, %v510_v46, 0.0 }
  0x9c   :  { %v83_v52 = vadd.f32 %v82_v44, %v81_v47  ;;  %v515_v53 = vadd.f32 %v514_v51, %v513_v50  ;;  %v500_v54 = vpop.xlane.xlu0 %499  ;;  %v503_v55 = vpop.xlane.xlu1 %502  ;;  %v5969_v44 = vld [vmem:[%s7901_s6] sm:$0xff]  ;;  %v5974_v50 = vld [vmem:[%s7901_s6 + $0x18] sm:$0xff]  ;;  %v5979_v51 = vld [vmem:[%s7901_s6 + $0x10] sm:$0xff] }
  0x9d   :  { %v511_v56 = vmul.f32 %v5920_v48, %v500_v54  ;;  %v512_v57 = vmul.f32 %v5925_v49, %v503_v55 }
  0x9e   :  { %v84_v58 = vrot.slane %v83_v52, 4 }
  0x9f   :  { %v516_v61 = vsel %vm76_vm1, %v511_v56, 0.0  ;;  %v518_v62 = vsel %vm76_vm1, %v512_v57, 0.0 }
  0xa0   :  { %v85_v63 = vadd.f32 %v84_v58, %v83_v52  ;;  %v517_v3 = vadd.f32 %v516_v61, %v515_v53  ;;  %v275_v4 = vpop.xlane.xlu0 %274  ;;  %v278_v6 = vpop.xlane.xlu1 %277 }
  0xa1   :  { %v290_v7 = vmul.f32 %v5934_v59, %v275_v4  ;;  %v291_v10 = vmul.f32 %v5939_v60, %v278_v6  ;;  %v5995_v4 = vld [vmem:[%s7901_s6 + $0x40] sm:$0xff] }
  0xa2   :  { %v86_v11 = vrot.slane %v85_v63, 2  ;;  %v519_v14 = vadd.f32 %v518_v62, %v517_v3  ;;  %v5990_v3 = vld [vmem:[%s7901_s6 + $0x48] sm:$0xff] }
  0xa3   :  { %v294_v19 = vsel %vm76_vm1, %v290_v7, 0.0  ;;  %v295_v22 = vsel %vm76_vm1, %v291_v10, 0.0  ;;  %v6000_v10 = vld [vmem:[%s7901_s6 + $0x58] sm:$0xff] }
  0xa4   :  { %v87_v23 = vadd.f32 %v86_v11, %v85_v63  ;;  %v520_v25 = vrot.slane %v519_v14, 4  ;;  %v296_v26 = vadd.f32 %v295_v22, %v294_v19  ;;  %v281_v30 = vpop.xlane.xlu0 %280  ;;  %v284_v31 = vpop.xlane.xlu1 %283 }
  0xa5   :  { %v292_v32 = vmul.f32 %v5948_v15, %v281_v30  ;;  %v293_v33 = vmul.f32 %v5953_v18, %v284_v31 }
  0xa6   :  { %v88_v34 = vrot.slane %v87_v23, 1  ;;  %v521_v35 = vadd.f32 %v520_v25, %v519_v14  ;;  %v6006_v14 = vld [vmem:[%s7901_s6 + $0x50] sm:$0xff] }
  0xa7   :  { %v297_v38 = vsel %vm76_vm1, %v292_v32, 0.0  ;;  %v299_v39 = vsel %vm76_vm1, %v293_v33, 0.0 }
  0xa8   :  { %v89_v40 = vadd.f32 %v88_v34, %v87_v23  ;;  %v522_v41 = vrot.slane %v521_v35, 2  ;;  %v298_v42 = vadd.f32 %v297_v38, %v296_v26  ;;  %v6023_v38 = vld [vmem:[%s7901_s6 + $0x20] sm:$0xff] }
  0xaa   :  { %v523_v45 = vadd.f32 %v522_v41, %v521_v35  ;;  %v90_v46 = vmax.f32 %v89_v40, 0.0  ;;  %v300_v47 = vadd.f32 %v299_v39, %v298_v42  ;;  %v6018_v35 = vld [vmem:[%s7901_s6 + $0x28] sm:$0xff]  ;;  %v4374_v42 = vld [vmem:[%s7901_s6 + $0x38] sm:$0xff] }
  0xac   :  { %v524_v52 = vrot.slane %v523_v45, 1  ;;  %v96_v53 = vmul.f32 %v5964_v43, %v90_v46  ;;  %v95_v54 = vmul.f32 %v5969_v44, %v90_v46  ;;  %v301_v55 = vrot.slane %v300_v47, 4 }
  0xad   :  { %v98_v56 = vmul.f32 %v5974_v50, %v90_v46  ;;  %v97_v57 = vmul.f32 %v5979_v51, %v90_v46 }
  0xae   :  { %v525_v58 = vadd.f32 %v524_v52, %v523_v45  ;;  %v102_v61 = vsel %vm76_vm1, %v96_v53, 0.0  ;;  %v99_v62 = vsel %vm76_vm1, %v95_v54, 0.0  ;;  %v302_v63 = vadd.f32 %v301_v55, %v300_v47  ;;  %v4373_v45 = vld [vmem:[%s7901_s6 + $0x30] sm:$0xff] }
  0xaf   :  { %103 = vadd.xlane.f32.xlu1 %v102_v61  ;;  %100 = vadd.xlane.f32.xlu0 %v99_v62  ;;  %v108_v11 = vsel %vm76_vm1, %v98_v56, 0.0  ;;  %v105_v22 = vsel %vm76_vm1, %v97_v57, 0.0  ;;  %v5703_v61 = vmov 0   ;;  %v148_v62 = vld [vmem:[%s7903_s8 + $0x8] sm:$0xff] }
  0xb0   :  { %v303_v6 = vrot.slane %v302_v63, 2  ;;  %v526_v7 = vmax.f32 %v525_v58, 0.0  ;;  %v7913_v58 = vmov 0.0   ;;  %5358 = vset.pattern.permute.xlu1 %v5703_v61  ;;  %5357 = vset.pattern.permute.xlu0 %v5703_v61 }
  0xb1   :  { %4859 = vmatprep.subr.bf16.mxu0 %v7913_v58  ;;  %4875 = vmatprep.subr.bf16.mxu1 %v7913_v58 }
  0xb2   :  { %v304_v19 = vadd.f32 %v303_v6, %v302_v63  ;;  %v533_v23 = vmul.f32 %v5990_v3, %v526_v7  ;;  %v532_v25 = vmul.f32 %v5995_v4, %v526_v7  ;;  %v535_v26 = vmul.f32 %v6000_v10, %v526_v7  ;;  %4863 = vmatprep.mubr.msk.bf16.mxu0 %vm5702_vm2, %v7913_v58  ;;  %v4416_v63 = vld [vmem:[%s7903_s8 + $0x68] sm:$0xff]  ;;  %v4386_v6 = vld [vmem:[%s7903_s8 + $0x38] sm:$0xff] }
  0xb3   :  { %109 = vadd.xlane.f32.xlu1 %v108_v11  ;;  %106 = vadd.xlane.f32.xlu0 %v105_v22  ;;  %v534_v33 = vmul.f32 %v6006_v14, %v526_v7  ;;  %v4385_v7 = vld [vmem:[%s7903_s8 + $0x30] sm:$0xff]  ;;  %v4415_v11 = vld [vmem:[%s7903_s8 + $0x60] sm:$0xff] }
  0xb4   :  { %v305_v30 = vrot.slane %v304_v19, 1  ;;  %v539_v31 = vsel %vm76_vm1, %v533_v23, 0.0  ;;  %v536_v32 = vsel %vm76_vm1, %v532_v25, 0.0  ;;  %v545_v39 = vsel %vm76_vm1, %v535_v26, 0.0  ;;  %4879 = vmatprep.mubr.msk.bf16.mxu1 %vm5702_vm2, %v7913_v58 }
  0xb5   :  { %v542_v40 = vsel %vm76_vm1, %v534_v33, 0.0 }
  0xb6   :  { %v306_v34 = vadd.f32 %v305_v30, %v304_v19  ;;  %v147_v19 = vld [vmem:[%s7903_s8] sm:$0xff] }
  0xb7   :  { %540 = vadd.xlane.f32.xlu1 %v539_v31  ;;  %537 = vadd.xlane.f32.xlu0 %v536_v32 }
  0xb8   :  { %v307_v41 = vmax.f32 %v306_v34, 0.0 }
  0xba   :  { %v314_v46 = vmul.f32 %v6018_v35, %v307_v41  ;;  %v313_v47 = vmul.f32 %v6023_v38, %v307_v41  ;;  %v316_v54 = vmul.f32 %v4374_v42, %v307_v41  ;;  %v315_v55 = vmul.f32 %v4373_v45, %v307_v41 }
  0xbb   :  { %546 = vadd.xlane.f32.xlu1 %v545_v39  ;;  %543 = vadd.xlane.f32.xlu0 %v542_v40 }
  0xbc   :  { %v320_v52 = vsel %vm76_vm1, %v314_v46, 0.0  ;;  %v317_v53 = vsel %vm76_vm1, %v313_v47, 0.0  ;;  %v326_v56 = vsel %vm76_vm1, %v316_v54, 0.0  ;;  %v323_v57 = vsel %vm76_vm1, %v315_v55, 0.0 }
  0xbf   :  { %321 = vadd.xlane.f32.xlu1 %v320_v52  ;;  %318 = vadd.xlane.f32.xlu0 %v317_v53 }
  0xc3   :  { %327 = vadd.xlane.f32.xlu1 %v326_v56  ;;  %324 = vadd.xlane.f32.xlu0 %v323_v57 }
  0xd4   :  { %160 = vperm.xlu1 %5358, %v148_v62  }
  0xd8   :  { %380 = vperm.xlu1 %5358, %v4386_v6  }
  0xd9   :  { %599 = vperm.xlu0 %5357, %v4416_v63  }
  0xdc   :  { %375 = vperm.xlu1 %5358, %v4385_v7  }
  0xe0   :  { %594 = vperm.xlu1 %5358, %v4415_v11  }
  0xe4   :  { %155 = vperm.xlu1 %5358, %v147_v19  }
 0x13c   :  { %v104_v22 = vpop.xlane.xlu1 %103  ;;  %v101_v23 = vpop.xlane.xlu0 %100 }
 0x13d   :  { %v4358_v25 = vmul.f32 -1.442695, %v104_v22  ;;  %v4357_v26 = vmul.f32 -1.442695, %v101_v23 }
 0x13f   :  { %5404 = vpow2.f32 %v4358_v25 }
 0x140   :  { %5406 = vpow2.f32 %v4357_v26  ;;  %v110_v30 = vpop.xlane.xlu1 %109  ;;  %v107_v31 = vpop.xlane.xlu0 %106 }
 0x141   :  { %v4360_v32 = vmul.f32 -1.442695, %v110_v30  ;;  %v4359_v33 = vmul.f32 -1.442695, %v107_v31 }
 0x143   :  { %5408 = vpow2.f32 %v4360_v32 }
 0x144   :  { %5410 = vpow2.f32 %v4359_v33  ;;  %v541_v34 = vpop.xlane.xlu1 %540  ;;  %v538_v39 = vpop.xlane.xlu0 %537 }
 0x145   :  { %v4406_v40 = vmul.f32 -1.442695, %v541_v34  ;;  %v4405_v41 = vmul.f32 -1.442695, %v538_v39 }
 0x147   :  { %5412 = vpow2.f32 %v4406_v40 }
 0x148   :  { %5414 = vpow2.f32 %v4405_v41  ;;  %v547_v42 = vpop.xlane.xlu1 %546  ;;  %v544_v45 = vpop.xlane.xlu0 %543 }
 0x149   :  { %v5405_v46 = vpop.eup %5404  ;;  %v4408_v47 = vmul.f32 -1.442695, %v547_v42  ;;  %v4407_v54 = vmul.f32 -1.442695, %v544_v45 }
 0x14a   :  { %v5407_v52 = vpop.eup %5406  ;;  %v124_v53 = vadd.f32 1.0, %v5405_v46 }
 0x14b   :  { %v123_v55 = vadd.f32 1.0, %v5407_v52  ;;  %5416 = vpow2.f32 %v4408_v47 }
 0x14c   :  { %5418 = vrcp.f32 %v124_v53  ;;  %v322_v56 = vpop.xlane.xlu1 %321  ;;  %v319_v57 = vpop.xlane.xlu0 %318 }
 0x14d   :  { %v5409_v61 = vpop.eup %5408  ;;  %5420 = vrcp.f32 %v123_v55  ;;  %v4376_v62 = vmul.f32 -1.442695, %v322_v56  ;;  %v4375_v7 = vmul.f32 -1.442695, %v319_v57 }
 0x14e   :  { %v5411_v63 = vpop.eup %5410  ;;  %v126_v6 = vadd.f32 1.0, %v5409_v61  ;;  %5422 = vpow2.f32 %v4407_v54 }
 0x14f   :  { %v125_v11 = vadd.f32 1.0, %v5411_v63  ;;  %5424 = vpow2.f32 %v4376_v62 }
 0x150   :  { %5426 = vrcp.f32 %v126_v6  ;;  %v328_v19 = vpop.xlane.xlu1 %327  ;;  %v325_v22 = vpop.xlane.xlu0 %324 }
 0x151   :  { %v5413_v23 = vpop.eup %5412  ;;  %5428 = vrcp.f32 %v125_v11  ;;  %v4378_v25 = vmul.f32 -1.442695, %v328_v19  ;;  %v4377_v31 = vmul.f32 -1.442695, %v325_v22  ;;  %v6071_v11 = vld [vmem:[%s7902_s7] sm:$0xff]  }
 0x152   :  { %v5415_v26 = vpop.eup %5414  ;;  %v561_v30 = vadd.f32 1.0, %v5413_v23  ;;  %5430 = vpow2.f32 %v4375_v7 }
 0x153   :  { %v560_v32 = vadd.f32 1.0, %v5415_v26  ;;  %5432 = vpow2.f32 %v4378_v25 }
 0x154   :  { %5434 = vrcp.f32 %v561_v30 }
 0x155   :  { %v5417_v33 = vpop.eup %5416  ;;  %5436 = vrcp.f32 %v560_v32 }
 0x156   :  { %v5419_v34 = vpop.eup %5418  ;;  %v563_v39 = vadd.f32 1.0, %v5417_v33  ;;  %5438 = vpow2.f32 %v4377_v31  ;;  %v6086_v31 = vld [vmem:[%s7902_s7 + $0x8] sm:$0xff]  }
 0x157   :  { %v5421_v40 = vpop.eup %5420  ;;  %v136_v41 = vmul.f32 %v5419_v34, %v5806_v2 }
 0x158   :  { %v5423_v42 = vpop.eup %5422  ;;  %5440 = vrcp.f32 %v563_v39  ;;  %v135_v45 = vmul.f32 %v5421_v40, %v5796_v0 }
 0x159   :  { %v5425_v46 = vpop.eup %5424  ;;  %v562_v47 = vadd.f32 1.0, %v5423_v42 }
 0x15a   :  { %v5427_v52 = vpop.eup %5426  ;;  %v342_v53 = vadd.f32 1.0, %v5425_v46  ;;  %v139_v54 = vpack.c.bf16 %v136_v41, %v135_v45  ;;  %v5362_v45 = vld [vmem:[%s7902_s7 + $0x18] sm:$0xff]   ;;  %v6133_v46 = vld [vmem:[%s7902_s7 + $0x40] sm:$0xff]  }
 0x15b   :  { %v5429_v55 = vpop.eup %5428  ;;  %5442 = vrcp.f32 %v562_v47  ;;  %v138_v56 = vmul.f32 %v5427_v52, %v5815_v5  ;;  %v5366_v47 = vld [vmem:[%s7902_s7 + $0x20] sm:$0xff]   ;;  %v6143_v52 = vpop.permute.xlu1 %160 }
 0x15c   :  { %v5431_v57 = vpop.eup %5430  ;;  %5444 = vrcp.f32 %v342_v53  ;;  %4860 = vmatpush3.bf16.msra.mxu0 %v139_v54  ;;  %v137_v61 = vmul.f32 %v5429_v55, %v5801_v1  ;;  %v5367_v53 = vld [vmem:[%s7902_s7 + $0x28] sm:$0xff]  }
 0x15d   :  { %v5433_v62 = vpop.eup %5432  ;;  %v341_v2 = vadd.f32 1.0, %v5431_v57  ;;  %4861 = vmatprep.subr.bf16.mxu0 %v7913_v58 }
 0x15e   :  { %v5435_v63 = vpop.eup %5434  ;;  %v344_v0 = vadd.f32 1.0, %v5433_v62  ;;  %v140_v6 = vpack.c.bf16 %v138_v56, %v137_v61 }
 0x15f   :  { %v5437_v7 = vpop.eup %5436  ;;  %5446 = vrcp.f32 %v341_v2  ;;  %v573_v5 = vmul.f32 %v5435_v63, %v5829_v9  ;;  %v6150_v62 = vpop.permute.xlu1 %380 }
 0x160   :  { %v5439_v19 = vpop.eup %5438  ;;  %5448 = vrcp.f32 %v344_v0  ;;  %4862 = vmatpush3.bf16.msra.mxu0 %v140_v6  ;;  %v572_v1 = vmul.f32 %v5437_v7, %v5824_v8  ;;  %7919 = vst [vmem:[#allocation2_spill] sm:$0xff] %v6150_v62 }
 0x161   :  { %v343_v22 = vadd.f32 1.0, %v5439_v19  ;;  %4891 = vmatprep.subr.bf16.mxu0 %v7913_v58 }
 0x162   :  { %v5441_v23 = vpop.eup %5440  ;;  %v576_v25 = vpack.c.bf16 %v573_v5, %v572_v1 }
 0x163   :  { %5450 = vrcp.f32 %v343_v22  ;;  %4864 = vmatmul.mubr.msk.bf16.vlgmr.msra.gmra.mrb[0].mxu0 %vm198_vm3, %v6071_v11  ;;  %v575_v26 = vmul.f32 %v5441_v23, %v5843_v13  ;;  %v6154_v6 = vpop.permute.xlu1 %375 }
 0x164   :  { %4892 = vmatpush3.bf16.msra.mxu0 %v576_v25  ;;  %4867 = vmatprep.mubr.msk.bf16.mxu0 %vm5702_vm2, %v7913_v58  ;;  %7920 = vst [vmem:[#allocation3_spill] sm:$0xff] %v6154_v6 }
 0x165   :  { %v5443_v9 = vpop.eup %5442  ;;  %4893 = vmatprep.subr.bf16.mxu0 %v7913_v58 }
 0x166   :  { %v5445_v30 = vpop.eup %5444  ;;  %v574_v8 = vmul.f32 %v5443_v9, %v5838_v12 }
 0x167   :  { %v354_v33 = vmul.f32 %v5445_v30, %v5857_v17  ;;  %v6099_v17 = vld [vmem:[%s7902_s7 + $0x10] sm:$0xff]   ;;  %v6158_v19 = vpop.permute.xlu1 %594 }
 0x168   :  { %v577_v32 = vpack.c.bf16 %v575_v26, %v574_v8 }
 0x169   :  { %v5447_v34 = vpop.eup %5446 }
 0x16a   :  { %v5449_v39 = vpop.eup %5448  ;;  %4894 = vmatpush3.bf16.msra.mxu0 %v577_v32  ;;  %v353_v13 = vmul.f32 %v5447_v34, %v5852_v16 }
 0x16b   :  { %4868 = vmatmul.mubr.msk.bf16.gmra.mrb[4].mxu0 %vm198_vm3, %v6086_v31  ;;  %v356_v40 = vmul.f32 %v5449_v39, %v5871_v21  ;;  %v6124_v21 = vld [vmem:[%s7902_s7 + $0x38] sm:$0xff]   ;;  %v6165_v34 = vpop.permute.xlu1 %155 }
 0x16c   :  { %4871 = vmatprep.mubr.msk.bf16.mxu0 %vm5702_vm2, %v7913_v58  ;;  %v357_v12 = vpack.c.bf16 %v354_v33, %v353_v13 }
 0x16d   :  { %v5451_v41 = vpop.eup %5450 }
 0x16e   :  { %4876 = vmatpush3.bf16.msra.mxu1 %v357_v12  ;;  %v355_v42 = vmul.f32 %v5451_v41, %v5866_v20  ;;  %v6115_v20 = vld [vmem:[%s7902_s7 + $0x30] sm:$0xff]   ;;  %v6169_v12 = vpop.permute.xlu0 %599 }
 0x16f   :  { %4877 = vmatprep.subr.bf16.mxu1 %v7913_v58 }
 0x170   :  { %v358_v16 = vpack.c.bf16 %v356_v40, %v355_v42 }
 0x172   :  { %4878 = vmatpush3.bf16.msra.mxu1 %v358_v16 }
 0x173   :  { %4872 = vmatmul.mubr.msk.bf16.gmra.mrb[8].mxu0 %vm198_vm3, %v6099_v17 }
 0x174   :  { %4895 = vmatprep.mubr.msk.bf16.mxu0 %vm5702_vm2, %v7913_v58 }
 0x175   :  { %4880 = vmatmul.mubr.msk.bf16.vlgmr.msra.gmra.mrb[0].mxu1 %vm198_vm3, %v5362_v45  ;;  %v6176_v45 = vld [vmem:[%s7897_s0 + $0x20] sm:$0xff] }
 0x176   :  { %4883 = vmatprep.mubr.msk.bf16.mxu1 %vm5702_vm2, %v7913_v58 }
 0x17b   :  { %4896 = vmatmul.mubr.msk.bf16.vlgmr.msra.gmra.mrb[12].mxu0 %vm198_vm3, %v6115_v20 }
 0x17c   :  { %4899 = vmatprep.mubr.msk.bf16.mxu0 %vm5702_vm2, %v7913_v58 }
 0x17d   :  { %4884 = vmatmul.mubr.msk.bf16.gmra.mrb[4].mxu1 %vm198_vm3, %v5366_v47 }
 0x17e   :  { %4887 = vmatprep.mubr.msk.bf16.mxu1 %vm5702_vm2, %v7913_v58 }
 0x183   :  { %4900 = vmatmul.mubr.msk.bf16.gmra.mrb[16].mxu0 %vm198_vm3, %v6124_v21 }
 0x184   :  { %4903 = vmatprep.mubr.msk.bf16.mxu0 %vm5702_vm2, %v7913_v58 }
 0x185   :  { %4888 = vmatmul.mubr.msk.bf16.gmra.mrb[8].mxu1 %vm198_vm3, %v5367_v53 }
 0x18b   :  { %4904 = vmatmul.mubr.msk.bf16.gmra.mrb[20].mxu0 %vm198_vm3, %v6133_v46 }
 0x236   :  { %v242_v54 = vpop.f32.mrb[0].mxu0 }
 0x237   :  { %v4865_v55 = vpop.f32.mrb[1].mxu0  ;;  %v243_v40 = vadd.f32 %v242_v54, %v6165_v34  ;;  %v1449_v54 = vsel %vm55_vm0, %v6176_v45, -inf }
 0x238   :  { %v245_v56 = vpop.f32.mrb[2].mxu0 }
 0x239   :  { %v246_v57 = vadd.f32 %v245_v56, %v6143_v52  ;;  %v4866_v61 = vpop.f32.mrb[3].mxu0  ;;  %v265_v56 = vpack.c.bf16 %v243_v40, %v243_v40 }
 0x23b   :  { %v266_v2 = vpack.c.bf16 %v246_v57, %v246_v57 }
 0x23d   :  { %954 = vxpose.xlu0.c.b16.start.end [1/1] (short) (narrow) %v266_v2, 64  ;;  %v6186_v2 = vld [vmem:[%s7897_s0 + $0x30] sm:$0xff] }
 0x23e   :  { %v6152_v63 = vpop.f32.mrb[4].mxu0 }
 0x23f   :  { %v4869_v0 = vpop.f32.mrb[5].mxu0 }
 0x240   :  { %v6156_v7 = vpop.f32.mrb[6].mxu0  ;;  %v1455_v0 = vsel %vm55_vm0, %v6186_v2, -inf }
 0x241   :  { %v4870_v5 = vpop.f32.mrb[7].mxu0 }
 0x242   :  { %v6194_v5 = vld [vmem:[%s7897_s0 + $0x38] sm:$0xff] }
 0x246   :  { %v6160_v1 = vpop.f32.mrb[8].mxu0 }
 0x247   :  { %v4873_v22 = vpop.f32.mrb[9].mxu0 }
 0x248   :  { %v6162_v23 = vpop.f32.mrb[10].mxu0  ;;  %v461_v25 = vpop.f32.mrb[0].mxu1  ;;  %v1458_v22 = vsel %vm55_vm0, %v6194_v5, -inf }
 0x249   :  { %v4874_v26 = vpop.f32.mrb[11].mxu0  ;;  %v462_v9 = vadd.f32 %v461_v25, %v6154_v6  ;;  %v4881_v30 = vpop.f32.mrb[1].mxu1 }
 0x24a   :  { %v464_v8 = vpop.f32.mrb[2].mxu1  ;;  %v6202_v26 = vld [vmem:[%s7898_s2 + $0x28] sm:$0xff] }
 0x24b   :  { %v484_v32 = vpack.c.bf16 %v462_v9, %v462_v9  ;;  %v4882_v33 = vpop.f32.mrb[3].mxu1  ;;  %v465_v25 = vadd.f32 %v464_v8, %v6150_v62  ;;  %v1736_v9 = vsel %vm55_vm0, %v6202_v26, -inf }
 0x24c   :  { %v4457_v33 = vld [vmem:[%s7899_s1 + $0x28] sm:$0xff] }
 0x24d   :  { %v738_v39 = vsel %vm736_vm4, %v484_v32, 0  ;;  %5339 = vmatprep.subr.msk.bf16.mxu1 %vm736_vm4, %v484_v32  ;;  %v485_v30 = vpack.c.bf16 %v465_v25, %v465_v25  ;;  %v6209_v32 = vld [vmem:[%s7898_s2 + $0x38] sm:$0xff] }
 0x24e   :  { %v680_v13 = vpop.f32.mrb[12].mxu0  ;;  %4908 = vmatpush3.bf16.msra.mxu1 %v738_v39  ;;  %v1742_v8 = vsel %vm55_vm0, %v6209_v32, -inf  ;;  %v1594_v39 = vsel %vm55_vm0, %v4457_v33, -inf }
 0x24f   :  { %v681_v41 = vadd.f32 %v680_v13, %v6158_v19  ;;  %v4897_v42 = vpop.f32.mrb[13].mxu0  ;;  %v4459_v13 = vld [vmem:[%s7899_s1 + $0x38] sm:$0xff] }
 0x250   :  { %v683_v16 = vpop.f32.mrb[14].mxu0  ;;  %v1600_v40 = vsel %vm55_vm0, %v4459_v13, -inf }
 0x251   :  { %v703_v47 = vpack.c.bf16 %v681_v41, %v681_v41  ;;  %v684_v53 = vadd.f32 %v683_v16, %v6169_v12  ;;  %v4898_v55 = vpop.f32.mrb[15].mxu0  ;;  %v6224_v41 = vld [vmem:[%s7897_s0 + $0x28] sm:$0xff]  ;;  %v6231_v16 = vld [vmem:[%s7898_s2 + $0x20] sm:$0xff] }
 0x252   :  { %v1452_v42 = vsel %vm55_vm0, %v6224_v41, -inf }
 0x253   :  { %v983_v57 = vsel %vm736_vm4, %v703_v47, 0  ;;  %v704_v61 = vpack.c.bf16 %v684_v53, %v684_v53  ;;  %5340 = vmatprep.subr.msk.bf16.mxu0 %vm736_vm4, %v703_v47  ;;  %v1733_v47 = vsel %vm55_vm0, %v6231_v16, -inf  ;;  %v6238_v53 = vld [vmem:[%s7898_s2 + $0x30] sm:$0xff] }
 0x254   :  { %4930 = vmatpush3.bf16.msra.mxu0 %v983_v57  ;;  %v1739_v55 = vsel %vm55_vm0, %v6238_v53, -inf  ;;  %v4456_v57 = vld [vmem:[%s7899_s1 + $0x20] sm:$0xff] }
 0x255   :  { %5341 = vmatprep.subr.msk.bf16.mxu0 %vm736_vm4, %v265_v56  ;;  %707 = vxpose.xlu1.c.b16.start.end [1/1] (short) (narrow) %v704_v61, 64  ;;  %v1591_v61 = vsel %vm55_vm0, %v4456_v57, -inf }
 0x256   :  { %1450 = vmax.xlane.f32.xlu0 %v1449_v54  ;;  %v4458_v54 = vld [vmem:[%s7899_s1 + $0x30] sm:$0xff]  ;;  %v6264_v57 = vpop.f32.mrb[16].mxu0 }
 0x257   :  { %7921 = vst [vmem:[#allocation4_spill] sm:$0xff] %v6264_v57 }
 0x25a   :  { %1456 = vmax.xlane.f32.xlu0 %v1455_v0  ;;  %v1597_v0 = vsel %vm55_vm0, %v4458_v54, -inf }
 0x25e   :  { %1459 = vmax.xlane.f32.xlu0 %v1458_v22 }
 0x262   :  { %1199 = vxpose.xlu1.c.b16.start.end [1/1] (short) (narrow) %v485_v30, 64  ;;  %1737 = vmax.xlane.f32.xlu0 %v1736_v9  ;;  %v1228_v9 = vsel %vm736_vm4, %v265_v56, 0 }
 0x266   :  { %1743 = vmax.xlane.f32.xlu0 %v1742_v8 }
 0x26a   :  { %1595 = vmax.xlane.f32.xlu0 %v1594_v39 }
 0x26e   :  { %1601 = vmax.xlane.f32.xlu0 %v1600_v40 }
 0x27b   :  { %1453 = vmax.xlane.f32.xlu1 %v1452_v42 }
 0x27f   :  { %1734 = vmax.xlane.f32.xlu1 %v1733_v47 }
 0x283   :  { %1740 = vmax.xlane.f32.xlu1 %v1739_v55 }
 0x287   :  { %1592 = vmax.xlane.f32.xlu1 %v1591_v61  ;;  %v4901_v61 = vpop.f32.mrb[17].mxu0 }
 0x288   :  { %v6268_v54 = vpop.f32.mrb[18].mxu0 }
 0x289   :  { %7922 = vst [vmem:[#allocation5_spill] sm:$0xff] %v6268_v54 }
 0x28b   :  { %1598 = vmax.xlane.f32.xlu1 %v1597_v0  ;;  %v4902_v0 = vpop.f32.mrb[19].mxu0 }
 0x2a3   :  { %v962_v22 = vpop.trf.xlu0 }
 0x2a4   :  { %4931 = vmatprep.mubr.msk.bf16.mxu0 %vm723_vm5, %v962_v22  ;;  %v6270_v22 = vpop.f32.mrb[20].mxu0 }
 0x2a5   :  { %7923 = vst [vmem:[#allocation6_spill] sm:$0xff] %v6270_v22 }
 0x2a7   :  { %v963_v25 = vpop.trf.xlu0 }
 0x2a8   :  { %4932 = vmatmul.mubr.msk.bf16.vlgmr.msra.gmra.mrb[24].mxu0 %vm723_vm5, %v963_v25  ;;  %v4905_v25 = vpop.f32.mrb[21].mxu0 }
 0x2a9   :  { %4952 = vmatpush3.bf16.msra.mxu0 %v1228_v9  ;;  %v6272_v9 = vpop.f32.mrb[22].mxu0  ;;  %v6280_v25 = vpop.f32.mrb[4].mxu1 }
 0x2aa   :  { %4973 = vmatprep.subr.bf16.mxu0 %v7913_v58  ;;  %7924 = vst [vmem:[#allocation7_spill] sm:$0xff] %v6272_v9  ;;  %7925 = vst [vmem:[#allocation8_spill] sm:$0xff] %v6280_v25 }
 0x2ab   :  { %v964_v30 = vpop.trf.xlu0 }
 0x2ac   :  { %4935 = vmatprep.mubr.msk.bf16.mxu0 %vm723_vm5, %v964_v30  ;;  %v4906_v30 = vpop.f32.mrb[23].mxu0 }
 0x2af   :  { %v965_v8 = vpop.trf.xlu0 }
 0x2b0   :  { %4936 = vmatmul.mubr.msk.bf16.gmra.mrb[28].mxu0 %vm723_vm5, %v965_v8 }
 0x2bb   :  { %v715_v33 = vpop.trf.xlu1 }
 0x2bc   :  { %4909 = vmatprep.mubr.msk.bf16.mxu1 %vm723_vm5, %v715_v33 }
 0x2bf   :  { %v716_v39 = vpop.trf.xlu1 }
 0x2c0   :  { %4910 = vmatmul.mubr.msk.bf16.vlgmr.msra.gmra.mrb[12].mxu1 %vm723_vm5, %v716_v39 }
 0x2c3   :  { %v717_v13 = vpop.trf.xlu1 }
 0x2c4   :  { %4913 = vmatprep.mubr.msk.bf16.mxu1 %vm723_vm5, %v717_v13 }
 0x2c7   :  { %v718_v56 = vpop.trf.xlu1 }
 0x2c8   :  { %4914 = vmatmul.mubr.msk.bf16.gmra.mrb[16].mxu1 %vm723_vm5, %v718_v56 }
 0x2cb   :  { %v1207_v40 = vpop.trf.xlu1 }
 0x2cc   :  { %4953 = vmatprep.mubr.msk.bf16.mxu0 %vm723_vm5, %v1207_v40 }
 0x2cf   :  { %v1208_v42 = vpop.trf.xlu1 }
 0x2d0   :  { %4954 = vmatmul.mubr.msk.bf16.vlgmr.msra.gmra.mrb[32].mxu0 %vm723_vm5, %v1208_v42 }
 0x2d3   :  { %v1209_v47 = vpop.trf.xlu1 }
 0x2d4   :  { %4957 = vmatprep.mubr.msk.bf16.mxu0 %vm723_vm5, %v1209_v47 }
 0x2d7   :  { %v1210_v55 = vpop.trf.xlu1 }
 0x2d8   :  { %4958 = vmatmul.mubr.msk.bf16.gmra.mrb[36].mxu0 %vm723_vm5, %v1210_v55 }
 0x2d9   :  { %4977 = vmatprep.mubr.msk.bf16.mxu0 %vm5702_vm2, %v7913_v58 }
 0x2e3   :  { %v1451_v8 = vpop.xlane.xlu0 %1450 }
 0x2e4   :  { %v1461_v13 = vmul.f32 %v1451_v8, %v5880_v24  ;;  %v4885_v24 = vpop.f32.mrb[5].mxu1 }
 0x2e6   :  { %v1465_v47 = vsel %vm76_vm1, %v1461_v13, 0.0 }
 0x2e7   :  { %v1457_v33 = vpop.xlane.xlu0 %1456 }
 0x2e8   :  { %v1463_v40 = vmul.f32 %v1457_v33, %v5885_v27  ;;  %v6284_v27 = vpop.f32.mrb[6].mxu1 }
 0x2e9   :  { %7926 = vst [vmem:[#allocation9_spill] sm:$0xff] %v6284_v27 }
 0x2ea   :  { %v1468_v58 = vsel %vm76_vm1, %v1463_v40, 0.0 }
 0x2eb   :  { %v1460_v39 = vpop.xlane.xlu0 %1459 }
 0x2ec   :  { %v1464_v61 = vmul.f32 %v1460_v39, %v5895_v29  ;;  %v4886_v39 = vpop.f32.mrb[7].mxu1 }
 0x2ed   :  { %v6289_v13 = vpop.f32.mrb[8].mxu1 }
 0x2ee   :  { %v1470_v33 = vsel %vm76_vm1, %v1464_v61, 0.0  ;;  %7927 = vst [vmem:[#allocation10_spill] sm:$0xff] %v6289_v13 }
 0x2ef   :  { %v1738_v56 = vpop.xlane.xlu0 %1737 }
 0x2f0   :  { %v1746_v0 = vmul.f32 %v5909_v37, %v1738_v56 }
 0x2f2   :  { %v1750_v29 = vsel %vm76_vm1, %v1746_v0, 0.0 }
 0x2f3   :  { %v1744_v62 = vpop.xlane.xlu0 %1743 }
 0x2f4   :  { %v1748_v40 = vmul.f32 %v5925_v49, %v1744_v62 }
 0x308   :  { %v1454_v42 = vpop.xlane.xlu1 %1453 }
 0x309   :  { %v1462_v55 = vmul.f32 %v1454_v42, %v5890_v28  ;;  %v4889_v42 = vpop.f32.mrb[9].mxu1 }
 0x30a   :  { %v6293_v24 = vpop.f32.mrb[10].mxu1 }
 0x30b   :  { %v1466_v30 = vsel %vm76_vm1, %v1462_v55, 0.0  ;;  %7928 = vst [vmem:[#allocation11_spill] sm:$0xff] %v6293_v24  ;;  %v4890_v22 = vpop.f32.mrb[11].mxu1 }
 0x30c   :  { %v1467_v8 = vadd.f32 %v1466_v30, %v1465_v47  ;;  %v1735_v6 = vpop.xlane.xlu1 %1734 }
 0x30d   :  { %v1745_v28 = vmul.f32 %v5904_v36, %v1735_v6 }
 0x30e   :  { %v1469_v37 = vadd.f32 %v1468_v58, %v1467_v8  ;;  %v1754_v58 = vsel %vm76_vm1, %v1748_v40, 0.0 }
 0x30f   :  { %v1749_v56 = vsel %vm76_vm1, %v1745_v28, 0.0 }
 0x310   :  { %v1471_v55 = vadd.f32 %v1470_v33, %v1469_v37  ;;  %v1751_v47 = vadd.f32 %v1750_v29, %v1749_v56  ;;  %v1741_v30 = vpop.xlane.xlu1 %1740 }
 0x311   :  { %v1747_v61 = vmul.f32 %v5920_v48, %v1741_v30 }
 0x312   :  { %v1472_v36 = vrot.slane %v1471_v55, 4 }
 0x313   :  { %v1752_v6 = vsel %vm76_vm1, %v1747_v61, 0.0 }
 0x314   :  { %v1473_v0 = vadd.f32 %v1472_v36, %v1471_v55  ;;  %v1753_v8 = vadd.f32 %v1752_v6, %v1751_v47 }
 0x316   :  { %v1474_v39 = vrot.slane %v1473_v0, 2  ;;  %v1755_v28 = vadd.f32 %v1754_v58, %v1753_v8  ;;  %v1596_v8 = vpop.xlane.xlu0 %1595 }
 0x318   :  { %v1475_v9 = vadd.f32 %v1474_v39, %v1473_v0  ;;  %v1756_v49 = vrot.slane %v1755_v28, 4  ;;  %v1593_v0 = vpop.xlane.xlu1 %1592 }
 0x31a   :  { %v1476_v62 = vrot.slane %v1475_v9, 1  ;;  %v1757_v33 = vadd.f32 %v1756_v49, %v1755_v28  ;;  %v1604_v28 = vmul.f32 %v5939_v60, %v1596_v8  ;;  %v149_v60 = vld [vmem:[%s7903_s8 + $0x10] sm:$0xff] }
 0x31c   :  { %v1477_v29 = vadd.f32 %v1476_v62, %v1475_v9  ;;  %v1758_v37 = vrot.slane %v1757_v33, 2  ;;  %v1599_v49 = vpop.xlane.xlu1 %1598 }
 0x31e   :  { %v1759_v56 = vadd.f32 %v1758_v37, %v1757_v33  ;;  %v1478_v42 = vmax.f32 %v1477_v29, 0.0  ;;  %v1602_v33 = vpop.xlane.xlu0 %1601 }
 0x320   :  { %v1760_v57 = vrot.slane %v1759_v56, 1  ;;  %v1480_v48 = vmul.f32 %v1478_v42, %v5964_v43  ;;  %v1479_v22 = vmul.f32 %v1478_v42, %v5969_v44  ;;  %v1482_v30 = vmul.f32 %v1478_v42, %v5974_v50 }
 0x321   :  { %v1481_v40 = vmul.f32 %v1478_v42, %v5979_v51 }
 0x322   :  { %v1761_v55 = vadd.f32 %v1760_v57, %v1759_v56  ;;  %v1486_v47 = vsel %vm76_vm1, %v1480_v48, 0.0  ;;  %v1483_v61 = vsel %vm76_vm1, %v1479_v22, 0.0  ;;  %v1492_v9 = vsel %vm76_vm1, %v1482_v30, 0.0 }
 0x323   :  { %1487 = vadd.xlane.f32.xlu0 %v1486_v47  ;;  %1484 = vadd.xlane.f32.xlu1 %v1483_v61  ;;  %v1489_v36 = vsel %vm76_vm1, %v1481_v40, 0.0  ;;  %v1606_v56 = vmul.f32 %v5953_v18, %v1602_v33 }
 0x324   :  { %v1762_v6 = vmax.f32 %v1761_v55, 0.0 }
 0x326   :  { %v1764_v43 = vmul.f32 %v5990_v3, %v1762_v6  ;;  %v1763_v44 = vmul.f32 %v5995_v4, %v1762_v6  ;;  %v1766_v57 = vmul.f32 %v6000_v10, %v1762_v6  ;;  %v1765_v58 = vmul.f32 %v6006_v14, %v1762_v6 }
 0x327   :  { %1493 = vadd.xlane.f32.xlu0 %v1492_v9  ;;  %1490 = vadd.xlane.f32.xlu1 %v1489_v36  ;;  %v1603_v4 = vmul.f32 %v5934_v59, %v1593_v0  ;;  %v1608_v10 = vsel %vm76_vm1, %v1604_v28, 0.0  ;;  %v1605_v14 = vmul.f32 %v5948_v15, %v1599_v49  ;;  %v1612_v59 = vsel %vm76_vm1, %v1606_v56, 0.0  ;;  %v150_v15 = vld [vmem:[%s7903_s8 + $0x18] sm:$0xff] }
 0x328   :  { %v1770_v50 = vsel %vm76_vm1, %v1764_v43, 0.0  ;;  %v1767_v51 = vsel %vm76_vm1, %v1763_v44, 0.0  ;;  %v1776_v39 = vsel %vm76_vm1, %v1766_v57, 0.0  ;;  %v1773_v3 = vsel %vm76_vm1, %v1765_v58, 0.0 }
 0x329   :  { %v1607_v62 = vsel %vm76_vm1, %v1603_v4, 0.0  ;;  %v1610_v37 = vsel %vm76_vm1, %v1605_v14, 0.0 }
 0x32a   :  { %v1609_v29 = vadd.f32 %v1608_v10, %v1607_v62 }
 0x32b   :  { %1771 = vadd.xlane.f32.xlu0 %v1770_v50  ;;  %1768 = vadd.xlane.f32.xlu1 %v1767_v51 }
 0x32c   :  { %v1611_v42 = vadd.f32 %v1610_v37, %v1609_v29 }
 0x32e   :  { %v1613_v48 = vadd.f32 %v1612_v59, %v1611_v42 }
 0x32f   :  { %1777 = vadd.xlane.f32.xlu0 %v1776_v39  ;;  %1774 = vadd.xlane.f32.xlu1 %v1773_v3 }
 0x330   :  { %v1614_v22 = vrot.slane %v1613_v48, 4 }
 0x332   :  { %v1615_v30 = vadd.f32 %v1614_v22, %v1613_v48 }
 0x334   :  { %v1616_v40 = vrot.slane %v1615_v30, 2 }
 0x336   :  { %v1617_v55 = vadd.f32 %v1616_v40, %v1615_v30 }
 0x338   :  { %v1618_v47 = vrot.slane %v1617_v55, 1 }
 0x33a   :  { %v1619_v18 = vadd.f32 %v1618_v47, %v1617_v55 }
 0x33c   :  { %v6328_v61 = vmax.f32 %v1619_v18, 0.0 }
 0x33e   :  { %v1621_v9 = vmul.f32 %v6023_v38, %v6328_v61  ;;  %v1622_v36 = vmul.f32 %v6018_v35, %v6328_v61 }
 0x340   :  { %165 = vperm.xlu1 %5358, %v149_v60   ;;  %v1625_v6 = vsel %vm76_vm1, %v1621_v9, 0.0  ;;  %v1628_v43 = vsel %vm76_vm1, %v1622_v36, 0.0 }
 0x345   :  { %170 = vperm.xlu0 %5357, %v150_v15  }
 0x364   :  { %1626 = vadd.xlane.f32.xlu1 %v1625_v6  ;;  %1629 = vadd.xlane.f32.xlu0 %v1628_v43 }
 0x37b   :  { %v6336_v44 = vpop.f32.mrb[24].mxu0 }
 0x37c   :  { %v6338_v50 = vpop.f32.mrb[25].mxu0  ;;  %v1056_v51 = vsel %vm55_vm0, %v6336_v44, -inf }
 0x37d   :  { %v6342_v57 = vpop.f32.mrb[26].mxu0  ;;  %1057 = vmax.xlane.f32.xlu1 %v1056_v51  ;;  %v1050_v58 = vsel %vm55_vm0, %v6338_v50, -inf }
 0x37e   :  { %v1059_v38 = vsel %vm55_vm0, %v6342_v57, -inf  ;;  %v6346_v35 = vpop.f32.mrb[27].mxu0 }
 0x37f   :  { %1060 = vmax.xlane.f32.xlu0 %v1059_v38  ;;  %v1053_v0 = vsel %vm55_vm0, %v6346_v35, -inf }
 0x381   :  { %1051 = vmax.xlane.f32.xlu1 %v1050_v58 }
 0x383   :  { %v6352_v8 = vpop.f32.mrb[28].mxu0  ;;  %1054 = vmax.xlane.f32.xlu0 %v1053_v0 }
 0x384   :  { %v6354_v39 = vpop.f32.mrb[29].mxu0  ;;  %v1068_v3 = vsel %vm55_vm0, %v6352_v8, -inf }
 0x385   :  { %v1062_v4 = vsel %vm55_vm0, %v6354_v39, -inf  ;;  %v6360_v28 = vpop.f32.mrb[30].mxu0 }
 0x386   :  { %1063 = vmax.xlane.f32.xlu1 %v1062_v4  ;;  %v6362_v49 = vpop.f32.mrb[31].mxu0  ;;  %v1071_v62 = vsel %vm55_vm0, %v6360_v28, -inf }
 0x387   :  { %1069 = vmax.xlane.f32.xlu0 %v1068_v3  ;;  %v1065_v10 = vsel %vm55_vm0, %v6362_v49, -inf }
 0x38a   :  { %1072 = vmax.xlane.f32.xlu1 %v1071_v62 }
 0x38b   :  { %1066 = vmax.xlane.f32.xlu0 %v1065_v10 }
 0x393   :  { %v6368_v14 = vpop.f32.mrb[12].mxu1 }
 0x394   :  { %v6370_v33 = vpop.f32.mrb[13].mxu1  ;;  %v811_v6 = vsel %vm55_vm0, %v6368_v14, -inf }
 0x395   :  { %v6372_v29 = vpop.f32.mrb[14].mxu1 }
 0x396   :  { %v6374_v37 = vpop.f32.mrb[15].mxu1  ;;  %v814_v38 = vsel %vm55_vm0, %v6372_v29, -inf }
 0x39b   :  { %v6376_v56 = vpop.f32.mrb[16].mxu1 }
 0x39c   :  { %v6378_v42 = vpop.f32.mrb[17].mxu1 }
 0x39d   :  { %v6380_v59 = vpop.f32.mrb[18].mxu1 }
 0x39e   :  { %v6382_v60 = vpop.f32.mrb[19].mxu1 }
 0x3a3   :  { %v6384_v48 = vpop.f32.mrb[32].mxu0 }
 0x3a4   :  { %v6386_v22 = vpop.f32.mrb[33].mxu0  ;;  %v1301_v15 = vsel %vm55_vm0, %v6384_v48, -inf }
 0x3a5   :  { %v6390_v30 = vpop.f32.mrb[34].mxu0  ;;  %1302 = vmax.xlane.f32.xlu1 %v1301_v15  ;;  %v1295_v47 = vsel %vm55_vm0, %v6386_v22, -inf }
 0x3a6   :  { %v6392_v40 = vpop.f32.mrb[35].mxu0  ;;  %v1304_v55 = vsel %vm55_vm0, %v6390_v30, -inf }
 0x3a7   :  { %1305 = vmax.xlane.f32.xlu0 %v1304_v55  ;;  %v1298_v18 = vsel %vm55_vm0, %v6392_v40, -inf }
 0x3a9   :  { %1296 = vmax.xlane.f32.xlu1 %v1295_v47  ;;  %v805_v47 = vsel %vm55_vm0, %v6370_v33, -inf }
 0x3ab   :  { %1299 = vmax.xlane.f32.xlu0 %v1298_v18  ;;  %v6400_v9 = vpop.f32.mrb[36].mxu0 }
 0x3ac   :  { %v6402_v36 = vpop.f32.mrb[37].mxu0  ;;  %v1313_v58 = vsel %vm55_vm0, %v6400_v9, -inf }
 0x3ad   :  { %812 = vmax.xlane.f32.xlu1 %v811_v6  ;;  %v6406_v43 = vpop.f32.mrb[38].mxu0 }
 0x3ae   :  { %v6408_v51 = vpop.f32.mrb[39].mxu0  ;;  %v1316_v10 = vsel %vm55_vm0, %v6406_v43, -inf }
 0x3af   :  { %815 = vmax.xlane.f32.xlu0 %v814_v38  ;;  %v808_v38 = vsel %vm55_vm0, %v6374_v37, -inf }
 0x3b0   :  { %v1485_v0 = vpop.xlane.xlu1 %1484  ;;  %v1488_v3 = vpop.xlane.xlu0 %1487 }
 0x3b1   :  { %v4449_v4 = vmul.f32 -1.442695, %v1485_v0  ;;  %v4450_v62 = vmul.f32 -1.442695, %v1488_v3  ;;  %1314 = vmax.xlane.f32.xlu1 %v1313_v58  ;;  %v1307_v0 = vsel %vm55_vm0, %v6402_v36, -inf }
 0x3b3   :  { %5452 = vpow2.f32 %v4449_v4  ;;  %1317 = vmax.xlane.f32.xlu0 %v1316_v10  ;;  %v1310_v10 = vsel %vm55_vm0, %v6408_v51, -inf }
 0x3b4   :  { %5454 = vpow2.f32 %v4450_v62  ;;  %v1491_v15 = vpop.xlane.xlu1 %1490  ;;  %v1494_v55 = vpop.xlane.xlu0 %1493 }
 0x3b5   :  { %v4451_v18 = vmul.f32 -1.442695, %v1491_v15  ;;  %v4452_v6 = vmul.f32 -1.442695, %v1494_v55  ;;  %806 = vmax.xlane.f32.xlu1 %v805_v47  ;;  %v823_v55 = vsel %vm55_vm0, %v6376_v56, -inf }
 0x3b7   :  { %5456 = vpow2.f32 %v4451_v18  ;;  %809 = vmax.xlane.f32.xlu0 %v808_v38 }
 0x3b8   :  { %5458 = vpow2.f32 %v4452_v6  ;;  %v1769_v58 = vpop.xlane.xlu1 %1768  ;;  %v1772_v3 = vpop.xlane.xlu0 %1771 }
 0x3b9   :  { %v4471_v4 = vmul.f32 -1.442695, %v1769_v58  ;;  %1308 = vmax.xlane.f32.xlu1 %v1307_v0  ;;  %v4472_v62 = vmul.f32 -1.442695, %v1772_v3  ;;  %v826_v58 = vsel %vm55_vm0, %v6380_v59, -inf }
 0x3bb   :  { %5460 = vpow2.f32 %v4471_v4  ;;  %1311 = vmax.xlane.f32.xlu0 %v1310_v10  ;;  %v817_v4 = vsel %vm55_vm0, %v6378_v42, -inf }
 0x3bc   :  { %v1775_v15 = vpop.xlane.xlu1 %1774  ;;  %5462 = vpow2.f32 %v4472_v62  ;;  %v1778_v6 = vpop.xlane.xlu0 %1777 }
 0x3bd   :  { %v5453_v47 = vpop.eup %5452  ;;  %v4473_v18 = vmul.f32 -1.442695, %v1775_v15  ;;  %824 = vmax.xlane.f32.xlu1 %v823_v55  ;;  %v4474_v0 = vmul.f32 -1.442695, %v1778_v6 }
 0x3be   :  { %v5455_v38 = vpop.eup %5454  ;;  %v1507_v54 = vadd.f32 1.0, %v5453_v47  ;;  %v820_v47 = vsel %vm55_vm0, %v6382_v60, -inf }
 0x3bf   :  { %v1508_v3 = vadd.f32 1.0, %v5455_v38  ;;  %5464 = vpow2.f32 %v4473_v18  ;;  %827 = vmax.xlane.f32.xlu0 %v826_v58 }
 0x3c0   :  { %5466 = vrcp.f32 %v1507_v54  ;;  %v6430_v55 = vpop.permute.xlu1 %165 }
 0x3c1   :  { %v5457_v62 = vpop.eup %5456  ;;  %5468 = vrcp.f32 %v1508_v3  ;;  %818 = vmax.xlane.f32.xlu1 %v817_v4  ;;  %v251_v6 = vadd.f32 %v6152_v63, %v6430_v55 }
 0x3c2   :  { %v5459_v10 = vpop.eup %5458  ;;  %v1509_v15 = vadd.f32 1.0, %v5457_v62  ;;  %5470 = vpow2.f32 %v4474_v0 }
 0x3c3   :  { %v1510_v27 = vadd.f32 1.0, %v5459_v10  ;;  %821 = vmax.xlane.f32.xlu0 %v820_v47 }
 0x3c4   :  { %5472 = vrcp.f32 %v1509_v15  ;;  %v6434_v18 = vpop.permute.xlu0 %170 }
 0x3c5   :  { %v5461_v54 = vpop.eup %5460  ;;  %5474 = vrcp.f32 %v1510_v27  ;;  %v254_v38 = vadd.f32 %v6156_v7, %v6434_v18 }
 0x3c6   :  { %v5463_v58 = vpop.eup %5462  ;;  %v1791_v3 = vadd.f32 1.0, %v5461_v54 }
 0x3c7   :  { %v1792_v4 = vadd.f32 1.0, %v5463_v58  ;;  %v267_v0 = vpack.c.bf16 %v254_v38, %v251_v6  ;;  %v151_v6 = vld [vmem:[%s7903_s8 + $0x20] sm:$0xff] }
 0x3c8   :  { %5476 = vrcp.f32 %v1791_v3  ;;  %v7929_v3 = vmov 0.0  }
 0x3c9   :  { %v5465_v62 = vpop.eup %5464  ;;  %5478 = vrcp.f32 %v1792_v4  ;;  %4925 = vmatprep.mubr.msk.bf16.mxu1 %vm55_vm0, %v267_v0 }
 0x3ca   :  { %v5467_v10 = vpop.eup %5466  ;;  %v1793_v15 = vadd.f32 1.0, %v5465_v62 }
 0x3cb   :  { %v5469_v47 = vpop.eup %5468  ;;  %v1519_v27 = vmul.f32 %v5467_v10, %v6176_v45 }
 0x3cc   :  { %v5471_v25 = vpop.eup %5470  ;;  %5480 = vrcp.f32 %v1793_v15  ;;  %v1520_v63 = vmul.f32 %v5469_v47, %v6224_v41 }
 0x3cd   :  { %v1794_v24 = vadd.f32 1.0, %v5471_v25 }
 0x3ce   :  { %v5473_v7 = vpop.eup %5472  ;;  %v1523_v13 = vpack.c.bf16 %v1520_v63, %v1519_v27 }
 0x3cf   :  { %v5475_v54 = vpop.eup %5474  ;;  %5482 = vrcp.f32 %v1794_v24  ;;  %v1521_v38 = vmul.f32 %v5473_v7, %v6186_v2  ;;  %v152_v2 = vld [vmem:[%s7903_s8 + $0x28] sm:$0xff] }
 0x3d0   :  { %4974 = vmatpush3.bf16.msra.mxu0 %v1523_v13  ;;  %v1522_v58 = vmul.f32 %v5475_v54, %v6194_v5 }
 0x3d1   :  { %4975 = vmatprep.subr.bf16.mxu0 %v7929_v3 }
 0x3d2   :  { %v5477_v45 = vpop.eup %5476  ;;  %175 = vperm.xlu1 %5358, %v151_v6   ;;  %v1524_v4 = vpack.c.bf16 %v1522_v58, %v1521_v38 }
 0x3d3   :  { %v5479_v41 = vpop.eup %5478  ;;  %v1803_v25 = vmul.f32 %v5477_v45, %v6231_v16 }
 0x3d4   :  { %4976 = vmatpush3.bf16.msra.mxu0 %v1524_v4  ;;  %v1804_v24 = vmul.f32 %v5479_v41, %v6202_v26 }
 0x3d5   :  { %5005 = vmatprep.subr.bf16.mxu0 %v7929_v3 }
 0x3d6   :  { %v5481_v0 = vpop.eup %5480  ;;  %v1807_v13 = vpack.c.bf16 %v1804_v24, %v1803_v25 }
 0x3d7   :  { %4978 = vmatmul.mubr.msk.bf16.vlgmr.msra.gmra.mrb[40].mxu0 %vm198_vm3, %v6071_v11  ;;  %v1805_v5 = vmul.f32 %v5481_v0, %v6238_v53  ;;  %v5692_v11 = vld [vmem:[%s7901_s6 + $0x30] sm:$0xff] }
 0x3d8   :  { %4981 = vmatprep.mubr.msk.bf16.mxu0 %vm5702_vm2, %v7929_v3  ;;  %5006 = vmatpush3.bf16.msra.mxu0 %v1807_v13 }
 0x3d9   :  { %v5483_v16 = vpop.eup %5482  ;;  %180 = vperm.xlu0 %5357, %v152_v2   ;;  %5007 = vmatprep.subr.bf16.mxu0 %v7929_v3 }
 0x3da   :  { %v1806_v26 = vmul.f32 %v5483_v16, %v6209_v32 }
 0x3dc   :  { %v1808_v62 = vpack.c.bf16 %v1806_v26, %v1805_v5 }
 0x3de   :  { %5008 = vmatpush3.bf16.msra.mxu0 %v1808_v62 }
 0x3df   :  { %4982 = vmatmul.mubr.msk.bf16.gmra.mrb[44].mxu0 %vm198_vm3, %v6086_v31  ;;  %v1623_v31 = vmul.f32 %v5692_v11, %v6328_v61 }
 0x3e0   :  { %4985 = vmatprep.mubr.msk.bf16.mxu0 %vm5702_vm2, %v7929_v3 }
 0x3e1   :  { %v1631_v32 = vsel %vm76_vm1, %v1623_v31, 0.0 }
 0x3e7   :  { %4986 = vmatmul.mubr.msk.bf16.gmra.mrb[48].mxu0 %vm198_vm3, %v6099_v17 }
 0x3e8   :  { %5009 = vmatprep.mubr.msk.bf16.mxu0 %vm5702_vm2, %v7929_v3 }
 0x3ef   :  { %5010 = vmatmul.mubr.msk.bf16.vlgmr.msra.gmra.mrb[52].mxu0 %vm198_vm3, %v6115_v20 }
 0x3f0   :  { %5013 = vmatprep.mubr.msk.bf16.mxu0 %vm5702_vm2, %v7929_v3 }
 0x3f1   :  { %v6485_v17 = vpop.xlane.xlu1 %1626  ;;  %v6487_v20 = vpop.xlane.xlu0 %1629 }
 0x3f6   :  { %1632 = vadd.xlane.f32.xlu1 %v1631_v32 }
 0x3f7   :  { %5014 = vmatmul.mubr.msk.bf16.gmra.mrb[56].mxu0 %vm198_vm3, %v6124_v21 }
 0x3f8   :  { %5017 = vmatprep.mubr.msk.bf16.mxu0 %vm5702_vm2, %v7929_v3 }
 0x3ff   :  { %5018 = vmatmul.mubr.msk.bf16.gmra.mrb[60].mxu0 %vm198_vm3, %v6133_v46 }
 0x40a   :  { %v1058_v53 = vpop.xlane.xlu1 %1057 }
 0x40b   :  { %v1076_v10 = vsub.f32 %v6336_v44, %v1058_v53 }
 0x40c   :  { %v1061_v15 = vpop.xlane.xlu0 %1060 }
 0x40d   :  { %v1086_v47 = vmul.f32 1.442695, %v1076_v10  ;;  %v1077_v27 = vsub.f32 %v6342_v57, %v1061_v15 }
 0x40e   :  { %v1052_v63 = vpop.xlane.xlu1 %1051 }
 0x40f   :  { %5484 = vpow2.f32 %v1086_v47  ;;  %v1088_v21 = vmul.f32 1.442695, %v1077_v27  ;;  %v1074_v7 = vsub.f32 %v6338_v50, %v1052_v63 }
 0x410   :  { %v1055_v54 = vpop.xlane.xlu0 %1054 }
 0x411   :  { %5486 = vpow2.f32 %v1088_v21  ;;  %v1082_v6 = vmul.f32 1.442695, %v1074_v7  ;;  %v1075_v46 = vsub.f32 %v6346_v35, %v1055_v54 }
 0x413   :  { %5488 = vpow2.f32 %v1082_v6  ;;  %v1084_v38 = vmul.f32 1.442695, %v1075_v46  ;;  %v1064_v58 = vpop.xlane.xlu1 %1063 }
 0x414   :  { %v1078_v45 = vsub.f32 %v6354_v39, %v1064_v58  ;;  %v1070_v44 = vpop.xlane.xlu0 %1069 }
 0x415   :  { %5490 = vpow2.f32 %v1084_v38  ;;  %v1080_v4 = vsub.f32 %v6352_v8, %v1070_v44 }
 0x416   :  { %v1090_v57 = vmul.f32 1.442695, %v1078_v45 }
 0x417   :  { %v1094_v41 = vmul.f32 1.442695, %v1080_v4  ;;  %v1073_v25 = vpop.xlane.xlu1 %1072 }
 0x418   :  { %v1081_v24 = vsub.f32 %v6360_v28, %v1073_v25  ;;  %v1067_v50 = vpop.xlane.xlu0 %1066 }
 0x419   :  { %v6496_v0 = vpop.eup %5484  ;;  %5492 = vpow2.f32 %v1094_v41  ;;  %v1079_v35 = vsub.f32 %v6362_v49, %v1067_v50 }
 0x41a   :  { %v1096_v2 = vmul.f32 1.442695, %v1081_v24  ;;  %v1104_v13 = vsel %vm55_vm0, %v6496_v0, 0.0  ;;  %5494 = vpow2.f32 %v1090_v57 }
 0x41b   :  { %v6501_v39 = vpop.eup %5486  ;;  %v1092_v5 = vmul.f32 1.442695, %v1079_v35  ;;  %1105 = vadd.xlane.f32.xlu1 %v1104_v13 }
 0x41c   :  { %5496 = vpow2.f32 %v1096_v2  ;;  %v1107_v8 = vsel %vm55_vm0, %v6501_v39, 0.0 }
 0x41d   :  { %v6505_v28 = vpop.eup %5488  ;;  %1108 = vadd.xlane.f32.xlu0 %v1107_v8  ;;  %5498 = vpow2.f32 %v1092_v5 }
 0x41e   :  { %v1098_v49 = vsel %vm55_vm0, %v6505_v28, 0.0 }
 0x41f   :  { %v6509_v16 = vpop.eup %5490  ;;  %1099 = vadd.xlane.f32.xlu1 %v1098_v49 }
 0x420   :  { %v1101_v26 = vsel %vm55_vm0, %v6509_v16, 0.0 }
 0x421   :  { %1102 = vadd.xlane.f32.xlu0 %v1101_v26 }
 0x423   :  { %v6513_v62 = vpop.eup %5492 }
 0x424   :  { %v1116_v11 = vsel %vm55_vm0, %v6513_v62, 0.0  ;;  %v6517_v31 = vpop.eup %5494 }
 0x425   :  { %1117 = vadd.xlane.f32.xlu1 %v1116_v11  ;;  %v1110_v15 = vsel %vm55_vm0, %v6517_v31, 0.0 }
 0x426   :  { %v6519_v32 = vpop.eup %5496 }
 0x427   :  { %v1119_v53 = vsel %vm55_vm0, %v6519_v32, 0.0  ;;  %v6523_v10 = vpop.eup %5498 }
 0x428   :  { %1120 = vadd.xlane.f32.xlu0 %v1119_v53  ;;  %v1113_v47 = vsel %vm55_vm0, %v6523_v10, 0.0 }
 0x429   :  { %1111 = vadd.xlane.f32.xlu1 %v1110_v15 }
 0x42c   :  { %1114 = vadd.xlane.f32.xlu0 %v1113_v47 }
 0x432   :  { %v1303_v27 = vpop.xlane.xlu1 %1302 }
 0x433   :  { %v1321_v63 = vsub.f32 %v6384_v48, %v1303_v27 }
 0x434   :  { %v1306_v21 = vpop.xlane.xlu0 %1305 }
 0x435   :  { %v1331_v7 = vmul.f32 1.442695, %v1321_v63  ;;  %v1322_v54 = vsub.f32 %v6390_v30, %v1306_v21 }
 0x436   :  { %v1297_v6 = vpop.xlane.xlu1 %1296 }
 0x437   :  { %5500 = vpow2.f32 %v1331_v7  ;;  %v1333_v46 = vmul.f32 1.442695, %v1322_v54  ;;  %v1319_v38 = vsub.f32 %v6386_v22, %v1297_v6 }
 0x438   :  { %v1300_v58 = vpop.xlane.xlu0 %1299 }
 0x439   :  { %5502 = vpow2.f32 %v1333_v46  ;;  %v1327_v45 = vmul.f32 1.442695, %v1319_v38  ;;  %v1320_v44 = vsub.f32 %v6392_v40, %v1300_v58 }
 0x43a   :  { %v813_v4 = vpop.xlane.xlu1 %812 }
 0x43b   :  { %5504 = vpow2.f32 %v1327_v45  ;;  %v1329_v57 = vmul.f32 1.442695, %v1320_v44  ;;  %v831_v41 = vsub.f32 %v6368_v14, %v813_v4 }
 0x43c   :  { %v816_v48 = vpop.xlane.xlu0 %815 }
 0x43d   :  { %5506 = vpow2.f32 %v1329_v57  ;;  %v841_v25 = vmul.f32 1.442695, %v831_v41  ;;  %v832_v30 = vsub.f32 %v6372_v29, %v816_v48 }
 0x43e   :  { %v1315_v24 = vpop.xlane.xlu1 %1314 }
 0x43f   :  { %5508 = vpow2.f32 %v841_v25  ;;  %v843_v50 = vmul.f32 1.442695, %v832_v30 }
 0x440   :  { %v6535_v35 = vpop.xlane.xlu0 %1317 }
 0x441   :  { %v6537_v22 = vpop.eup %5500  ;;  %5510 = vpow2.f32 %v843_v50 }
 0x442   :  { %v807_v2 = vpop.xlane.xlu1 %806  ;;  %v1349_v40 = vsel %vm55_vm0, %v6537_v22, 0.0 }
 0x443   :  { %v6541_v13 = vpop.eup %5502  ;;  %v829_v14 = vsub.f32 %v6370_v33, %v807_v2  ;;  %1350 = vadd.xlane.f32.xlu1 %v1349_v40 }
 0x444   :  { %v810_v5 = vpop.xlane.xlu0 %809  ;;  %v1352_v29 = vsel %vm55_vm0, %v6541_v13, 0.0 }
 0x445   :  { %v6546_v8 = vpop.eup %5504  ;;  %v837_v49 = vmul.f32 1.442695, %v829_v14  ;;  %v830_v26 = vsub.f32 %v6374_v37, %v810_v5  ;;  %1353 = vadd.xlane.f32.xlu0 %v1352_v29 }
 0x446   :  { %v1309_v11 = vpop.xlane.xlu1 %1308  ;;  %v1343_v53 = vsel %vm55_vm0, %v6546_v8, 0.0 }
 0x447   :  { %v6551_v15 = vpop.eup %5506  ;;  %5512 = vpow2.f32 %v837_v49  ;;  %v839_v47 = vmul.f32 1.442695, %v830_v26  ;;  %1344 = vadd.xlane.f32.xlu1 %v1343_v53  ;;  %v1323_v6 = vsub.f32 %v6402_v36, %v1309_v11 }
 0x448   :  { %v1312_v33 = vpop.xlane.xlu0 %1311  ;;  %v1346_v27 = vsel %vm55_vm0, %v6551_v15, 0.0 }
 0x449   :  { %v6555_v63 = vpop.eup %5508  ;;  %5514 = vpow2.f32 %v839_v47  ;;  %1347 = vadd.xlane.f32.xlu0 %v1346_v27  ;;  %v1335_v41 = vmul.f32 1.442695, %v1323_v6  ;;  %v1324_v2 = vsub.f32 %v6408_v51, %v1312_v33 }
 0x44a   :  { %v825_v21 = vpop.xlane.xlu1 %824  ;;  %v859_v37 = vsel %vm55_vm0, %v6555_v63, 0.0 }
 0x44b   :  { %v6559_v7 = vpop.eup %5510  ;;  %v835_v54 = vsub.f32 %v6376_v56, %v825_v21  ;;  %860 = vadd.xlane.f32.xlu1 %v859_v37  ;;  %v1325_v56 = vsub.f32 %v6400_v9, %v1315_v24  ;;  %v1337_v24 = vmul.f32 1.442695, %v1324_v2  ;;  %v5693_v21 = vld [vmem:[%s7901_s6 + $0x38] sm:$0xff]  ;;  %s5711_s6 = smov 120  }
 0x44c   :  { %v828_v46 = vpop.xlane.xlu0 %827  ;;  %v862_v38 = vsel %vm55_vm0, %v6559_v7, 0.0  ;;  %v1624_v37 = vmul.f32 %v5693_v21, %v6328_v61 }
 0x44d   :  { %v849_v58 = vmul.f32 1.442695, %v835_v54  ;;  %v836_v45 = vsub.f32 %v6380_v59, %v828_v46  ;;  %863 = vadd.xlane.f32.xlu0 %v862_v38  ;;  %v1339_v14 = vmul.f32 1.442695, %v1325_v56  ;;  %v4418_v56 = vld [vmem:[%s7903_s8 + $0x78] sm:$0xff] }
 0x44e   :  { %v819_v44 = vpop.xlane.xlu1 %818  ;;  %v1634_v46 = vsel %vm76_vm1, %v1624_v37, 0.0 }
 0x44f   :  { %5516 = vpow2.f32 %v849_v58  ;;  %v851_v4 = vmul.f32 1.442695, %v836_v45  ;;  %v833_v57 = vsub.f32 %v6378_v42, %v819_v44 }
 0x450   :  { %v822_v48 = vpop.xlane.xlu0 %821 }
 0x451   :  { %v6567_v25 = vpop.eup %5512  ;;  %5518 = vpow2.f32 %v851_v4  ;;  %v845_v36 = vmul.f32 1.442695, %v833_v57  ;;  %v834_v30 = vsub.f32 %v6382_v60, %v822_v48  ;;  %v1326_v60 = vsub.f32 %v6406_v43, %v6535_v35  ;;  %v4387_v4 = vld [vmem:[%s7903_s8 + $0x40] sm:$0xff]  ;;  %v4389_v57 = vld [vmem:[%s7903_s8 + $0x50] sm:$0xff]  ;;  %v4388_v48 = vld [vmem:[%s7903_s8 + $0x48] sm:$0xff] }
 0x452   :  { %v853_v50 = vsel %vm55_vm0, %v6567_v25, 0.0  ;;  %v6578_v9 = vpop.permute.xlu1 %175 }
 0x453   :  { %v6573_v59 = vpop.eup %5514  ;;  %5520 = vpow2.f32 %v845_v36  ;;  %v847_v40 = vmul.f32 1.442695, %v834_v30  ;;  %854 = vadd.xlane.f32.xlu1 %v853_v50  ;;  %v6588_v51 = vadd.f32 %v6160_v1, %v6578_v9  ;;  %v1341_v43 = vmul.f32 1.442695, %v1326_v60  ;;  %v4417_v36 = vld [vmem:[%s7903_s8 + $0x70] sm:$0xff]  ;;  %v4420_v30 = vld [vmem:[%s7903_s8 + $0x88] sm:$0xff] }
 0x454   :  { %5522 = vpow2.f32 %v1335_v41  ;;  %v856_v42 = vsel %vm55_vm0, %v6573_v59, 0.0  ;;  %v4390_v41 = vld [vmem:[%s7903_s8 + $0x58] sm:$0xff]  ;;  %v4419_v50 = vld [vmem:[%s7903_s8 + $0x80] sm:$0xff]  ;;  %s5707_s8 = smov 7  }
 0x455   :  { %5524 = vpow2.f32 %v847_v40  ;;  %857 = vadd.xlane.f32.xlu0 %v856_v42 }
 0x456   :  { %5526 = vpow2.f32 %v1339_v14 }
 0x457   :  { %5528 = vpow2.f32 %v1337_v24 }
 0x458   :  { %v6582_v5 = vpop.permute.xlu0 %180  ;;  %5530 = vpow2.f32 %v1341_v43 }
 0x459   :  { %v6584_v29 = vpop.eup %5516  ;;  %v6592_v49 = vadd.f32 %v6162_v23, %v6582_v5 }
 0x45a   :  { %v871_v26 = vsel %vm55_vm0, %v6584_v29, 0.0 }
 0x45b   :  { %v6596_v11 = vpop.eup %5518  ;;  %872 = vadd.xlane.f32.xlu1 %v871_v26 }
 0x45c   :  { %v874_v53 = vsel %vm55_vm0, %v6596_v11, 0.0 }
 0x45d   :  { %v6602_v1 = vpop.eup %5520  ;;  %875 = vadd.xlane.f32.xlu0 %v874_v53 }
 0x45e   :  { %v6604_v47 = vpop.eup %5522  ;;  %v865_v23 = vsel %vm55_vm0, %v6602_v1, 0.0 }
 0x45f   :  { %v6608_v33 = vpop.eup %5524  ;;  %866 = vadd.xlane.f32.xlu1 %v865_v23  ;;  %v1355_v54 = vsel %vm55_vm0, %v6604_v47, 0.0 }
 0x460   :  { %v868_v27 = vsel %vm55_vm0, %v6608_v33, 0.0  ;;  %v6618_v6 = vpop.eup %5526 }
 0x461   :  { %869 = vadd.xlane.f32.xlu0 %v868_v27  ;;  %v6621_v38 = vpop.eup %5528  ;;  %v1361_v58 = vsel %vm55_vm0, %v6618_v6, 0.0 }
 0x462   :  { %v1358_v45 = vsel %vm55_vm0, %v6621_v38, 0.0  ;;  %v6627_v61 = vpop.eup %5530 }
 0x463   :  { %1356 = vadd.xlane.f32.xlu1 %v1355_v54  ;;  %v1364_v44 = vsel %vm55_vm0, %v6627_v61, 0.0 }
 0x465   :  { %1635 = vadd.xlane.f32.xlu0 %v1634_v46 }
 0x467   :  { %1362 = vadd.xlane.f32.xlu1 %v1361_v58 }
 0x469   :  { %1359 = vadd.xlane.f32.xlu0 %v1358_v45 }
 0x46d   :  { %1365 = vadd.xlane.f32.xlu0 %v1364_v44 }
 0x478   :  { %385 = vperm.xlu1 %5358, %v4387_v4  }
 0x47c   :  { %395 = vperm.xlu1 %5358, %v4389_v57  }
 0x480   :  { %400 = vperm.xlu1 %5358, %v4390_v41  }
 0x483   :  { %390 = vperm.xlu0 %5357, %v4388_v48   ;;  %v6664_v54 = vpop.xlane.xlu1 %1632 }
 0x484   :  { %609 = vperm.xlu1 %5358, %v4418_v56  }
 0x487   :  { %604 = vperm.xlu0 %5357, %v4417_v36  }
 0x488   :  { %619 = vperm.xlu1 %5358, %v4420_v30  }
 0x48b   :  { %614 = vperm.xlu0 %5357, %v4419_v50  }
 0x4a8   :  { %v6666_v58 = vpop.xlane.xlu1 %1105 }
 0x4aa   :  { %v1559_v2 = vpop.f32.mrb[40].mxu0 }
 0x4ab   :  { %v4979_v40 = vpop.f32.mrb[41].mxu0  ;;  %v1560_v56 = vadd.f32 %v1559_v2, %v6165_v34 }
 0x4ac   :  { %v1562_v42 = vpop.f32.mrb[42].mxu0  ;;  %v6678_v41 = vpop.xlane.xlu1 %1099 }
 0x4ad   :  { %v1563_v14 = vadd.f32 %v1562_v42, %v6143_v52  ;;  %v4980_v60 = vpop.f32.mrb[43].mxu0 }
 0x4ae   :  { %v6685_v60 = vpack.c.bf16 %v1560_v56, %v1560_v56 }
 0x4af   :  { %v1583_v24 = vpack.c.bf16 %v1563_v14, %v1563_v14 }
 0x4b1   :  { %2115 = vxpose.xlu1.c.b16.start.end [1/1] (short) (narrow) %v1583_v24, 64 }
 0x4b2   :  { %v1567_v26 = vpop.f32.mrb[44].mxu0  ;;  %v6683_v14 = vpop.xlane.xlu1 %1117 }
 0x4b3   :  { %v4983_v43 = vpop.f32.mrb[45].mxu0  ;;  %v6657_v23 = vadd.f32 %v1567_v26, %v6430_v55 }
 0x4b4   :  { %v1570_v53 = vpop.f32.mrb[46].mxu0 }
 0x4b5   :  { %v6660_v27 = vadd.f32 %v1570_v53, %v6434_v18  ;;  %v4984_v21 = vpop.f32.mrb[47].mxu0  ;;  %v6674_v18 = vpop.xlane.xlu0 %1108 }
 0x4b9   :  { %v1103_v50 = vpop.xlane.xlu0 %1102 }
 0x4ba   :  { %v1575_v46 = vpop.f32.mrb[48].mxu0 }
 0x4bb   :  { %v4987_v52 = vpop.f32.mrb[49].mxu0  ;;  %v6669_v44 = vadd.f32 %v1575_v46, %v6578_v9 }
 0x4bc   :  { %v1578_v45 = vpop.f32.mrb[50].mxu0 }
 0x4bd   :  { %7930 = vst [vmem:[#allocation12_spill] sm:$0xff] %v6669_v44  ;;  %v6672_v55 = vadd.f32 %v1578_v45, %v6582_v5  ;;  %v4988_v4 = vpop.f32.mrb[51].mxu0  ;;  %v6689_v43 = vpop.xlane.xlu0 %1120 }
 0x4bf   :  { %7931 = vst [vmem:[#allocation13_spill] sm:$0xff] %v6672_v55 }
 0x4c1   :  { %v1115_v21 = vpop.xlane.xlu0 %1114 }
 0x4c2   :  { %v1843_v48 = vpop.f32.mrb[52].mxu0 }
 0x4c3   :  { %v1844_v36 = vadd.f32 %v1843_v48, %v6158_v19  ;;  %v5011_v30 = vpop.f32.mrb[53].mxu0 }
 0x4c4   :  { %v1846_v9 = vpop.f32.mrb[54].mxu0 }
 0x4c5   :  { %v1866_v40 = vpack.c.bf16 %v1844_v36, %v1844_v36  ;;  %v1847_v5 = vadd.f32 %v1846_v9, %v6169_v12  ;;  %v5012_v42 = vpop.f32.mrb[55].mxu0  ;;  %v1112_v12 = vpop.xlane.xlu1 %1111 }
 0x4c7   :  { %v2144_v24 = vsel %vm736_vm4, %v1866_v40, 0  ;;  %v1867_v26 = vpack.c.bf16 %v1847_v5, %v1847_v5  ;;  %5343 = vmatprep.subr.msk.bf16.mxu0 %vm736_vm4, %v1866_v40 }
 0x4c8   :  { %5044 = vmatpush3.bf16.msra.mxu0 %v2144_v24 }
 0x4c9   :  { %5344 = vmatprep.subr.msk.bf16.mxu0 %vm736_vm4, %v6685_v60  ;;  %1870 = vxpose.xlu0.c.b16.start.end [1/1] (short) (narrow) %v1867_v26, 64 }
 0x4ca   :  { %v6693_v19 = vpop.f32.mrb[56].mxu0 }
 0x4cb   :  { %v5015_v34 = vpop.f32.mrb[57].mxu0 }
 0x4cc   :  { %v6695_v2 = vpop.f32.mrb[58].mxu0 }
 0x4cd   :  { %v5016_v53 = vpop.f32.mrb[59].mxu0 }
 0x4d0   :  { %v6697_v46 = vpop.xlane.xlu1 %1350 }
 0x4d2   :  { %v6699_v52 = vpop.xlane.xlu0 %1353  ;;  %v6701_v45 = vpop.f32.mrb[60].mxu0 }
 0x4d3   :  { %v5019_v4 = vpop.f32.mrb[61].mxu0 }
 0x4d4   :  { %v6703_v48 = vpop.f32.mrb[62].mxu0  ;;  %v6705_v36 = vpop.xlane.xlu1 %1344 }
 0x4d5   :  { %v5020_v56 = vpop.f32.mrb[63].mxu0 }
 0x4d6   :  { %v6707_v30 = vpop.xlane.xlu0 %1347 }
 0x4d8   :  { %v861_v9 = vpop.xlane.xlu1 %860 }
 0x4da   :  { %v864_v40 = vpop.xlane.xlu0 %863 }
 0x4db   :  { %5532 = vrcp.f32 %v864_v40 }
 0x4e0   :  { %v855_v5 = vpop.xlane.xlu1 %854 }
 0x4e1   :  { %5534 = vrcp.f32 %v855_v5 }
 0x4e2   :  { %5536 = vrcp.f32 %v861_v9  ;;  %v858_v42 = vpop.xlane.xlu0 %857 }
 0x4e3   :  { %5538 = vrcp.f32 %v858_v42 }
 0x4e5   :  { %v5533_v26 = vpop.eup %5532 }
 0x4e6   :  { %v888_v5 = vmul.f32 %v5533_v26, %v6559_v7 }
 0x4e8   :  { %v873_v24 = vpop.xlane.xlu1 %872 }
 0x4ea   :  { %v876_v34 = vpop.xlane.xlu0 %875 }
 0x4eb   :  { %v5535_v53 = vpop.eup %5534  ;;  %5540 = vrcp.f32 %v876_v34 }
 0x4ec   :  { %v5537_v4 = vpop.eup %5536  ;;  %v867_v57 = vpop.xlane.xlu1 %866  ;;  %v885_v35 = vmul.f32 %v5535_v53, %v6567_v25 }
 0x4ed   :  { %v5539_v56 = vpop.eup %5538  ;;  %5542 = vrcp.f32 %v867_v57  ;;  %v887_v44 = vmul.f32 %v5537_v4, %v6555_v63 }
 0x4ee   :  { %5544 = vrcp.f32 %v873_v24  ;;  %v870_v37 = vpop.xlane.xlu0 %869  ;;  %v886_v40 = vmul.f32 %v5539_v56, %v6573_v59  ;;  %v7933_v56 = vld [vmem:[#allocation11_spill] sm:$0xff] }
 0x4ef   :  { %5546 = vrcp.f32 %v870_v37  ;;  %v894_v55 = vpack.c.bf16 %v888_v5, %v887_v44  ;;  %v4460_v44 = vmul.f32 -1.442695, %v6485_v17 }
 0x4f0   :  { %v6712_v9 = vpop.xlane.xlu1 %1356  ;;  %v893_v42 = vpack.c.bf16 %v886_v40, %v885_v35  ;;  %5548 = vrcp.f32 %v1103_v50 }
 0x4f1   :  { %5550 = vrcp.f32 %v6678_v41 }
 0x4f2   :  { %4917 = vmatprep.subr.bf16.mxu1 %v893_v42  ;;  %v1636_v34 = vpop.xlane.xlu0 %1635  ;;  %5552 = vrcp.f32 %v6674_v18 }
 0x4f3   :  { %4918 = vmatpush3.bf16.msra.mxu1 %v893_v42  ;;  %5554 = vrcp.f32 %v6666_v58  ;;  %v4461_v58 = vmul.f32 -1.442695, %v6487_v20 }
 0x4f4   :  { %v6716_v57 = vpop.xlane.xlu1 %1362  ;;  %4919 = vmatprep.subr.bf16.mxu1 %v894_v55  ;;  %5556 = vrcp.f32 %v1115_v21 }
 0x4f5   :  { %v5541_v25 = vpop.eup %5540  ;;  %5558 = vrcp.f32 %v1112_v12 }
 0x4f6   :  { %v6720_v35 = vpop.xlane.xlu0 %1359  ;;  %v892_v18 = vmul.f32 %v5541_v25, %v6596_v11  ;;  %5560 = vrcp.f32 %v6689_v43  ;;  %v7932_v43 = vld [vmem:[#allocation10_spill] sm:$0xff]  ;;  %v7934_v25 = vld [vmem:[#allocation8_spill] sm:$0xff] }
 0x4f7   :  { %v5543_v7 = vpop.eup %5542  ;;  %4920 = vmatpush3.bf16.msra.mxu1 %v894_v55  ;;  %5562 = vpow2.f32 %v4460_v44  ;;  %v4462_v44 = vmul.f32 -1.442695, %v6664_v54 }
 0x4f8   :  { %v5545_v59 = vpop.eup %5544  ;;  %v6722_v63 = vpop.permute.xlu1 %385  ;;  %v889_v41 = vmul.f32 %v5543_v7, %v6602_v1  ;;  %5564 = vrcp.f32 %v6683_v14 }
 0x4f9   :  { %v5547_v37 = vpop.eup %5546  ;;  %v891_v53 = vmul.f32 %v5545_v59, %v6584_v29  ;;  %5566 = vpow2.f32 %v4461_v58  ;;  %v7935_v59 = vld [vmem:[#allocation9_spill] sm:$0xff] }
 0x4fa   :  { %v890_v50 = vmul.f32 %v5547_v37, %v6608_v33  ;;  %v5549_v24 = vpop.eup %5548  ;;  %v6733_v17 = vpop.xlane.xlu0 %1365  ;;  %5568 = vrcp.f32 %v6707_v30  ;;  %v470_v30 = vadd.f32 %v7934_v25, %v6722_v63 }
 0x4fb   :  { %v5551_v4 = vpop.eup %5550  ;;  %v896_v1 = vpack.c.bf16 %v892_v18, %v891_v53  ;;  %v1131_v33 = vmul.f32 %v5549_v24, %v6509_v16  ;;  %5570 = vrcp.f32 %v6705_v36  ;;  %v7937_v24 = vpack.c.bf16 %v6592_v49, %v6588_v51 }
 0x4fc   :  { %v6729_v55 = vpop.permute.xlu1 %395  ;;  %v895_v26 = vpack.c.bf16 %v890_v50, %v889_v41  ;;  %v5553_v11 = vpop.eup %5552  ;;  %v1130_v29 = vmul.f32 %v5551_v4, %v6505_v28  ;;  %v4463_v28 = vmul.f32 -1.442695, %v1636_v34  ;;  %5572 = vrcp.f32 %v6699_v52  ;;  %v7936_v34 = vld [vmem:[#allocation5_spill] sm:$0xff]  ;;  %v7938_v52 = vld [vmem:[#allocation4_spill] sm:$0xff] }
 0x4fd   :  { %v5555_v12 = vpop.eup %5554  ;;  %v6743_v21 = vadd.f32 %v7932_v43, %v6729_v55  ;;  %v1133_v5 = vmul.f32 %v5553_v11, %v6501_v39  ;;  %5574 = vrcp.f32 %v6697_v46 }
 0x4fe   :  { %4921 = vmatprep.subr.bf16.mxu1 %v895_v26  ;;  %v1138_v40 = vpack.c.bf16 %v1131_v33, %v1130_v29  ;;  %v5557_v42 = vpop.eup %5556  ;;  %v1132_v41 = vmul.f32 %v5555_v12, %v6496_v0  ;;  %5576 = vpow2.f32 %v4463_v28 }
 0x4ff   :  { %4922 = vmatpush3.bf16.msra.mxu1 %v895_v26  ;;  %v5559_v50 = vpop.eup %5558  ;;  %v1135_v26 = vmul.f32 %v5557_v42, %v6523_v10  ;;  %5578 = vpow2.f32 %v4462_v44 }
 0x500   :  { %v6737_v20 = vpop.permute.xlu1 %400  ;;  %4923 = vmatprep.subr.bf16.mxu1 %v896_v1  ;;  %v1139_v54 = vpack.c.bf16 %v1133_v5, %v1132_v41  ;;  %v5561_v53 = vpop.eup %5560  ;;  %5580 = vrcp.f32 %v6720_v35  ;;  %v7940_v35 = vld [vmem:[#allocation6_spill] sm:$0xff] }
 0x501   :  { %v6747_v16 = vadd.f32 %v7933_v56, %v6737_v20  ;;  %v5563_v51 = vpop.eup %5562  ;;  %5582 = vrcp.f32 %v6712_v9  ;;  %v1137_v12 = vmul.f32 %v5561_v53, %v6519_v32  ;;  %v7939_v56 = vld [vmem:[#allocation7_spill] sm:$0xff] }
 0x502   :  { %v6750_v14 = vpop.permute.xlu0 %390  ;;  %v5565_v10 = vpop.eup %5564  ;;  %5584 = vrcp.f32 %v6733_v17 }
 0x503   :  { %v487_v7 = vpack.c.bf16 %v6747_v16, %v6743_v21  ;;  %v473_v37 = vadd.f32 %v7935_v59, %v6750_v14  ;;  %4924 = vmatpush3.bf16.msra.mxu1 %v896_v1  ;;  %v1134_v1 = vmul.f32 %v5559_v50, %v6517_v31  ;;  %v5567_v11 = vpop.eup %5566  ;;  %v1136_v9 = vmul.f32 %v5565_v10, %v6513_v62  ;;  %v5696_v10 = vld [vmem:[%s7899_s1 + $0x38] sm:$0xff] }
 0x504   :  { %v610_v36 = vpop.permute.xlu1 %609  ;;  %4939 = vmatprep.subr.bf16.mxu1 %v1138_v40  ;;  %v5569_v43 = vpop.eup %5568  ;;  %5586 = vrcp.f32 %v6716_v57  ;;  %v1650_v44 = vadd.f32 1.0, %v5567_v11  ;;  %v5697_v11 = vld [vmem:[%s7899_s1 + $0x30] sm:$0xff] }
 0x505   :  { %v486_v39 = vpack.c.bf16 %v473_v37, %v470_v30  ;;  %v6764_v18 = vadd.f32 %v7936_v34, %v610_v36  ;;  %v6772_v0 = vadd.f32 %v6695_v2, %v610_v36  ;;  %v1140_v29 = vpack.c.bf16 %v1135_v26, %v1134_v1  ;;  %v5571_v28 = vpop.eup %5570 }
 0x506   :  { %4926 = vmatmul.mubr.msk.bf16.vlgmr.msra.gmra.mrb[20].mxu1 %vm55_vm0, %v7937_v24  ;;  %v605_v58 = vpop.permute.xlu0 %604  ;;  %v1141_v25 = vpack.c.bf16 %v1137_v12, %v1136_v9  ;;  %v1376_v30 = vmul.f32 %v5569_v43, %v6551_v15  ;;  %v5573_v59 = vpop.eup %5572  ;;  %v1649_v37 = vadd.f32 1.0, %v5563_v51  ;;  %v1375_v62 = vmul.f32 %v5571_v28, %v6546_v8  ;;  %v5698_v12 = vld [vmem:[%s7902_s7 + $0x18] sm:$0xff]   ;;  %v5699_v43 = vld [vmem:[%s7902_s7 + $0x20] sm:$0xff]  }
 0x507   :  { %v689_v4 = vadd.f32 %v7938_v52, %v605_v58  ;;  %v6776_v46 = vadd.f32 %v6693_v19, %v605_v58  ;;  %4940 = vmatpush3.bf16.msra.mxu1 %v1138_v40  ;;  %4947 = vmatprep.mubr.msk.bf16.mxu1 %vm55_vm0, %v486_v39  ;;  %v1378_v50 = vmul.f32 %v5573_v59, %v6541_v13 }
 0x508   :  { %v620_v49 = vpop.permute.xlu1 %619  ;;  %4941 = vmatprep.subr.bf16.mxu1 %v1139_v54  ;;  %v1383_v41 = vpack.c.bf16 %v1376_v30, %v1375_v62  ;;  %5588 = vrcp.f32 %v1649_v37 }
 0x509   :  { %v705_v2 = vpack.c.bf16 %v6764_v18, %v689_v4  ;;  %v1868_v33 = vpack.c.bf16 %v6772_v0, %v6776_v46  ;;  %v6787_v40 = vadd.f32 %v7939_v56, %v620_v49  ;;  %v6790_v31 = vadd.f32 %v6703_v48, %v620_v49  ;;  %v5700_v56 = vld [vmem:[%s7902_s7 + $0x28] sm:$0xff]   ;;  %s5704_s7 = smov 64  }
 0x50a   :  { %v615_v19 = vpop.permute.xlu0 %614  ;;  %5590 = vrcp.f32 %v1650_v44 }
 0x50b   :  { %v6793_v5 = vadd.f32 %v7940_v35, %v615_v19  ;;  %v6796_v42 = vadd.f32 %v6701_v45, %v615_v19  ;;  %4942 = vmatpush3.bf16.msra.mxu1 %v1139_v54  ;;  %v5575_v45 = vpop.eup %5574 }
 0x50c   :  { %4943 = vmatprep.subr.bf16.mxu1 %v1140_v29  ;;  %v5577_v17 = vpop.eup %5576  ;;  %v1377_v57 = vmul.f32 %v5575_v45, %v6537_v22 }
 0x50d   :  { %v706_v32 = vpack.c.bf16 %v6787_v40, %v6793_v5  ;;  %v1869_v48 = vpack.c.bf16 %v6790_v31, %v6796_v42  ;;  %v5579_v36 = vpop.eup %5578  ;;  %v1652_v15 = vadd.f32 1.0, %v5577_v17 }
 0x50e   :  { %v5581_v39 = vpop.eup %5580  ;;  %v1651_v18 = vadd.f32 1.0, %v5579_v36  ;;  %v1384_v8 = vpack.c.bf16 %v1378_v50, %v1377_v57 }
 0x50f   :  { %4944 = vmatpush3.bf16.msra.mxu1 %v1140_v29  ;;  %v5583_v34 = vpop.eup %5582  ;;  %v1380_v24 = vmul.f32 %v5581_v39, %v6621_v38  ;;  %5592 = vrcp.f32 %v1652_v15  ;;  %v2389_v38 = vsel %vm736_vm4, %v6685_v60, 0  ;;  %v5695_v60 = vld [vmem:[%s7899_s1 + $0x28] sm:$0xff] }
 0x510   :  { %4945 = vmatprep.subr.bf16.mxu1 %v1141_v25  ;;  %v5585_v58 = vpop.eup %5584  ;;  %v1379_v22 = vmul.f32 %v5583_v34, %v6604_v47  ;;  %5594 = vrcp.f32 %v1651_v18  ;;  %v5694_v47 = vld [vmem:[%s7899_s1 + $0x20] sm:$0xff]  ;;  %v7941_v18 = vld [vmem:[#allocation3_spill] sm:$0xff] }
 0x511   :  { %v5587_v54 = vpop.eup %5586  ;;  %v1382_v21 = vmul.f32 %v5585_v58, %v6627_v61 }
 0x512   :  { %v1385_v26 = vpack.c.bf16 %v1380_v24, %v1379_v22  ;;  %v5589_v53 = vpop.eup %5588 }
 0x513   :  { %4946 = vmatpush3.bf16.msra.mxu1 %v1141_v25  ;;  %v1661_v61 = vmul.f32 %v5694_v47, %v5589_v53 }
 0x514   :  { %4961 = vmatprep.subr.bf16.mxu1 %v1383_v41  ;;  %v5591_v52 = vpop.eup %5590 }
 0x515   :  { %v1662_v51 = vmul.f32 %v5695_v60, %v5591_v52 }
 0x516   :  { %4948 = vmatmul.mubr.msk.bf16.vlgmr.msra.gmra.mrb[24].mxu1 %vm55_vm0, %v487_v7  ;;  %v1381_v7 = vmul.f32 %v5587_v54, %v6618_v6  ;;  %v7942_v54 = vld [vmem:[#allocation2_spill] sm:$0xff] }
 0x517   :  { %v2123_v13 = vpop.trf.xlu1  ;;  %4962 = vmatpush3.bf16.msra.mxu1 %v1383_v41  ;;  %4969 = vmatprep.mubr.msk.bf16.mxu1 %vm55_vm0, %v705_v2  ;;  %v1665_v6 = vpack.c.bf16 %v1662_v51, %v1661_v61 }
 0x518   :  { %4963 = vmatprep.subr.bf16.mxu1 %v1384_v8  ;;  %5045 = vmatprep.mubr.msk.bf16.mxu0 %vm723_vm5, %v2123_v13  ;;  %v1386_v4 = vpack.c.bf16 %v1382_v21, %v1381_v7 }
 0x519   :  { %v5593_v49 = vpop.eup %5592 }
 0x51a   :  { %v5595_v1 = vpop.eup %5594  ;;  %v1664_v2 = vmul.f32 %v5696_v10, %v5593_v49 }
 0x51b   :  { %v2124_v16 = vpop.trf.xlu1  ;;  %4964 = vmatpush3.bf16.msra.mxu1 %v1384_v8  ;;  %v1663_v19 = vmul.f32 %v5697_v11, %v5595_v1 }
 0x51c   :  { %5046 = vmatmul.mubr.msk.bf16.vlgmr.msra.gmra.mrb[64].mxu0 %vm723_vm5, %v2124_v16  ;;  %4965 = vmatprep.subr.bf16.mxu1 %v1385_v26 }
 0x51d   :  { %5066 = vmatpush3.bf16.msra.mxu0 %v2389_v38  ;;  %v1666_v29 = vpack.c.bf16 %v1664_v2, %v1663_v19  ;;  %v7943_v2 = vpack.c.bf16 %v6660_v27, %v6657_v23 }
 0x51f   :  { %4966 = vmatpush3.bf16.msra.mxu1 %v1385_v26  ;;  %v2125_v35 = vpop.trf.xlu1 }
 0x520   :  { %4967 = vmatprep.subr.bf16.mxu1 %v1386_v4  ;;  %5049 = vmatprep.mubr.msk.bf16.mxu0 %vm723_vm5, %v2125_v35 }
 0x523   :  { %4968 = vmatpush3.bf16.msra.mxu1 %v1386_v4  ;;  %v2126_v5 = vpop.trf.xlu1 }
 0x524   :  { %4989 = vmatprep.subr.bf16.mxu1 %v7929_v3  ;;  %5050 = vmatmul.mubr.msk.bf16.gmra.mrb[68].mxu0 %vm723_vm5, %v2126_v5 }
 0x526   :  { %4970 = vmatmul.mubr.msk.bf16.vlgmr.msra.gmra.mrb[28].mxu1 %vm55_vm0, %v706_v32 }
 0x527   :  { %4990 = vmatpush3.bf16.msra.mxu1 %v1665_v6  ;;  %4993 = vmatprep.mubr.msk.bf16.mxu1 %vm5702_vm2, %v7929_v3 }
 0x528   :  { %4991 = vmatprep.subr.bf16.mxu1 %v7929_v3 }
 0x52b   :  { %4992 = vmatpush3.bf16.msra.mxu1 %v1666_v29 }
 0x52e   :  { %4994 = vmatmul.mubr.msk.bf16.vlgmr.msra.gmra.mrb[32].mxu1 %vm198_vm3, %v5698_v12 }
 0x52f   :  { %4997 = vmatprep.mubr.msk.bf16.mxu1 %vm5702_vm2, %v7929_v3  ;;  %v1878_v40 = vpop.trf.xlu0 }
 0x533   :  { %v1879_v13 = vpop.trf.xlu0 }
 0x536   :  { %4998 = vmatmul.mubr.msk.bf16.gmra.mrb[36].mxu1 %vm198_vm3, %v5699_v43 }
 0x537   :  { %5001 = vmatprep.mubr.msk.bf16.mxu1 %vm5702_vm2, %v7929_v3  ;;  %v1880_v53 = vpop.trf.xlu0 }
 0x53b   :  { %v1881_v49 = vpop.trf.xlu0 }
 0x53e   :  { %5002 = vmatmul.mubr.msk.bf16.gmra.mrb[40].mxu1 %vm198_vm3, %v5700_v56 }
 0x53f   :  { %5023 = vmatprep.mubr.msk.bf16.mxu1 %vm723_vm5, %v1878_v40 }
 0x5d9   :  { %v6861_v28 = vpop.f32.mrb[20].mxu1 }
 0x5da   :  { %v6863_v9 = vpop.f32.mrb[21].mxu1 }
 0x5db   :  { %v6865_v3 = vpop.f32.mrb[22].mxu1 }
 0x5dc   :  { %v953_v32 = vpack.c.bf16 %v6865_v3, %v6861_v28  ;;  %v6869_v25 = vpop.f32.mrb[23].mxu1 }
 0x5dd   :  { %v952_v30 = vpack.c.bf16 %v6869_v25, %v6863_v9 }
 0x5e9   :  { %v6873_v59 = vpop.f32.mrb[24].mxu1 }
 0x5ea   :  { %v6875_v37 = vpop.f32.mrb[25].mxu1 }
 0x5eb   :  { %v6877_v45 = vpop.f32.mrb[26].mxu1 }
 0x5ec   :  { %v6881_v62 = vpop.f32.mrb[27].mxu1 }
 0x5ed   :  { %v7947_v28 = vpack.c.bf16 %v6881_v62, %v6875_v37 }
 0x5ef   :  { %v6924_v29 = vpop.f32.mrb[64].mxu0 }
 0x5f0   :  { %v6926_v12 = vpop.f32.mrb[65].mxu0 }
 0x5f1   :  { %v6929_v23 = vpop.f32.mrb[66].mxu0 }
 0x5f2   :  { %v6931_v27 = vpop.f32.mrb[67].mxu0 }
 0x5f9   :  { %v6885_v36 = vpop.f32.mrb[28].mxu1 }
 0x5fa   :  { %v6887_v41 = vpop.f32.mrb[29].mxu1 }
 0x5fb   :  { %v6889_v50 = vpop.f32.mrb[30].mxu1 }
 0x5fc   :  { %v6893_v34 = vpop.f32.mrb[31].mxu1 }
 0x601   :  { %v1701_v57 = vpop.f32.mrb[32].mxu1 }
 0x602   :  { %v1702_v8 = vadd.f32 %v1701_v57, %v7941_v18  ;;  %v4995_v24 = vpop.f32.mrb[33].mxu1 }
 0x603   :  { %v1704_v58 = vpop.f32.mrb[34].mxu1 }
 0x604   :  { %v1724_v22 = vpack.c.bf16 %v1702_v8, %v1702_v8  ;;  %v1705_v26 = vadd.f32 %v1704_v58, %v7942_v54  ;;  %v4996_v21 = vpop.f32.mrb[35].mxu1 }
 0x606   :  { %v1899_v16 = vsel %vm736_vm4, %v1724_v22, 0  ;;  %v1725_v38 = vpack.c.bf16 %v1705_v26, %v1705_v26  ;;  %5342 = vmatprep.subr.msk.bf16.mxu1 %vm736_vm4, %v1724_v22 }
 0x607   :  { %5022 = vmatpush3.bf16.msra.mxu1 %v1899_v16 }
 0x608   :  { %2360 = vxpose.xlu0.c.b16.start.end [1/1] (short) (narrow) %v1725_v38, 64 }
 0x609   :  { %v1709_v7 = vpop.f32.mrb[36].mxu1 }
 0x60a   :  { %v4999_v52 = vpop.f32.mrb[37].mxu1  ;;  %5024 = vmatmul.mubr.msk.bf16.vlgmr.msra.gmra.mrb[44].mxu1 %vm723_vm5, %v1879_v13  ;;  %v6904_v47 = vadd.f32 %v1709_v7, %v6722_v63 }
 0x60b   :  { %v1712_v4 = vpop.f32.mrb[38].mxu1  ;;  %5027 = vmatprep.mubr.msk.bf16.mxu1 %vm723_vm5, %v1880_v53 }
 0x60c   :  { %v6907_v61 = vadd.f32 %v1712_v4, %v6750_v14  ;;  %v5000_v60 = vpop.f32.mrb[39].mxu1 }
 0x60d   :  { %v2211_v60 = vsel %vm55_vm0, %v6926_v12, -inf }
 0x60e   :  { %v1726_v51 = vpack.c.bf16 %v6907_v61, %v6904_v47 }
 0x611   :  { %v1717_v1 = vpop.f32.mrb[40].mxu1 }
 0x612   :  { %v5003_v6 = vpop.f32.mrb[41].mxu1  ;;  %5028 = vmatmul.mubr.msk.bf16.gmra.mrb[48].mxu1 %vm723_vm5, %v1881_v49  ;;  %v6917_v63 = vadd.f32 %v1717_v1, %v6729_v55  ;;  %v2217_v1 = vsel %vm55_vm0, %v6924_v29, -inf }
 0x613   :  { %v1720_v10 = vpop.f32.mrb[42].mxu1  ;;  %5039 = vmatprep.mubr.msk.bf16.mxu1 %vm55_vm0, %v7943_v2  ;;  %v2214_v6 = vsel %vm55_vm0, %v6931_v27, -inf  ;;  %v2220_v2 = vsel %vm55_vm0, %v6929_v23, -inf }
 0x614   :  { %v6920_v14 = vadd.f32 %v1720_v10, %v6737_v20  ;;  %v5004_v11 = vpop.f32.mrb[43].mxu1  ;;  %v6934_v20 = vpop.f32.mrb[68].mxu0 }
 0x615   :  { %v6936_v56 = vpop.f32.mrb[69].mxu0  ;;  %v2229_v11 = vsel %vm55_vm0, %v6934_v20, -inf }
 0x616   :  { %v1727_v19 = vpack.c.bf16 %v6920_v14, %v6917_v63  ;;  %v6939_v35 = vpop.f32.mrb[70].mxu0  ;;  %v2223_v10 = vsel %vm55_vm0, %v6936_v56, -inf }
 0x617   :  { %v6941_v5 = vpop.f32.mrb[71].mxu0 }
 0x66e   :  { %v2368_v43 = vpop.trf.xlu0 }
 0x66f   :  { %5067 = vmatprep.mubr.msk.bf16.mxu0 %vm723_vm5, %v2368_v43  ;;  %v2226_v43 = vsel %vm55_vm0, %v6941_v5, -inf }
 0x672   :  { %v2369_v55 = vpop.trf.xlu0 }
 0x673   :  { %5068 = vmatmul.mubr.msk.bf16.vlgmr.msra.gmra.mrb[72].mxu0 %vm723_vm5, %v2369_v55  ;;  %v2232_v55 = vsel %vm55_vm0, %v6939_v35, -inf }
 0x676   :  { %v2370_v40 = vpop.trf.xlu0 }
 0x677   :  { %5071 = vmatprep.mubr.msk.bf16.mxu0 %vm723_vm5, %v2370_v40 }
 0x67a   :  { %v2371_v57 = vpop.trf.xlu0 }
 0x67b   :  { %5072 = vmatmul.mubr.msk.bf16.gmra.mrb[76].mxu0 %vm723_vm5, %v2371_v57 }
 0x6dd   :  { %v6944_v18 = vpop.f32.mrb[44].mxu1 }
 0x6de   :  { %v6946_v8 = vpop.f32.mrb[45].mxu1  ;;  %v1972_v54 = vsel %vm55_vm0, %v6944_v18, -inf }
 0x6df   :  { %v6948_v24 = vpop.f32.mrb[46].mxu1  ;;  %v1966_v58 = vsel %vm55_vm0, %v6946_v8, -inf }
 0x6e0   :  { %1967 = vmax.xlane.f32.xlu1 %v1966_v58  ;;  %v6952_v13 = vpop.f32.mrb[47].mxu1  ;;  %v1975_v21 = vsel %vm55_vm0, %v6948_v24, -inf }
 0x6e1   :  { %v1969_v22 = vsel %vm55_vm0, %v6952_v13, -inf }
 0x6e2   :  { %1970 = vmax.xlane.f32.xlu0 %v1969_v22 }
 0x6e4   :  { %1973 = vmax.xlane.f32.xlu1 %v1972_v54 }
 0x6e5   :  { %v6958_v26 = vpop.f32.mrb[48].mxu1 }
 0x6e6   :  { %v6962_v16 = vpop.f32.mrb[49].mxu1  ;;  %v1984_v52 = vsel %vm55_vm0, %v6958_v26, -inf }
 0x6e7   :  { %v1978_v38 = vsel %vm55_vm0, %v6962_v16, -inf  ;;  %v6966_v7 = vpop.f32.mrb[50].mxu1 }
 0x6e8   :  { %1976 = vmax.xlane.f32.xlu1 %v1975_v21  ;;  %1979 = vmax.xlane.f32.xlu0 %v1978_v38  ;;  %v6968_v53 = vpop.f32.mrb[51].mxu1  ;;  %v1987_v49 = vsel %vm55_vm0, %v6966_v7, -inf }
 0x6e9   :  { %v1981_v4 = vsel %vm55_vm0, %v6968_v53, -inf }
 0x6ec   :  { %1985 = vmax.xlane.f32.xlu0 %v1984_v52  ;;  %1982 = vmax.xlane.f32.xlu1 %v1981_v4 }
 0x6f0   :  { %2212 = vmax.xlane.f32.xlu0 %v2211_v60  ;;  %1988 = vmax.xlane.f32.xlu1 %v1987_v49 }
 0x6f4   :  { %2218 = vmax.xlane.f32.xlu0 %v2217_v1  ;;  %2215 = vmax.xlane.f32.xlu1 %v2214_v6 }
 0x6f8   :  { %2224 = vmax.xlane.f32.xlu0 %v2223_v10  ;;  %2221 = vmax.xlane.f32.xlu1 %v2220_v2 }
 0x6fc   :  { %2230 = vmax.xlane.f32.xlu0 %v2229_v11  ;;  %2227 = vmax.xlane.f32.xlu1 %v2226_v43 }
 0x700   :  { %2233 = vmax.xlane.f32.xlu1 %v2232_v55 }
 0x746   :  { %v6992_v40 = vpop.f32.mrb[72].mxu0 }
 0x747   :  { %v6994_v57 = vpop.f32.mrb[73].mxu0  ;;  %v2462_v38 = vsel %vm55_vm0, %v6992_v40, -inf }
 0x748   :  { %v6996_v58 = vpop.f32.mrb[74].mxu0  ;;  %v2456_v22 = vsel %vm55_vm0, %v6994_v57, -inf }
 0x749   :  { %2457 = vmax.xlane.f32.xlu0 %v2456_v22  ;;  %v7000_v54 = vpop.f32.mrb[75].mxu0  ;;  %v2465_v4 = vsel %vm55_vm0, %v6996_v58, -inf }
 0x74a   :  { %v2459_v21 = vsel %vm55_vm0, %v7000_v54, -inf }
 0x74b   :  { %2460 = vmax.xlane.f32.xlu1 %v2459_v21 }
 0x74d   :  { %2463 = vmax.xlane.f32.xlu0 %v2462_v38 }
 0x74e   :  { %v7006_v52 = vpop.f32.mrb[76].mxu0 }
 0x74f   :  { %2466 = vmax.xlane.f32.xlu1 %v2465_v4  ;;  %v7010_v60 = vpop.f32.mrb[77].mxu0  ;;  %v2474_v2 = vsel %vm55_vm0, %v7006_v52, -inf }
 0x750   :  { %v7012_v49 = vpop.f32.mrb[78].mxu0  ;;  %v2468_v1 = vsel %vm55_vm0, %v7010_v60, -inf }
 0x751   :  { %2469 = vmax.xlane.f32.xlu0 %v2468_v1  ;;  %v7016_v6 = vpop.f32.mrb[79].mxu0  ;;  %v2477_v11 = vsel %vm55_vm0, %v7012_v49, -inf }
 0x752   :  { %v2471_v10 = vsel %vm55_vm0, %v7016_v6, -inf }
 0x753   :  { %2472 = vmax.xlane.f32.xlu1 %v2471_v10 }
 0x755   :  { %2475 = vmax.xlane.f32.xlu0 %v2474_v2 }
 0x757   :  { %2478 = vmax.xlane.f32.xlu1 %v2477_v11 }
 0x76d   :  { %v1968_v43 = vpop.xlane.xlu1 %1967 }
 0x76e   :  { %v1990_v55 = vsub.f32 %v6946_v8, %v1968_v43 }
 0x76f   :  { %v1971_v22 = vpop.xlane.xlu0 %1970 }
 0x770   :  { %v1998_v21 = vmul.f32 1.442695, %v1990_v55  ;;  %v1991_v38 = vsub.f32 %v6952_v13, %v1971_v22 }
 0x771   :  { %v1974_v4 = vpop.xlane.xlu1 %1973 }
 0x772   :  { %5596 = vpow2.f32 %v1998_v21  ;;  %v2000_v1 = vmul.f32 1.442695, %v1991_v38  ;;  %v1992_v10 = vsub.f32 %v6944_v18, %v1974_v4 }
 0x774   :  { %5598 = vpow2.f32 %v2000_v1  ;;  %v2002_v39 = vmul.f32 1.442695, %v1992_v10 }
 0x775   :  { %v1977_v15 = vpop.xlane.xlu1 %1976  ;;  %v1980_v2 = vpop.xlane.xlu0 %1979 }
 0x776   :  { %5600 = vpow2.f32 %v2002_v39  ;;  %v1993_v44 = vsub.f32 %v6948_v24, %v1977_v15  ;;  %v1994_v11 = vsub.f32 %v6962_v16, %v1980_v2 }
 0x778   :  { %v2004_v17 = vmul.f32 1.442695, %v1993_v44  ;;  %v2006_v8 = vmul.f32 1.442695, %v1994_v11 }
 0x779   :  { %v1983_v43 = vpop.xlane.xlu1 %1982  ;;  %v1986_v55 = vpop.xlane.xlu0 %1985 }
 0x77a   :  { %5602 = vpow2.f32 %v2004_v17  ;;  %v1995_v13 = vsub.f32 %v6968_v53, %v1983_v43  ;;  %v1996_v22 = vsub.f32 %v6958_v26, %v1986_v55 }
 0x77b   :  { %5604 = vpow2.f32 %v2006_v8 }
 0x77c   :  { %v7031_v18 = vpop.eup %5596  ;;  %v2008_v21 = vmul.f32 1.442695, %v1995_v13  ;;  %v2010_v38 = vmul.f32 1.442695, %v1996_v22 }
 0x77d   :  { %v1989_v4 = vpop.xlane.xlu1 %1988  ;;  %v2213_v39 = vpop.xlane.xlu0 %2212  ;;  %v2014_v15 = vsel %vm55_vm0, %v7031_v18, 0.0 }
 0x77e   :  { %v7035_v24 = vpop.eup %5598  ;;  %5606 = vpow2.f32 %v2008_v21  ;;  %v1997_v44 = vsub.f32 %v6966_v7, %v1989_v4  ;;  %v2235_v17 = vsub.f32 %v6926_v12, %v2213_v39  ;;  %2015 = vadd.xlane.f32.xlu0 %v2014_v15 }
 0x77f   :  { %5608 = vpow2.f32 %v2010_v38  ;;  %v2017_v26 = vsel %vm55_vm0, %v7035_v24, 0.0 }
 0x780   :  { %v7041_v16 = vpop.eup %5600  ;;  %v2012_v53 = vmul.f32 1.442695, %v1997_v44  ;;  %v2243_v1 = vmul.f32 1.442695, %v2235_v17  ;;  %2018 = vadd.xlane.f32.xlu1 %v2017_v26 }
 0x781   :  { %v2216_v10 = vpop.xlane.xlu1 %2215  ;;  %v2219_v2 = vpop.xlane.xlu0 %2218  ;;  %v2020_v11 = vsel %vm55_vm0, %v7041_v16, 0.0 }
 0x782   :  { %5610 = vpow2.f32 %v2012_v53  ;;  %v2236_v7 = vsub.f32 %v6931_v27, %v2216_v10  ;;  %v2237_v12 = vsub.f32 %v6924_v29, %v2219_v2  ;;  %2021 = vadd.xlane.f32.xlu0 %v2020_v11 }
 0x783   :  { %5612 = vpow2.f32 %v2243_v1 }
 0x784   :  { %v7047_v8 = vpop.eup %5602  ;;  %v2245_v43 = vmul.f32 1.442695, %v2236_v7  ;;  %v2247_v55 = vmul.f32 1.442695, %v2237_v12 }
 0x785   :  { %v7049_v13 = vpop.eup %5604  ;;  %v2222_v22 = vpop.xlane.xlu1 %2221  ;;  %v2023_v38 = vsel %vm55_vm0, %v7047_v8, 0.0 }
 0x786   :  { %v2225_v21 = vpop.xlane.xlu0 %2224  ;;  %5614 = vpow2.f32 %v2245_v43  ;;  %v2238_v4 = vsub.f32 %v6929_v23, %v2222_v22  ;;  %2024 = vadd.xlane.f32.xlu1 %v2023_v38  ;;  %v2026_v29 = vsel %vm55_vm0, %v7049_v13, 0.0 }
 0x787   :  { %v2239_v27 = vsub.f32 %v6936_v56, %v2225_v21  ;;  %5616 = vpow2.f32 %v2247_v55  ;;  %2027 = vadd.xlane.f32.xlu0 %v2026_v29 }
 0x788   :  { %v7057_v39 = vpop.eup %5606  ;;  %v2249_v15 = vmul.f32 1.442695, %v2238_v4 }
 0x789   :  { %v2251_v44 = vmul.f32 1.442695, %v2239_v27  ;;  %v7059_v17 = vpop.eup %5608  ;;  %v2228_v26 = vpop.xlane.xlu1 %2227  ;;  %v2029_v1 = vsel %vm55_vm0, %v7057_v39, 0.0 }
 0x78a   :  { %v2231_v53 = vpop.xlane.xlu0 %2230  ;;  %5618 = vpow2.f32 %v2249_v15  ;;  %v2240_v23 = vsub.f32 %v6941_v5, %v2228_v26  ;;  %2030 = vadd.xlane.f32.xlu1 %v2029_v1  ;;  %v2032_v10 = vsel %vm55_vm0, %v7059_v17, 0.0 }
 0x78b   :  { %v2241_v56 = vsub.f32 %v6934_v20, %v2231_v53  ;;  %5620 = vpow2.f32 %v2251_v44  ;;  %2033 = vadd.xlane.f32.xlu0 %v2032_v10 }
 0x78c   :  { %v7067_v2 = vpop.eup %5610  ;;  %v2253_v11 = vmul.f32 1.442695, %v2240_v23 }
 0x78d   :  { %v2255_v7 = vmul.f32 1.442695, %v2241_v56  ;;  %v7069_v12 = vpop.eup %5612  ;;  %v2234_v43 = vpop.xlane.xlu1 %2233  ;;  %v2035_v55 = vsel %vm55_vm0, %v7067_v2, 0.0 }
 0x78e   :  { %5622 = vpow2.f32 %v2253_v11  ;;  %v2242_v5 = vsub.f32 %v6939_v35, %v2234_v43  ;;  %2036 = vadd.xlane.f32.xlu1 %v2035_v55  ;;  %v2259_v20 = vsel %vm55_vm0, %v7069_v12, 0.0 }
 0x78f   :  { %5624 = vpow2.f32 %v2255_v7  ;;  %2260 = vadd.xlane.f32.xlu0 %v2259_v20 }
 0x790   :  { %v7076_v22 = vpop.eup %5614  ;;  %v2257_v21 = vmul.f32 1.442695, %v2242_v5 }
 0x791   :  { %v7078_v38 = vpop.eup %5616  ;;  %v2262_v4 = vsel %vm55_vm0, %v7076_v22, 0.0 }
 0x792   :  { %5626 = vpow2.f32 %v2257_v21  ;;  %2263 = vadd.xlane.f32.xlu1 %v2262_v4  ;;  %v2265_v27 = vsel %vm55_vm0, %v7078_v38, 0.0 }
 0x793   :  { %2266 = vadd.xlane.f32.xlu0 %v2265_v27 }
 0x794   :  { %v7084_v35 = vpop.eup %5618 }
 0x795   :  { %v7086_v29 = vpop.eup %5620  ;;  %v2268_v15 = vsel %vm55_vm0, %v7084_v35, 0.0 }
 0x796   :  { %2269 = vadd.xlane.f32.xlu1 %v2268_v15  ;;  %v2271_v44 = vsel %vm55_vm0, %v7086_v29, 0.0 }
 0x797   :  { %2272 = vadd.xlane.f32.xlu0 %v2271_v44 }
 0x798   :  { %v7092_v26 = vpop.eup %5622 }
 0x799   :  { %v7094_v53 = vpop.eup %5624  ;;  %v2274_v1 = vsel %vm55_vm0, %v7092_v26, 0.0 }
 0x79a   :  { %2275 = vadd.xlane.f32.xlu1 %v2274_v1  ;;  %v2277_v23 = vsel %vm55_vm0, %v7094_v53, 0.0 }
 0x79b   :  { %2278 = vadd.xlane.f32.xlu0 %v2277_v23 }
 0x79c   :  { %v7100_v56 = vpop.eup %5626 }
 0x79d   :  { %v2280_v10 = vsel %vm55_vm0, %v7100_v56, 0.0 }
 0x79e   :  { %2281 = vadd.xlane.f32.xlu1 %v2280_v10 }
 0x7d6   :  { %v2458_v11 = vpop.xlane.xlu0 %2457 }
 0x7d7   :  { %v2480_v7 = vsub.f32 %v6994_v57, %v2458_v11 }
 0x7d8   :  { %v2461_v43 = vpop.xlane.xlu1 %2460 }
 0x7d9   :  { %v2488_v55 = vmul.f32 1.442695, %v2480_v7  ;;  %v2481_v5 = vsub.f32 %v7000_v54, %v2461_v43 }
 0x7da   :  { %v2464_v20 = vpop.xlane.xlu0 %2463 }
 0x7db   :  { %5628 = vpow2.f32 %v2488_v55  ;;  %v2490_v21 = vmul.f32 1.442695, %v2481_v5  ;;  %v2482_v4 = vsub.f32 %v6992_v40, %v2464_v20 }
 0x7dc   :  { %v2467_v27 = vpop.xlane.xlu1 %2466 }
 0x7dd   :  { %5630 = vpow2.f32 %v2490_v21  ;;  %v2492_v15 = vmul.f32 1.442695, %v2482_v4  ;;  %v2483_v44 = vsub.f32 %v6996_v58, %v2467_v27 }
 0x7de   :  { %v2470_v1 = vpop.xlane.xlu0 %2469 }
 0x7df   :  { %5632 = vpow2.f32 %v2492_v15  ;;  %v2494_v23 = vmul.f32 1.442695, %v2483_v44  ;;  %v2484_v10 = vsub.f32 %v7010_v60, %v2470_v1 }
 0x7e0   :  { %v2473_v57 = vpop.xlane.xlu1 %2472 }
 0x7e1   :  { %5634 = vpow2.f32 %v2494_v23  ;;  %v2496_v11 = vmul.f32 1.442695, %v2484_v10  ;;  %v2485_v54 = vsub.f32 %v7016_v6, %v2473_v57 }
 0x7e2   :  { %v2476_v7 = vpop.xlane.xlu0 %2475 }
 0x7e3   :  { %5636 = vpow2.f32 %v2496_v11  ;;  %v2498_v43 = vmul.f32 1.442695, %v2485_v54  ;;  %v2486_v40 = vsub.f32 %v7006_v52, %v2476_v7 }
 0x7e4   :  { %v2479_v55 = vpop.xlane.xlu1 %2478 }
 0x7e5   :  { %v7111_v5 = vpop.eup %5628  ;;  %5638 = vpow2.f32 %v2498_v43  ;;  %v2500_v58 = vmul.f32 1.442695, %v2486_v40  ;;  %v2487_v20 = vsub.f32 %v7012_v49, %v2479_v55 }
 0x7e6   :  { %v2504_v60 = vsel %vm55_vm0, %v7111_v5, 0.0 }
 0x7e7   :  { %v7116_v21 = vpop.eup %5630  ;;  %5640 = vpow2.f32 %v2500_v58  ;;  %v2502_v4 = vmul.f32 1.442695, %v2487_v20  ;;  %2505 = vadd.xlane.f32.xlu0 %v2504_v60 }
 0x7e8   :  { %v2507_v6 = vsel %vm55_vm0, %v7116_v21, 0.0 }
 0x7e9   :  { %v7120_v27 = vpop.eup %5632  ;;  %5642 = vpow2.f32 %v2502_v4  ;;  %2508 = vadd.xlane.f32.xlu1 %v2507_v6 }
 0x7ea   :  { %v2510_v52 = vsel %vm55_vm0, %v7120_v27, 0.0 }
 0x7eb   :  { %v7124_v15 = vpop.eup %5634  ;;  %2511 = vadd.xlane.f32.xlu0 %v2510_v52 }
 0x7ec   :  { %v2513_v49 = vsel %vm55_vm0, %v7124_v15, 0.0 }
 0x7ed   :  { %v7128_v44 = vpop.eup %5636  ;;  %2514 = vadd.xlane.f32.xlu1 %v2513_v49 }
 0x7ee   :  { %v2516_v1 = vsel %vm55_vm0, %v7128_v44, 0.0 }
 0x7ef   :  { %v7132_v23 = vpop.eup %5638  ;;  %2517 = vadd.xlane.f32.xlu0 %v2516_v1 }
 0x7f0   :  { %v2519_v10 = vsel %vm55_vm0, %v7132_v23, 0.0 }
 0x7f1   :  { %v7136_v57 = vpop.eup %5640  ;;  %2520 = vadd.xlane.f32.xlu1 %v2519_v10 }
 0x7f2   :  { %v2522_v11 = vsel %vm55_vm0, %v7136_v57, 0.0 }
 0x7f3   :  { %v7140_v54 = vpop.eup %5642  ;;  %2523 = vadd.xlane.f32.xlu0 %v2522_v11 }
 0x7f4   :  { %v2525_v7 = vsel %vm55_vm0, %v7140_v54, 0.0 }
 0x7f5   :  { %2526 = vadd.xlane.f32.xlu1 %v2525_v7 }
 0x80b   :  { %v2016_v43 = vpop.xlane.xlu0 %2015 }
 0x80c   :  { %5644 = vrcp.f32 %v2016_v43 }
 0x80d   :  { %v2019_v40 = vpop.xlane.xlu1 %2018 }
 0x80e   :  { %5646 = vrcp.f32 %v2019_v40 }
 0x80f   :  { %v2022_v55 = vpop.xlane.xlu0 %2021 }
 0x810   :  { %5648 = vrcp.f32 %v2022_v55 }
 0x813   :  { %v2025_v58 = vpop.xlane.xlu1 %2024 }
 0x814   :  { %5650 = vrcp.f32 %v2025_v58  ;;  %v2028_v20 = vpop.xlane.xlu0 %2027 }
 0x815   :  { %5652 = vrcp.f32 %v2028_v20 }
 0x816   :  { %v5645_v60 = vpop.eup %5644 }
 0x817   :  { %v2031_v4 = vpop.xlane.xlu1 %2030  ;;  %v2046_v49 = vmul.f32 %v5645_v60, %v7031_v18 }
 0x818   :  { %v5647_v6 = vpop.eup %5646  ;;  %5654 = vrcp.f32 %v2031_v4  ;;  %v2034_v52 = vpop.xlane.xlu0 %2033 }
 0x819   :  { %v2047_v1 = vmul.f32 %v5647_v6, %v7035_v24  ;;  %5656 = vrcp.f32 %v2034_v52 }
 0x81a   :  { %v5649_v7 = vpop.eup %5648 }
 0x81b   :  { %v2037_v10 = vpop.xlane.xlu1 %2036  ;;  %v2054_v11 = vpack.c.bf16 %v2047_v1, %v2046_v49  ;;  %v2048_v58 = vmul.f32 %v5649_v7, %v7041_v16 }
 0x81c   :  { %5658 = vrcp.f32 %v2037_v10  ;;  %v2261_v43 = vpop.xlane.xlu0 %2260 }
 0x81d   :  { %5031 = vmatprep.subr.bf16.mxu1 %v2054_v11  ;;  %5660 = vrcp.f32 %v2261_v43 }
 0x81e   :  { %v5651_v40 = vpop.eup %5650  ;;  %5032 = vmatpush3.bf16.msra.mxu1 %v2054_v11 }
 0x81f   :  { %v2264_v55 = vpop.xlane.xlu1 %2263  ;;  %v2049_v20 = vmul.f32 %v5651_v40, %v7047_v8  ;;  %v5653_v4 = vpop.eup %5652 }
 0x820   :  { %5662 = vrcp.f32 %v2264_v55  ;;  %v2267_v18 = vpop.xlane.xlu0 %2266  ;;  %v2050_v52 = vmul.f32 %v5653_v4, %v7049_v13 }
 0x821   :  { %v2055_v60 = vpack.c.bf16 %v2049_v20, %v2048_v58  ;;  %5664 = vrcp.f32 %v2267_v18 }
 0x822   :  { %v5655_v24 = vpop.eup %5654 }
 0x823   :  { %v2270_v6 = vpop.xlane.xlu1 %2269  ;;  %5033 = vmatprep.subr.bf16.mxu1 %v2055_v60  ;;  %v2051_v49 = vmul.f32 %v5655_v24, %v7057_v39  ;;  %v5657_v1 = vpop.eup %5656  ;;  %v7944_v24 = vld [vmem:[#allocation13_spill] sm:$0xff] }
 0x824   :  { %5666 = vrcp.f32 %v2270_v6  ;;  %v2273_v10 = vpop.xlane.xlu0 %2272  ;;  %5034 = vmatpush3.bf16.msra.mxu1 %v2055_v60  ;;  %v2052_v7 = vmul.f32 %v5657_v1, %v7059_v17 }
 0x825   :  { %v2056_v11 = vpack.c.bf16 %v2051_v49, %v2050_v52  ;;  %5668 = vrcp.f32 %v2273_v10 }
 0x826   :  { %v5659_v16 = vpop.eup %5658 }
 0x827   :  { %v2276_v8 = vpop.xlane.xlu1 %2275  ;;  %5035 = vmatprep.subr.bf16.mxu1 %v2056_v11  ;;  %v2053_v43 = vmul.f32 %v5659_v16, %v7067_v2  ;;  %v5661_v40 = vpop.eup %5660  ;;  %v7945_v2 = vld [vmem:[#allocation12_spill] sm:$0xff] }
 0x828   :  { %5670 = vrcp.f32 %v2276_v8  ;;  %v2279_v55 = vpop.xlane.xlu0 %2278  ;;  %5036 = vmatpush3.bf16.msra.mxu1 %v2056_v11  ;;  %v2291_v20 = vmul.f32 %v5661_v40, %v7069_v12  ;;  %v7946_v6 = vpack.c.bf16 %v7944_v24, %v7945_v2 }
 0x829   :  { %v2057_v13 = vpack.c.bf16 %v2053_v43, %v2052_v7  ;;  %5672 = vrcp.f32 %v2279_v55 }
 0x82a   :  { %v5663_v58 = vpop.eup %5662 }
 0x82b   :  { %v2282_v39 = vpop.xlane.xlu1 %2281  ;;  %5037 = vmatprep.subr.bf16.mxu1 %v2057_v13  ;;  %v2292_v4 = vmul.f32 %v5663_v58, %v7076_v22  ;;  %v5665_v18 = vpop.eup %5664 }
 0x82c   :  { %5674 = vrcp.f32 %v2282_v39  ;;  %5038 = vmatpush3.bf16.msra.mxu1 %v2057_v13  ;;  %v2293_v52 = vmul.f32 %v5665_v18, %v7078_v38 }
 0x82d   :  { %v2299_v60 = vpack.c.bf16 %v2292_v4, %v2291_v20 }
 0x82e   :  { %v5667_v17 = vpop.eup %5666 }
 0x82f   :  { %5040 = vmatmul.mubr.msk.bf16.vlgmr.msra.gmra.mrb[52].mxu1 %vm55_vm0, %v7946_v6  ;;  %5053 = vmatprep.subr.bf16.mxu1 %v2299_v60  ;;  %v2294_v49 = vmul.f32 %v5667_v17, %v7084_v35  ;;  %v5669_v1 = vpop.eup %5668 }
 0x830   :  { %5054 = vmatpush3.bf16.msra.mxu1 %v2299_v60  ;;  %5061 = vmatprep.mubr.msk.bf16.mxu1 %vm55_vm0, %v1726_v51  ;;  %v2295_v10 = vmul.f32 %v5669_v1, %v7086_v29 }
 0x831   :  { %v2300_v12 = vpack.c.bf16 %v2294_v49, %v2293_v52 }
 0x832   :  { %v5671_v22 = vpop.eup %5670 }
 0x833   :  { %5055 = vmatprep.subr.bf16.mxu1 %v2300_v12  ;;  %v2296_v11 = vmul.f32 %v5671_v22, %v7092_v26  ;;  %v5673_v16 = vpop.eup %5672 }
 0x834   :  { %5056 = vmatpush3.bf16.msra.mxu1 %v2300_v12  ;;  %v2297_v35 = vmul.f32 %v5673_v16, %v7094_v53 }
 0x835   :  { %v2301_v8 = vpack.c.bf16 %v2296_v11, %v2295_v10 }
 0x836   :  { %v5675_v38 = vpop.eup %5674 }
 0x837   :  { %5057 = vmatprep.subr.bf16.mxu1 %v2301_v8  ;;  %v2298_v7 = vmul.f32 %v5675_v38, %v7100_v56  ;;  %v5370_v38 = vld [vmem:[%s7904_s9 + $0x40] sm:$0xff]  }
 0x838   :  { %5058 = vmatpush3.bf16.msra.mxu1 %v2301_v8 }
 0x839   :  { %v2302_v47 = vpack.c.bf16 %v2298_v7, %v2297_v35  ;;  %v2650_v7 = vld [vmem:[%s7905_s11 + $0x8] sm:$0xff] }
 0x83b   :  { %5059 = vmatprep.subr.bf16.mxu1 %v2302_v47 }
 0x83c   :  { %5060 = vmatpush3.bf16.msra.mxu1 %v2302_v47  ;;  %v2649_v47 = vld [vmem:[%s7905_s11] sm:$0xff] }
 0x83f   :  { %5062 = vmatmul.mubr.msk.bf16.vlgmr.msra.gmra.mrb[56].mxu1 %vm55_vm0, %v1727_v19 }
 0x840   :  { %5083 = vmatprep.mubr.msk.bf16.mxu1 %vm55_vm0, %v1868_v33 }
 0x874   :  { %v2506_v61 = vpop.xlane.xlu0 %2505 }
 0x875   :  { %5676 = vrcp.f32 %v2506_v61  ;;  %v2654_v61 = vld [vmem:[%s7906_s12 + $0x8] sm:$0xff] }
 0x876   :  { %v2509_v51 = vpop.xlane.xlu1 %2508 }
 0x877   :  { %5678 = vrcp.f32 %v2509_v51  ;;  %v2653_v51 = vld [vmem:[%s7906_s12] sm:$0xff] }
 0x878   :  { %v2512_v29 = vpop.xlane.xlu0 %2511 }
 0x879   :  { %5680 = vrcp.f32 %v2512_v29  ;;  %v2652_v29 = vld [vmem:[%s7905_s11 + $0x18] sm:$0xff] }
 0x87a   :  { %v2515_v26 = vpop.xlane.xlu1 %2514 }
 0x87b   :  { %5682 = vrcp.f32 %v2515_v26  ;;  %v2651_v26 = vld [vmem:[%s7905_s11 + $0x10] sm:$0xff] }
 0x87c   :  { %v2518_v53 = vpop.xlane.xlu0 %2517 }
 0x87d   :  { %5684 = vrcp.f32 %v2518_v53 }
 0x87e   :  { %v2521_v56 = vpop.xlane.xlu1 %2520 }
 0x87f   :  { %v5677_v43 = vpop.eup %5676  ;;  %5686 = vrcp.f32 %v2521_v56 }
 0x880   :  { %v2524_v63 = vpop.xlane.xlu0 %2523  ;;  %v2536_v0 = vmul.f32 %v5677_v43, %v7111_v5 }
 0x881   :  { %v5679_v14 = vpop.eup %5678  ;;  %5688 = vrcp.f32 %v2524_v63  ;;  %v2656_v63 = vld [vmem:[%s7906_s12 + $0x18] sm:$0xff] }
 0x882   :  { %v2527_v19 = vpop.xlane.xlu1 %2526  ;;  %v2537_v46 = vmul.f32 %v5679_v14, %v7116_v21  ;;  %v2655_v14 = vld [vmem:[%s7906_s12 + $0x10] sm:$0xff] }
 0x883   :  { %v5681_v33 = vpop.eup %5680  ;;  %5690 = vrcp.f32 %v2527_v19 }
 0x884   :  { %v2544_v40 = vpack.c.bf16 %v2537_v46, %v2536_v0  ;;  %v2538_v13 = vmul.f32 %v5681_v33, %v7120_v27  ;;  %v7950_v0 = vpack.c.bf16 %v6889_v50, %v6885_v36  ;;  %v5372_v36 = vld [vmem:[%s7904_s9 + $0x10] sm:$0xff]   ;;  %v5374_v50 = vld [vmem:[%s7904_s9 + $0x20] sm:$0xff]   ;;  %v5373_v33 = vld [vmem:[%s7904_s9 + $0x18] sm:$0xff]  }
 0x885   :  { %v5683_v55 = vpop.eup %5682 }
 0x886   :  { %5075 = vmatprep.subr.bf16.mxu1 %v2544_v40  ;;  %v2539_v58 = vmul.f32 %v5683_v55, %v7124_v15  ;;  %v5376_v55 = vld [vmem:[%s7904_s9 + $0x30] sm:$0xff]  }
 0x887   :  { %v5685_v39 = vpop.eup %5684  ;;  %5076 = vmatpush3.bf16.msra.mxu1 %v2544_v40  ;;  %v5375_v40 = vld [vmem:[%s7904_s9 + $0x28] sm:$0xff]  }
 0x888   :  { %v2545_v20 = vpack.c.bf16 %v2539_v58, %v2538_v13  ;;  %v2540_v18 = vmul.f32 %v5685_v39, %v7128_v44  ;;  %v5378_v13 = vld [vmem:[%s7904_s9 + $0x50] sm:$0xff]   ;;  %v5377_v58 = vld [vmem:[%s7904_s9 + $0x38] sm:$0xff]  }
 0x889   :  { %v5687_v4 = vpop.eup %5686  ;;  %v5379_v39 = vld [vmem:[%s7904_s9 + $0x58] sm:$0xff]  }
 0x88a   :  { %5077 = vmatprep.subr.bf16.mxu1 %v2545_v20  ;;  %v2541_v5 = vmul.f32 %v5687_v4, %v7132_v23  ;;  %v5382_v4 = vld [vmem:[%s7904_s9 + $0x70] sm:$0xff]  }
 0x88b   :  { %v5689_v60 = vpop.eup %5688  ;;  %5078 = vmatpush3.bf16.msra.mxu1 %v2545_v20  ;;  %v5380_v20 = vld [vmem:[%s7904_s9 + $0x60] sm:$0xff]  }
 0x88c   :  { %v2546_v21 = vpack.c.bf16 %v2541_v5, %v2540_v18  ;;  %v2542_v24 = vmul.f32 %v5689_v60, %v7136_v57  ;;  %v5381_v18 = vld [vmem:[%s7904_s9 + $0x68] sm:$0xff]   ;;  %v5383_v5 = vld [vmem:[%s7904_s9 + $0x78] sm:$0xff]   ;;  %v5384_v60 = vld [vmem:[%s7904_s9 + $0x80] sm:$0xff]  }
 0x88d   :  { %v5691_v17 = vpop.eup %5690 }
 0x88e   :  { %5079 = vmatprep.subr.bf16.mxu1 %v2546_v21  ;;  %v2543_v27 = vmul.f32 %v5691_v17, %v7140_v54 }
 0x88f   :  { %5080 = vmatpush3.bf16.msra.mxu1 %v2546_v21  ;;  %v5385_v21 = vld [vmem:[%s7904_s9 + $0x88] sm:$0xff]  }
 0x890   :  { %v2547_v15 = vpack.c.bf16 %v2543_v27, %v2542_v24 }
 0x892   :  { %5081 = vmatprep.subr.bf16.mxu1 %v2547_v15 }
 0x893   :  { %5082 = vmatpush3.bf16.msra.mxu1 %v2547_v15 }
 0x896   :  { %5084 = vmatmul.mubr.msk.bf16.vlgmr.msra.gmra.mrb[60].mxu1 %vm55_vm0, %v1869_v48  ;;  %v5368_v48 = vld [vmem:[%s7904_s9] sm:$0xff]  }
 0x897   :  { %5099 = vmatprep.mubr.msk.bf16.mxu0 %vm2676_vm6, %v5368_v48  ;;  %5115 = vmatprep.mubr.msk.bf16.mxu1 %vm2676_vm6, %v5370_v38 }
 0x902   :  { %v5041_v44 = vpop.f32.mrb[52].mxu1 }
 0x903   :  { %v2098_v23 = vpop.f32.mrb[53].mxu1 }
 0x904   :  { %v5042_v2 = vpop.f32.mrb[54].mxu1 }
 0x905   :  { %v2114_v6 = vpack.c.bf16 %v5042_v2, %v5041_v44  ;;  %v2101_v52 = vpop.f32.mrb[55].mxu1 }
 0x906   :  { %v2113_v49 = vpack.c.bf16 %v2101_v52, %v2098_v23 }
 0x907   :  { %2609 = vrot.lane.b32.xlu1 %v2114_v6, %s5704_s7 }
 0x908   :  { %2607 = vrot.lane.b32.xlu0 %v2113_v49, %s5704_s7 }
 0x912   :  { %v5063_v57 = vpop.f32.mrb[56].mxu1 }
 0x913   :  { %v2343_v54 = vpop.f32.mrb[57].mxu1 }
 0x914   :  { %v5064_v1 = vpop.f32.mrb[58].mxu1 }
 0x915   :  { %v2359_v12 = vpack.c.bf16 %v5064_v1, %v5063_v57  ;;  %v2346_v22 = vpop.f32.mrb[59].mxu1 }
 0x916   :  { %v2358_v10 = vpack.c.bf16 %v2346_v22, %v2343_v54 }
 0x917   :  { %2623 = vrot.lane.b32.xlu0 %v2359_v12, %s5704_s7 }
 0x918   :  { %2621 = vrot.lane.b32.xlu1 %v2358_v10, %s5704_s7 }
 0x969   :  { %v5085_v31 = vpop.f32.mrb[60].mxu1 }
 0x96a   :  { %v2588_v42 = vpop.f32.mrb[61].mxu1 }
 0x96b   :  { %v5086_v11 = vpop.f32.mrb[62].mxu1 }
 0x96c   :  { %v2604_v16 = vpack.c.bf16 %v5086_v11, %v5085_v31  ;;  %v2591_v8 = vpop.f32.mrb[63].mxu1 }
 0x96d   :  { %v2603_v35 = vpack.c.bf16 %v2591_v8, %v2588_v42 }
 0x96e   :  { %2637 = vrot.lane.b32.xlu0 %v2604_v16, %s5704_s7 }
 0x96f   :  { %2635 = vrot.lane.b32.xlu1 %v2603_v35, %s5704_s7 }
 0x972   :  { %3450 = vperm.xlu0 %5357, %v2650_v7  }
 0x973   :  { %3445 = vperm.xlu1 %5358, %v2649_v47  }
 0x976   :  { %3474 = vperm.xlu0 %5357, %v2654_v61  }
 0x977   :  { %3469 = vperm.xlu1 %5358, %v2653_v51  }
 0x979   :  { %v2610_v53 = vpop.permute.xlu1 %2609 }
 0x97a   :  { %3460 = vperm.xlu0 %5357, %v2652_v29   ;;  %v2608_v56 = vpop.permute.xlu0 %2607  ;;  %v7238_v9 = vsel %vm55_vm0, %v953_v32, %v2610_v53  ;;  %v7948_v32 = vpack.c.bf16 %v6877_v45, %v6873_v59  ;;  %v7949_v59 = vpack.c.bf16 %v6893_v34, %v6887_v41  ;;  %v5369_v41 = vld [vmem:[%s7904_s9 + $0x8] sm:$0xff]  }
 0x97b   :  { %v7224_v43 = vsel %vm55_vm0, %v952_v30, %v2608_v56  ;;  %3455 = vperm.xlu1 %5358, %v2651_v26   ;;  %v5371_v34 = vld [vmem:[%s7904_s9 + $0x48] sm:$0xff]   ;;  %s5706_s9 = smov 8  }
 0x97c   :  { %5087 = vmatprep.subr.bf16.mxu0 %v7224_v43  ;;  %5103 = vmatprep.subr.bf16.mxu1 %v7224_v43 }
 0x97d   :  { %5088 = vmatpush3.bf16.msra.mxu0 %v7224_v43  ;;  %5104 = vmatpush3.bf16.msra.mxu1 %v7224_v43 }
 0x97e   :  { %3484 = vperm.xlu0 %5357, %v2656_v63   ;;  %5089 = vmatprep.subr.bf16.mxu0 %v7238_v9 }
 0x97f   :  { %5105 = vmatprep.subr.bf16.mxu1 %v7238_v9  ;;  %3479 = vperm.xlu1 %5358, %v2655_v14  }
 0x981   :  { %5090 = vmatpush3.bf16.msra.mxu0 %v7238_v9  ;;  %5106 = vmatpush3.bf16.msra.mxu1 %v7238_v9 }
 0x989   :  { %v2624_v25 = vpop.permute.xlu0 %2623 }
 0x98a   :  { %v2622_v30 = vpop.permute.xlu1 %2621  ;;  %v7258_v19 = vsel %vm55_vm0, %v7948_v32, %v2624_v25  ;;  %v4565_v25 = vld [vmem:[%s7907_s3 + $0x20] sm:$0xff] }
 0x98b   :  { %v7250_v3 = vsel %vm55_vm0, %v7947_v28, %v2622_v30  ;;  %v4566_v30 = vld [vmem:[%s7907_s3 + $0x28] sm:$0xff]  ;;  %v4567_v28 = vld [vmem:[%s7907_s3 + $0x30] sm:$0xff]  ;;  %v3536_v32 = vld [vmem:[%s7908_s13] sm:$0xff] }
 0x98c   :  { %5091 = vmatprep.subr.bf16.mxu0 %v7250_v3  ;;  %5107 = vmatprep.subr.bf16.mxu1 %v7250_v3 }
 0x98d   :  { %5092 = vmatpush3.bf16.msra.mxu0 %v7250_v3  ;;  %5108 = vmatpush3.bf16.msra.mxu1 %v7250_v3 }
 0x98e   :  { %5093 = vmatprep.subr.bf16.mxu0 %v7258_v19  ;;  %5109 = vmatprep.subr.bf16.mxu1 %v7258_v19 }
 0x991   :  { %5094 = vmatpush3.bf16.msra.mxu0 %v7258_v19  ;;  %5110 = vmatpush3.bf16.msra.mxu1 %v7258_v19 }
 0x9e0   :  { %v2638_v37 = vpop.permute.xlu0 %2637 }
 0x9e1   :  { %v2636_v62 = vpop.permute.xlu1 %2635  ;;  %v7278_v46 = vsel %vm55_vm0, %v7950_v0, %v2638_v37  ;;  %v3537_v37 = vld [vmem:[%s7908_s13 + $0x8] sm:$0xff]  ;;  %v5386_v0 = vld [vmem:[%s7910_s10] sm:$0xff]  }
 0x9e2   :  { %v7270_v45 = vsel %vm55_vm0, %v7949_v59, %v2636_v62  ;;  %v3538_v59 = vld [vmem:[%s7908_s13 + $0x10] sm:$0xff] }
 0x9e3   :  { %5095 = vmatprep.subr.bf16.mxu0 %v7270_v45  ;;  %5111 = vmatprep.subr.bf16.mxu1 %v7270_v45 }
 0x9e4   :  { %5096 = vmatpush3.bf16.msra.mxu0 %v7270_v45  ;;  %5112 = vmatpush3.bf16.msra.mxu1 %v7270_v45 }
 0x9e5   :  { %5097 = vmatprep.subr.bf16.mxu0 %v7278_v46  ;;  %5113 = vmatprep.subr.bf16.mxu1 %v7278_v46 }
 0x9e8   :  { %5098 = vmatpush3.bf16.msra.mxu0 %v7278_v46  ;;  %5114 = vmatpush3.bf16.msra.mxu1 %v7278_v46 }
 0x9e9   :  { %5119 = vmatprep.subr.bf16.mxu0 %v7224_v43  ;;  %5135 = vmatprep.subr.bf16.mxu1 %v7224_v43 }
 0x9eb   :  { %5100 = vmatmul.mubr.msk.bf16.vlgmr.msra.gmra.mrb[80].mxu0 %vm2676_vm6, %v5369_v41  ;;  %5116 = vmatmul.mubr.msk.bf16.vlgmr.msra.gmra.mrb[64].mxu1 %vm2676_vm6, %v5371_v34  ;;  %v3540_v34 = vld [vmem:[%s7909_s14] sm:$0xff] }
 0x9ec   :  { %5120 = vmatpush3.bf16.msra.mxu0 %v7224_v43  ;;  %5136 = vmatpush3.bf16.msra.mxu1 %v7224_v43 }
 0x9ed   :  { %5121 = vmatprep.subr.bf16.mxu0 %v7238_v9  ;;  %5137 = vmatprep.subr.bf16.mxu1 %v7238_v9 }
 0x9ee   :  { %5131 = vmatprep.mubr.msk.bf16.mxu0 %vm2676_vm6, %v5372_v36  ;;  %5147 = vmatprep.mubr.msk.bf16.mxu1 %vm2676_vm6, %v5374_v50  ;;  %v3541_v36 = vld [vmem:[%s7909_s14 + $0x8] sm:$0xff] }
 0x9f0   :  { %5122 = vmatpush3.bf16.msra.mxu0 %v7238_v9  ;;  %5138 = vmatpush3.bf16.msra.mxu1 %v7238_v9 }
 0x9f1   :  { %5123 = vmatprep.subr.bf16.mxu0 %v7250_v3  ;;  %5139 = vmatprep.subr.bf16.mxu1 %v7250_v3  ;;  %v7498_v62 = vpop.permute.xlu0 %3450 }
 0x9f4   :  { %5124 = vmatpush3.bf16.msra.mxu0 %v7250_v3  ;;  %5140 = vmatpush3.bf16.msra.mxu1 %v7250_v3 }
 0x9f5   :  { %5125 = vmatprep.subr.bf16.mxu0 %v7258_v19  ;;  %5141 = vmatprep.subr.bf16.mxu1 %v7258_v19  ;;  %v7522_v50 = vpop.permute.xlu0 %3474 }
 0x9f8   :  { %5126 = vmatpush3.bf16.msra.mxu0 %v7258_v19  ;;  %5142 = vmatpush3.bf16.msra.mxu1 %v7258_v19 }
 0x9f9   :  { %5127 = vmatprep.subr.bf16.mxu0 %v7270_v45  ;;  %5143 = vmatprep.subr.bf16.mxu1 %v7270_v45 }
 0x9fc   :  { %5128 = vmatpush3.bf16.msra.mxu0 %v7270_v45  ;;  %5144 = vmatpush3.bf16.msra.mxu1 %v7270_v45 }
 0x9fd   :  { %5129 = vmatprep.subr.bf16.mxu0 %v7278_v46  ;;  %5145 = vmatprep.subr.bf16.mxu1 %v7278_v46 }
 0xa00   :  { %5130 = vmatpush3.bf16.msra.mxu0 %v7278_v46  ;;  %5146 = vmatpush3.bf16.msra.mxu1 %v7278_v46 }
 0xa01   :  { %5151 = vmatprep.subr.bf16.mxu0 %v7224_v43  ;;  %5167 = vmatprep.subr.bf16.mxu1 %v7224_v43 }
 0xa03   :  { %5132 = vmatmul.mubr.msk.bf16.vlgmr.msra.gmra.mrb[84].mxu0 %vm2676_vm6, %v5373_v33  ;;  %5148 = vmatmul.mubr.msk.bf16.vlgmr.msra.gmra.mrb[68].mxu1 %vm2676_vm6, %v5375_v40  ;;  %v7526_v40 = vpop.permute.xlu0 %3460 }
 0xa04   :  { %5152 = vmatpush3.bf16.msra.mxu0 %v7224_v43  ;;  %5168 = vmatpush3.bf16.msra.mxu1 %v7224_v43 }
 0xa05   :  { %5153 = vmatprep.subr.bf16.mxu0 %v7238_v9  ;;  %5169 = vmatprep.subr.bf16.mxu1 %v7238_v9 }
 0xa06   :  { %5163 = vmatprep.mubr.msk.bf16.mxu0 %vm2676_vm6, %v5376_v55  ;;  %5179 = vmatprep.mubr.msk.bf16.mxu1 %vm2676_vm6, %v5378_v13 }
 0xa07   :  { %v7530_v13 = vpop.permute.xlu0 %3484 }
 0xa08   :  { %5154 = vmatpush3.bf16.msra.mxu0 %v7238_v9  ;;  %5170 = vmatpush3.bf16.msra.mxu1 %v7238_v9 }
 0xa09   :  { %5155 = vmatprep.subr.bf16.mxu0 %v7250_v3  ;;  %5171 = vmatprep.subr.bf16.mxu1 %v7250_v3 }
 0xa0c   :  { %5156 = vmatpush3.bf16.msra.mxu0 %v7250_v3  ;;  %5172 = vmatpush3.bf16.msra.mxu1 %v7250_v3 }
 0xa0d   :  { %5157 = vmatprep.subr.bf16.mxu0 %v7258_v19  ;;  %5173 = vmatprep.subr.bf16.mxu1 %v7258_v19 }
 0xa10   :  { %5158 = vmatpush3.bf16.msra.mxu0 %v7258_v19  ;;  %5174 = vmatpush3.bf16.msra.mxu1 %v7258_v19 }
 0xa11   :  { %5159 = vmatprep.subr.bf16.mxu0 %v7270_v45  ;;  %5175 = vmatprep.subr.bf16.mxu1 %v7270_v45 }
 0xa14   :  { %5160 = vmatpush3.bf16.msra.mxu0 %v7270_v45  ;;  %5176 = vmatpush3.bf16.msra.mxu1 %v7270_v45 }
 0xa15   :  { %5161 = vmatprep.subr.bf16.mxu0 %v7278_v46  ;;  %5177 = vmatprep.subr.bf16.mxu1 %v7278_v46 }
 0xa18   :  { %5162 = vmatpush3.bf16.msra.mxu0 %v7278_v46  ;;  %5178 = vmatpush3.bf16.msra.mxu1 %v7278_v46 }
 0xa19   :  { %5183 = vmatprep.subr.bf16.mxu0 %v7224_v43  ;;  %5199 = vmatprep.subr.bf16.mxu1 %v7224_v43 }
 0xa1b   :  { %5164 = vmatmul.mubr.msk.bf16.vlgmr.msra.gmra.mrb[88].mxu0 %vm2676_vm6, %v5377_v58  ;;  %5180 = vmatmul.mubr.msk.bf16.vlgmr.msra.gmra.mrb[72].mxu1 %vm2676_vm6, %v5379_v39 }
 0xa1c   :  { %5184 = vmatpush3.bf16.msra.mxu0 %v7224_v43  ;;  %5200 = vmatpush3.bf16.msra.mxu1 %v7224_v43 }
 0xa1d   :  { %5185 = vmatprep.subr.bf16.mxu0 %v7238_v9  ;;  %5201 = vmatprep.subr.bf16.mxu1 %v7238_v9 }
 0xa1e   :  { %5195 = vmatprep.mubr.msk.bf16.mxu0 %vm2676_vm6, %v5380_v20  ;;  %5211 = vmatprep.mubr.msk.bf16.mxu1 %vm2676_vm6, %v5382_v4 }
 0xa20   :  { %5186 = vmatpush3.bf16.msra.mxu0 %v7238_v9  ;;  %5202 = vmatpush3.bf16.msra.mxu1 %v7238_v9 }
 0xa21   :  { %5187 = vmatprep.subr.bf16.mxu0 %v7250_v3  ;;  %5203 = vmatprep.subr.bf16.mxu1 %v7250_v3 }
 0xa24   :  { %5188 = vmatpush3.bf16.msra.mxu0 %v7250_v3  ;;  %5204 = vmatpush3.bf16.msra.mxu1 %v7250_v3 }
 0xa25   :  { %5189 = vmatprep.subr.bf16.mxu0 %v7258_v19  ;;  %5205 = vmatprep.subr.bf16.mxu1 %v7258_v19 }
 0xa28   :  { %5190 = vmatpush3.bf16.msra.mxu0 %v7258_v19  ;;  %5206 = vmatpush3.bf16.msra.mxu1 %v7258_v19 }
 0xa29   :  { %5191 = vmatprep.subr.bf16.mxu0 %v7270_v45  ;;  %5207 = vmatprep.subr.bf16.mxu1 %v7270_v45 }
 0xa2c   :  { %5192 = vmatpush3.bf16.msra.mxu0 %v7270_v45  ;;  %5208 = vmatpush3.bf16.msra.mxu1 %v7270_v45 }
 0xa2d   :  { %5193 = vmatprep.subr.bf16.mxu0 %v7278_v46  ;;  %5209 = vmatprep.subr.bf16.mxu1 %v7278_v46 }
 0xa30   :  { %5194 = vmatpush3.bf16.msra.mxu0 %v7278_v46  ;;  %5210 = vmatpush3.bf16.msra.mxu1 %v7278_v46 }
 0xa31   :  { %5215 = vmatprep.subr.bf16.mxu0 %v7224_v43 }
 0xa33   :  { %5196 = vmatmul.mubr.msk.bf16.vlgmr.msra.gmra.mrb[92].mxu0 %vm2676_vm6, %v5381_v18  ;;  %5212 = vmatmul.mubr.msk.bf16.vlgmr.msra.gmra.mrb[76].mxu1 %vm2676_vm6, %v5383_v5 }
 0xa34   :  { %5216 = vmatpush3.bf16.msra.mxu0 %v7224_v43  ;;  %5227 = vmatprep.mubr.msk.bf16.mxu0 %vm2676_vm6, %v5384_v60 }
 0xa35   :  { %5217 = vmatprep.subr.bf16.mxu0 %v7238_v9  ;;  %5239 = vmatprep.mubr.msk.bf16.mxu1 %vm55_vm0, %v5386_v0 }
 0xa38   :  { %5218 = vmatpush3.bf16.msra.mxu0 %v7238_v9 }
 0xa39   :  { %5219 = vmatprep.subr.bf16.mxu0 %v7250_v3 }
 0xa3c   :  { %5220 = vmatpush3.bf16.msra.mxu0 %v7250_v3  ;;  %v4568_v3 = vld [vmem:[%s7907_s3 + $0x38] sm:$0xff] }
 0xa3d   :  { %5221 = vmatprep.subr.bf16.mxu0 %v7258_v19 }
 0xa40   :  { %5222 = vmatpush3.bf16.msra.mxu0 %v7258_v19  ;;  %v7492_v19 = vpop.permute.xlu1 %3445 }
 0xa41   :  { %5223 = vmatprep.subr.bf16.mxu0 %v7270_v45 }
 0xa44   :  { %5224 = vmatpush3.bf16.msra.mxu0 %v7270_v45  ;;  %v3539_v45 = vld [vmem:[%s7908_s13 + $0x18] sm:$0xff]  ;;  %v7512_v41 = vpop.permute.xlu1 %3469 }
 0xa45   :  { %5225 = vmatprep.subr.bf16.mxu0 %v7278_v46 }
 0xa48   :  { %5226 = vmatpush3.bf16.msra.mxu0 %v7278_v46  ;;  %v5387_v46 = vld [vmem:[%s7910_s10 + $0x40] sm:$0xff]   ;;  %v7524_v33 = vpop.permute.xlu1 %3455 }
 0xa4b   :  { %5228 = vmatmul.mubr.msk.bf16.vlgmr.msra.gmra.mrb[96].mxu0 %vm2676_vm6, %v5385_v21 }
 0xa4c   :  { %5251 = vmatprep.mubr.msk.bf16.mxu0 %vm55_vm0, %v5387_v46  ;;  %v7528_v55 = vpop.permute.xlu1 %3479 }
 0xabe   :  { %v5101_v17 = vpop.f32.mrb[80].mxu0  ;;  %v7434_v24 = vpop.f32.mrb[64].mxu1 }
 0xabf   :  { %2736 = vrot.lane.b32.xlu1 %v5101_v17, %s5705_s24  ;;  %v2717_v27 = vpop.f32.mrb[81].mxu0  ;;  %v7437_v15 = vpop.f32.mrb[65].mxu1 }
 0xac0   :  { %v5102_v44 = vpop.f32.mrb[82].mxu0  ;;  %v7439_v23 = vpop.f32.mrb[66].mxu1 }
 0xac1   :  { %2738 = vrot.lane.b32.xlu0 %v5102_v44, %s5705_s24  ;;  %v2720_v2 = vpop.f32.mrb[83].mxu0  ;;  %v7442_v6 = vpop.f32.mrb[67].mxu1 }
 0xac3   :  { %2732 = vrot.lane.b32.xlu1 %v2717_v27, %s5705_s24 }
 0xac5   :  { %2734 = vrot.lane.b32.xlu0 %v2720_v2, %s5705_s24 }
 0xad6   :  { %v5133_v52 = vpop.f32.mrb[84].mxu0  ;;  %v5149_v49 = vpop.f32.mrb[68].mxu1 }
 0xad7   :  { %2887 = vrot.lane.b32.xlu1 %v5133_v52, %s5706_s9  ;;  %v2868_v57 = vpop.f32.mrb[85].mxu0  ;;  %v2958_v54 = vpop.f32.mrb[69].mxu1 }
 0xad8   :  { %v5134_v1 = vpop.f32.mrb[86].mxu0  ;;  %v5150_v12 = vpop.f32.mrb[70].mxu1 }
 0xad9   :  { %2889 = vrot.lane.b32.xlu0 %v5134_v1, %s5706_s9  ;;  %v2871_v22 = vpop.f32.mrb[87].mxu0  ;;  %v2961_v10 = vpop.f32.mrb[71].mxu1 }
 0xadb   :  { %2977 = vrot.lane.b32.xlu1 %v5149_v49, %s5707_s8 }
 0xadd   :  { %2979 = vrot.lane.b32.xlu0 %v5150_v12, %s5707_s8 }
 0xadf   :  { %2883 = vrot.lane.b32.xlu1 %v2868_v57, %s5706_s9 }
 0xae1   :  { %2885 = vrot.lane.b32.xlu0 %v2871_v22, %s5706_s9  ;;  %v2740_v22 = vlaneseq }
 0xae3   :  { %2973 = vrot.lane.b32.xlu1 %v2958_v54, %s5707_s8 }
 0xae5   :  { %2975 = vrot.lane.b32.xlu0 %v2961_v10, %s5707_s8 }
 0xaee   :  { %v5165_v31 = vpop.f32.mrb[88].mxu0  ;;  %v5181_v42 = vpop.f32.mrb[72].mxu1 }
 0xaef   :  { %3067 = vrot.lane.b32.xlu1 %v5165_v31, %s5708_s25  ;;  %v3048_v48 = vpop.f32.mrb[89].mxu0  ;;  %v3138_v11 = vpop.f32.mrb[73].mxu1 }
 0xaf0   :  { %v5166_v16 = vpop.f32.mrb[90].mxu0  ;;  %v5182_v8 = vpop.f32.mrb[74].mxu1 }
 0xaf1   :  { %3069 = vrot.lane.b32.xlu0 %v5166_v16, %s5708_s25  ;;  %v3051_v38 = vpop.f32.mrb[91].mxu0  ;;  %v3141_v35 = vpop.f32.mrb[75].mxu1 }
 0xaf3   :  { %3157 = vrot.lane.b32.xlu1 %v5181_v42, %s5709_s26  ;;  %v2741_v42 = vshrl.u32 %v2740_v22, 7 }
 0xaf5   :  { %3159 = vrot.lane.b32.xlu0 %v5182_v8, %s5709_s26  ;;  %v2742_v16 = vsub.s32 0, %v2741_v42  ;;  %v2647_v8 = vld [vmem:[%s7911_s4] sm:$0xff] }
 0xaf7   :  { %3063 = vrot.lane.b32.xlu1 %v3048_v48, %s5708_s25 }
 0xaf9   :  { %3065 = vrot.lane.b32.xlu0 %v3051_v38, %s5708_s25  ;;  %v2893_v38 = vsub.s32 1, %v2741_v42 }
 0xafb   :  { %3153 = vrot.lane.b32.xlu1 %v3138_v11, %s5709_s26 }
 0xafd   :  { %3155 = vrot.lane.b32.xlu0 %v3141_v35, %s5709_s26 }
 0xb06   :  { %v5197_v7 = vpop.f32.mrb[92].mxu0  ;;  %v5213_v47 = vpop.f32.mrb[76].mxu1 }
 0xb07   :  { %3247 = vrot.lane.b32.xlu1 %v5197_v7, %s5710_s27  ;;  %v3228_v61 = vpop.f32.mrb[93].mxu0  ;;  %v3318_v51 = vpop.f32.mrb[77].mxu1  ;;  %v7543_v7 = vrot.slane %v2647_v8, %v2742_v16 }
 0xb08   :  { %v5198_v29 = vpop.f32.mrb[94].mxu0  ;;  %v5214_v26 = vpop.f32.mrb[78].mxu1 }
 0xb09   :  { %3249 = vrot.lane.b32.xlu0 %v5198_v29, %s5710_s27  ;;  %v3231_v53 = vpop.f32.mrb[95].mxu0  ;;  %v3321_v56 = vpop.f32.mrb[79].mxu1  ;;  %v7548_v29 = vrot.slane %v2647_v8, %v2893_v38 }
 0xb0b   :  { %3337 = vrot.lane.b32.xlu1 %v5213_v47, %s5711_s6  ;;  %v2983_v47 = vsub.s32 2, %v2741_v42 }
 0xb0d   :  { %3339 = vrot.lane.b32.xlu0 %v5214_v26, %s5711_s6  ;;  %v3073_v26 = vsub.s32 3, %v2741_v42 }
 0xb0f   :  { %3243 = vrot.lane.b32.xlu1 %v3228_v61, %s5710_s27 }
 0xb11   :  { %3245 = vrot.lane.b32.xlu0 %v3231_v53, %s5710_s27  ;;  %v3163_v53 = vsub.s32 5, %v2741_v42 }
 0xb13   :  { %3333 = vrot.lane.b32.xlu1 %v3318_v51, %s5711_s6  ;;  %v7562_v0 = vrot.slane %v2647_v8, %v3163_v53 }
 0xb15   :  { %3335 = vrot.lane.b32.xlu0 %v3321_v56, %s5711_s6  ;;  %v3253_v56 = vsub.s32 6, %v2741_v42 }
 0xb17   :  { %v7564_v46 = vrot.slane %v2647_v8, %v3253_v56 }
 0xb1e   :  { %v5229_v43 = vpop.f32.mrb[96].mxu0 }
 0xb1f   :  { %v3408_v63 = vpop.f32.mrb[97].mxu0 }
 0xb20   :  { %3423 = vrot.lane.b32.xlu1 %v3408_v63, %s5712_s28  ;;  %v5230_v14 = vpop.f32.mrb[98].mxu0  ;;  %v7551_v63 = vrot.slane %v2647_v8, %v2983_v47 }
 0xb21   :  { %v3411_v9 = vpop.f32.mrb[99].mxu0 }
 0xb22   :  { %3425 = vrot.lane.b32.xlu0 %v3411_v9, %s5712_s28 }
 0xb24   :  { %3427 = vrot.lane.b32.xlu1 %v5229_v43, %s5712_s28 }
 0xb26   :  { %3429 = vrot.lane.b32.xlu0 %v5230_v14, %s5712_s28 }
 0xb28   :  { %3508 = vrot.lane.b32.xlu1 %v4565_v25, %s5704_s7  ;;  %v3343_v25 = vsub.s32 7, %v2741_v42 }
 0xb2a   :  { %3510 = vrot.lane.b32.xlu0 %v4566_v30, %s5704_s7 }
 0xb2c   :  { %3512 = vrot.lane.b32.xlu1 %v4567_v28, %s5704_s7 }
 0xb2e   :  { %3514 = vrot.lane.b32.xlu0 %v4568_v3, %s5704_s7 }
 0xb30   :  { %4299 = vperm.xlu1 %5358, %v3536_v32  }
 0xb31   :  { %v2737_v58 = vpop.permute.xlu1 %2736 }
 0xb32   :  { %4304 = vperm.xlu0 %5357, %v3537_v37   ;;  %v2746_v9 = vmul.f32 %v7543_v7, %v2737_v58  ;;  %v7558_v37 = vrot.slane %v2647_v8, %v3073_v26 }
 0xb33   :  { %v2739_v39 = vpop.permute.xlu0 %2738 }
 0xb34   :  { %4309 = vperm.xlu1 %5358, %v3538_v59   ;;  %v2747_v59 = vmul.f32 %v7543_v7, %v2739_v39 }
 0xb35   :  { %v2733_v20 = vpop.permute.xlu1 %2732 }
 0xb36   :  { %4314 = vperm.xlu0 %5357, %v3539_v45   ;;  %v2744_v51 = vmul.f32 %v7543_v7, %v2733_v20 }
 0xb37   :  { %v2735_v4 = vpop.permute.xlu0 %2734 }
 0xb38   :  { %4323 = vperm.xlu1 %5358, %v3540_v34   ;;  %v2745_v43 = vmul.f32 %v7543_v7, %v2735_v4  ;;  %v2799_v28 = vadd.f32 %v7437_v15, %v2744_v51  ;;  %v2807_v4 = vadd.f32 %v7434_v24, %v2746_v9 }
 0xb3a   :  { %4328 = vperm.xlu0 %5357, %v3541_v36   ;;  %v2802_v36 = vadd.f32 %v7442_v6, %v2745_v43  ;;  %v2810_v6 = vadd.f32 %v7439_v23, %v2747_v59 }
 0xb49   :  { %v2888_v18 = vpop.permute.xlu1 %2887 }
 0xb4a   :  { %v2897_v45 = vmul.f32 %v7548_v29, %v2888_v18 }
 0xb4b   :  { %v2890_v5 = vpop.permute.xlu0 %2889 }
 0xb4c   :  { %v2901_v16 = vadd.f32 %v2897_v45, %v2807_v4 }
 0xb4d   :  { %v2978_v60 = vpop.permute.xlu1 %2977 }
 0xb4e   :  { %v2987_v39 = vmul.f32 %v7551_v63, %v2978_v60 }
 0xb4f   :  { %v2980_v21 = vpop.permute.xlu0 %2979 }
 0xb50   :  { %v2991_v51 = vadd.f32 %v2987_v39, %v2901_v16 }
 0xb51   :  { %v2884_v17 = vpop.permute.xlu1 %2883 }
 0xb52   :  { %v2895_v14 = vmul.f32 %v7548_v29, %v2884_v17  ;;  %v2898_v17 = vmul.f32 %v7548_v29, %v2890_v5 }
 0xb53   :  { %v2886_v27 = vpop.permute.xlu0 %2885 }
 0xb54   :  { %v2896_v3 = vmul.f32 %v7548_v29, %v2886_v27  ;;  %v2899_v58 = vadd.f32 %v2895_v14, %v2799_v28  ;;  %v7572_v27 = vrot.slane %v2647_v8, %v3343_v25  ;;  %v2902_v47 = vadd.f32 %v2898_v17, %v2810_v6  ;;  %v7590_v14 = vld [vmem:[%s7911_s4 + $0x8] ss:$0 sm:$0xff] }
 0xb55   :  { %v2974_v44 = vpop.permute.xlu1 %2973 }
 0xb56   :  { %v2985_v32 = vmul.f32 %v7551_v63, %v2974_v44  ;;  %v2900_v18 = vadd.f32 %v2896_v3, %v2802_v36 }
 0xb57   :  { %v2976_v2 = vpop.permute.xlu0 %2975 }
 0xb58   :  { %v2986_v15 = vmul.f32 %v7551_v63, %v2976_v2  ;;  %v2989_v44 = vadd.f32 %v2985_v32, %v2899_v58  ;;  %v2988_v2 = vmul.f32 %v7551_v63, %v2980_v21 }
 0xb5a   :  { %v2990_v38 = vadd.f32 %v2986_v15, %v2900_v18  ;;  %v2992_v56 = vadd.f32 %v2988_v2, %v2902_v47 }
 0xb61   :  { %v3068_v52 = vpop.permute.xlu1 %3067 }
 0xb63   :  { %v3070_v49 = vpop.permute.xlu0 %3069 }
 0xb65   :  { %v3158_v57 = vpop.permute.xlu1 %3157 }
 0xb67   :  { %v7532_v54 = vpop.permute.xlu0 %3159 }
 0xb69   :  { %v3064_v1 = vpop.permute.xlu1 %3063 }
 0xb6a   :  { %v3075_v20 = vmul.f32 %v7558_v37, %v3064_v1  ;;  %v3077_v1 = vmul.f32 %v7558_v37, %v3068_v52 }
 0xb6b   :  { %v3066_v12 = vpop.permute.xlu0 %3065 }
 0xb6c   :  { %v3076_v22 = vmul.f32 %v7558_v37, %v3066_v12  ;;  %v3079_v5 = vadd.f32 %v3075_v20, %v2989_v44  ;;  %v3078_v12 = vmul.f32 %v7558_v37, %v3070_v49  ;;  %v3081_v43 = vadd.f32 %v3077_v1, %v2991_v51 }
 0xb6d   :  { %v3154_v10 = vpop.permute.xlu1 %3153 }
 0xb6e   :  { %v3165_v42 = vmul.f32 %v7562_v0, %v3154_v10  ;;  %v3167_v10 = vmul.f32 %v7562_v0, %v3158_v57  ;;  %v3080_v23 = vadd.f32 %v3076_v22, %v2990_v38 }
 0xb6f   :  { %v3156_v31 = vpop.permute.xlu0 %3155 }
 0xb70   :  { %v3166_v60 = vmul.f32 %v7562_v0, %v3156_v31  ;;  %v3169_v53 = vadd.f32 %v3165_v42, %v3079_v5  ;;  %v3168_v31 = vmul.f32 %v7562_v0, %v7532_v54  ;;  %v3171_v28 = vadd.f32 %v3167_v10, %v3081_v43  ;;  %v3497_v10 = vld [vmem:[%s7907_s3 + $0x10] sm:$0xff] }
 0xb72   :  { %v3170_v49 = vadd.f32 %v3166_v60, %v3080_v23 }
 0xb79   :  { %v7534_v48 = vpop.permute.xlu1 %3247 }
 0xb7a   :  { %v3257_v57 = vmul.f32 %v7564_v46, %v7534_v48 }
 0xb7b   :  { %v7536_v11 = vpop.permute.xlu0 %3249 }
 0xb7c   :  { %v3258_v3 = vmul.f32 %v7564_v46, %v7536_v11  ;;  %v3261_v15 = vadd.f32 %v3257_v57, %v3171_v28 }
 0xb7d   :  { %v7541_v35 = vpop.permute.xlu1 %3337 }
 0xb7e   :  { %v3347_v54 = vmul.f32 %v7572_v27, %v7541_v35 }
 0xb7f   :  { %v7545_v61 = vpop.permute.xlu0 %3339 }
 0xb80   :  { %v3348_v48 = vmul.f32 %v7572_v27, %v7545_v61  ;;  %v3351_v18 = vadd.f32 %v3347_v54, %v3261_v15  ;;  %v5394_v15 = vld [vmem:[%s7910_s10 + $0x30] sm:$0xff]  }
 0xb81   :  { %v3244_v30 = vpop.permute.xlu1 %3243 }
 0xb82   :  { %v3255_v8 = vmul.f32 %v7564_v46, %v3244_v30  ;;  %v3082_v30 = vadd.f32 %v3078_v12, %v2992_v56 }
 0xb83   :  { %v3246_v34 = vpop.permute.xlu0 %3245 }
 0xb84   :  { %v3256_v21 = vmul.f32 %v7564_v46, %v3246_v34  ;;  %v3259_v9 = vadd.f32 %v3255_v8, %v3169_v53  ;;  %v3172_v36 = vadd.f32 %v3168_v31, %v3082_v30 }
 0xb85   :  { %v3334_v24 = vpop.permute.xlu1 %3333 }
 0xb86   :  { %v3345_v52 = vmul.f32 %v7572_v27, %v3334_v24  ;;  %v3260_v59 = vadd.f32 %v3256_v21, %v3170_v49  ;;  %v3262_v39 = vadd.f32 %v3258_v3, %v3172_v36  ;;  %v3495_v24 = vld [vmem:[%s7907_s3] sm:$0xff] }
 0xb87   :  { %v3336_v26 = vpop.permute.xlu0 %3335  ;;  %v5392_v36 = vld [vmem:[%s7910_s10 + $0x20] sm:$0xff]  }
 0xb88   :  { %v3346_v25 = vmul.f32 %v7572_v27, %v3336_v26  ;;  %v3349_v45 = vadd.f32 %v3345_v52, %v3259_v9  ;;  %v3352_v42 = vadd.f32 %v3348_v48, %v3262_v39  ;;  %v5391_v48 = vld [vmem:[%s7910_s10 + $0x18] sm:$0xff]   ;;  %v5398_v39 = vld [vmem:[%s7910_s10 + $0x60] sm:$0xff]  }
 0xb8a   :  { %v3350_v20 = vadd.f32 %v3346_v25, %v3260_v59  ;;  %v5388_v59 = vld [vmem:[%s7910_s10 + $0x8] sm:$0xff]  }
 0xb92   :  { %v3424_v32 = vpop.permute.xlu1 %3423 }
 0xb93   :  { %v3435_v34 = vmul.f32 %v7590_v14, %v3424_v32 }
 0xb94   :  { %v3426_v58 = vpop.permute.xlu0 %3425 }
 0xb95   :  { %v3439_v4 = vadd.f32 %v3435_v34, %v3349_v45  ;;  %v3436_v17 = vmul.f32 %v7590_v14, %v3426_v58  ;;  %v5389_v45 = vld [vmem:[%s7910_s10 + $0x48] sm:$0xff]   ;;  %v5390_v34 = vld [vmem:[%s7910_s10 + $0x10] sm:$0xff]  }
 0xb96   :  { %v3428_v11 = vpop.permute.xlu1 %3427  ;;  %v5393_v58 = vld [vmem:[%s7910_s10 + $0x28] sm:$0xff]  }
 0xb97   :  { %v3463_v44 = vmul.f32 %v7492_v19, %v3439_v4  ;;  %v3440_v35 = vadd.f32 %v3436_v17, %v3350_v20  ;;  %v3437_v22 = vmul.f32 %v7590_v14, %v3428_v11  ;;  %v3496_v19 = vld [vmem:[%s7907_s3 + $0x8] sm:$0xff]  ;;  %v5396_v20 = vld [vmem:[%s7910_s10 + $0x50] sm:$0xff]   ;;  %v5395_v4 = vld [vmem:[%s7910_s10 + $0x38] sm:$0xff]  }
 0xb98   :  { %v3430_v6 = vpop.permute.xlu0 %3429  ;;  %v5397_v17 = vld [vmem:[%s7910_s10 + $0x58] sm:$0xff]   ;;  %v5400_v11 = vld [vmem:[%s7910_s10 + $0x70] sm:$0xff]  }
 0xb99   :  { %v3464_v16 = vmul.f32 %v7498_v62, %v3440_v35  ;;  %v3441_v2 = vadd.f32 %v3437_v22, %v3351_v18  ;;  %v3438_v61 = vmul.f32 %v7590_v14, %v3430_v6  ;;  %v3487_v1 = vadd.f32 %v7512_v41, %v3463_v44  ;;  %v5399_v18 = vld [vmem:[%s7910_s10 + $0x68] sm:$0xff]   ;;  %v5401_v44 = vld [vmem:[%s7910_s10 + $0x78] sm:$0xff]   ;;  %v5402_v35 = vld [vmem:[%s7910_s10 + $0x80] sm:$0xff]  }
 0xb9a   :  { %v3509_v38 = vpop.permute.xlu1 %3508  ;;  %v5403_v22 = vld [vmem:[%s7910_s10 + $0x88] sm:$0xff]  }
 0xb9b   :  { %v3465_v5 = vmul.f32 %v7524_v33, %v3441_v2  ;;  %v3442_v60 = vadd.f32 %v3438_v61, %v3352_v42  ;;  %v3491_v8 = vmax.f32 %v3487_v1, 0.0  ;;  %v3520_v62 = vsel %vm55_vm0, %v3495_v24, %v3509_v38  ;;  %v3498_v33 = vld [vmem:[%s7907_s3 + $0x18] sm:$0xff] }
 0xb9c   :  { %v3488_v47 = vadd.f32 %v7522_v50, %v3464_v16  ;;  %v3511_v51 = vpop.permute.xlu0 %3510 }
 0xb9d   :  { %v3466_v41 = vmul.f32 %v7526_v40, %v3442_v60  ;;  %v3521_v12 = vsel %vm55_vm0, %v3496_v19, %v3511_v51  ;;  %v3489_v23 = vadd.f32 %v7528_v55, %v3465_v5  ;;  %v3524_v21 = vmul.f32 %v3520_v62, %v3491_v8 }
 0xb9e   :  { %v3492_v26 = vmax.f32 %v3488_v47, 0.0  ;;  %v3513_v53 = vpop.permute.xlu1 %3512  ;;  %v3528_v52 = vadd.f32 %v3520_v62, %v3491_v8 }
 0xb9f   :  { %v3490_v50 = vadd.f32 %v7530_v13, %v3466_v41  ;;  %v3493_v43 = vmax.f32 %v3489_v23, 0.0  ;;  %v3522_v31 = vsel %vm55_vm0, %v3497_v10, %v3513_v53 }
 0xba0   :  { %v3525_v56 = vmul.f32 %v3521_v12, %v3492_v26  ;;  %v3529_v40 = vadd.f32 %v3521_v12, %v3492_v26  ;;  %v3515_v49 = vpop.permute.xlu0 %3514 }
 0xba1   :  { %v3494_v57 = vmax.f32 %v3490_v50, 0.0  ;;  %v3523_v9 = vsel %vm55_vm0, %v3498_v33, %v3515_v49  ;;  %v3526_v30 = vmul.f32 %v3522_v31, %v3493_v43  ;;  %v3530_v28 = vadd.f32 %v3522_v31, %v3493_v43 }
 0xba2   :  { %v7629_v25 = vpack.c.bf16 %v3525_v56, %v3524_v21  ;;  %v7631_v55 = vpack.c.bf16 %v3529_v40, %v3528_v52 }
 0xba3   :  { %v3527_v3 = vmul.f32 %v3523_v9, %v3494_v57  ;;  %v3531_v32 = vadd.f32 %v3523_v9, %v3494_v57 }
 0xba4   :  { %5231 = vmatprep.subr.bf16.mxu1 %v7629_v25  ;;  %5243 = vmatprep.subr.bf16.mxu0 %v7629_v25 }
 0xba5   :  { %v7635_v13 = vpack.c.bf16 %v3527_v3, %v3526_v30  ;;  %v7637_v54 = vpack.c.bf16 %v3531_v32, %v3530_v28  ;;  %5232 = vmatpush3.bf16.msra.mxu1 %v7629_v25  ;;  %5244 = vmatpush3.bf16.msra.mxu0 %v7629_v25  ;;  %v3542_v3 = vld [vmem:[%s7909_s14 + $0x10] sm:$0xff]  ;;  %v3543_v32 = vld [vmem:[%s7909_s14 + $0x18] sm:$0xff] }
 0xba7   :  { %5233 = vmatprep.subr.bf16.mxu1 %v7635_v13  ;;  %5245 = vmatprep.subr.bf16.mxu0 %v7635_v13 }
 0xba9   :  { %5234 = vmatpush3.bf16.msra.mxu1 %v7635_v13  ;;  %5246 = vmatpush3.bf16.msra.mxu0 %v7635_v13 }
 0xbaa   :  { %5235 = vmatprep.subr.bf16.mxu1 %v7631_v55  ;;  %5247 = vmatprep.subr.bf16.mxu0 %v7631_v55 }
 0xbad   :  { %5236 = vmatpush3.bf16.msra.mxu1 %v7631_v55  ;;  %5248 = vmatpush3.bf16.msra.mxu0 %v7631_v55 }
 0xbae   :  { %5237 = vmatprep.subr.bf16.mxu1 %v7637_v54  ;;  %5249 = vmatprep.subr.bf16.mxu0 %v7637_v54 }
 0xbb1   :  { %5238 = vmatpush3.bf16.msra.mxu1 %v7637_v54  ;;  %5250 = vmatpush3.bf16.msra.mxu0 %v7637_v54 }
 0xbb2   :  { %5255 = vmatprep.subr.bf16.mxu1 %v7629_v25  ;;  %5267 = vmatprep.subr.bf16.mxu0 %v7629_v25 }
 0xbb4   :  { %5240 = vmatmul.mubr.msk.bf16.vlgmr.msra.gmra.mrb[80].mxu1 %vm55_vm0, %v5388_v59  ;;  %5252 = vmatmul.mubr.msk.bf16.vlgmr.msra.gmra.mrb[100].mxu0 %vm55_vm0, %v5389_v45 }
 0xbb5   :  { %5256 = vmatpush3.bf16.msra.mxu1 %v7629_v25  ;;  %5268 = vmatpush3.bf16.msra.mxu0 %v7629_v25 }
 0xbb6   :  { %5257 = vmatprep.subr.bf16.mxu1 %v7635_v13  ;;  %5269 = vmatprep.subr.bf16.mxu0 %v7635_v13 }
 0xbb7   :  { %5263 = vmatprep.mubr.msk.bf16.mxu1 %vm55_vm0, %v5390_v34  ;;  %5275 = vmatprep.mubr.msk.bf16.mxu0 %vm55_vm0, %v5392_v36 }
 0xbb9   :  { %5258 = vmatpush3.bf16.msra.mxu1 %v7635_v13  ;;  %5270 = vmatpush3.bf16.msra.mxu0 %v7635_v13 }
 0xbba   :  { %5259 = vmatprep.subr.bf16.mxu1 %v7631_v55  ;;  %5271 = vmatprep.subr.bf16.mxu0 %v7631_v55 }
 0xbbd   :  { %5260 = vmatpush3.bf16.msra.mxu1 %v7631_v55  ;;  %5272 = vmatpush3.bf16.msra.mxu0 %v7631_v55 }
 0xbbe   :  { %5261 = vmatprep.subr.bf16.mxu1 %v7637_v54  ;;  %5273 = vmatprep.subr.bf16.mxu0 %v7637_v54 }
 0xbc1   :  { %5262 = vmatpush3.bf16.msra.mxu1 %v7637_v54  ;;  %5274 = vmatpush3.bf16.msra.mxu0 %v7637_v54 }
 0xbc2   :  { %5279 = vmatprep.subr.bf16.mxu1 %v7629_v25  ;;  %5291 = vmatprep.subr.bf16.mxu0 %v7629_v25 }
 0xbc4   :  { %5264 = vmatmul.mubr.msk.bf16.vlgmr.msra.gmra.mrb[84].mxu1 %vm55_vm0, %v5391_v48  ;;  %5276 = vmatmul.mubr.msk.bf16.vlgmr.msra.gmra.mrb[104].mxu0 %vm55_vm0, %v5393_v58 }
 0xbc5   :  { %5280 = vmatpush3.bf16.msra.mxu1 %v7629_v25  ;;  %5292 = vmatpush3.bf16.msra.mxu0 %v7629_v25 }
 0xbc6   :  { %5281 = vmatprep.subr.bf16.mxu1 %v7635_v13  ;;  %5293 = vmatprep.subr.bf16.mxu0 %v7635_v13 }
 0xbc7   :  { %5287 = vmatprep.mubr.msk.bf16.mxu1 %vm55_vm0, %v5394_v15  ;;  %5299 = vmatprep.mubr.msk.bf16.mxu0 %vm55_vm0, %v5396_v20 }
 0xbc9   :  { %5282 = vmatpush3.bf16.msra.mxu1 %v7635_v13  ;;  %5294 = vmatpush3.bf16.msra.mxu0 %v7635_v13 }
 0xbca   :  { %5283 = vmatprep.subr.bf16.mxu1 %v7631_v55  ;;  %5295 = vmatprep.subr.bf16.mxu0 %v7631_v55 }
 0xbcd   :  { %5284 = vmatpush3.bf16.msra.mxu1 %v7631_v55  ;;  %5296 = vmatpush3.bf16.msra.mxu0 %v7631_v55 }
 0xbce   :  { %5285 = vmatprep.subr.bf16.mxu1 %v7637_v54  ;;  %5297 = vmatprep.subr.bf16.mxu0 %v7637_v54 }
 0xbd1   :  { %5286 = vmatpush3.bf16.msra.mxu1 %v7637_v54  ;;  %5298 = vmatpush3.bf16.msra.mxu0 %v7637_v54 }
 0xbd2   :  { %5303 = vmatprep.subr.bf16.mxu1 %v7629_v25  ;;  %5315 = vmatprep.subr.bf16.mxu0 %v7629_v25 }
 0xbd4   :  { %5288 = vmatmul.mubr.msk.bf16.vlgmr.msra.gmra.mrb[88].mxu1 %vm55_vm0, %v5395_v4  ;;  %5300 = vmatmul.mubr.msk.bf16.vlgmr.msra.gmra.mrb[108].mxu0 %vm55_vm0, %v5397_v17 }
 0xbd5   :  { %5304 = vmatpush3.bf16.msra.mxu1 %v7629_v25  ;;  %5316 = vmatpush3.bf16.msra.mxu0 %v7629_v25 }
 0xbd6   :  { %5305 = vmatprep.subr.bf16.mxu1 %v7635_v13  ;;  %5317 = vmatprep.subr.bf16.mxu0 %v7635_v13 }
 0xbd7   :  { %5311 = vmatprep.mubr.msk.bf16.mxu1 %vm55_vm0, %v5398_v39  ;;  %5323 = vmatprep.mubr.msk.bf16.mxu0 %vm55_vm0, %v5400_v11 }
 0xbd9   :  { %5306 = vmatpush3.bf16.msra.mxu1 %v7635_v13  ;;  %5318 = vmatpush3.bf16.msra.mxu0 %v7635_v13 }
 0xbda   :  { %5307 = vmatprep.subr.bf16.mxu1 %v7631_v55  ;;  %5319 = vmatprep.subr.bf16.mxu0 %v7631_v55 }
 0xbdd   :  { %5308 = vmatpush3.bf16.msra.mxu1 %v7631_v55  ;;  %5320 = vmatpush3.bf16.msra.mxu0 %v7631_v55 }
 0xbde   :  { %5309 = vmatprep.subr.bf16.mxu1 %v7637_v54  ;;  %5321 = vmatprep.subr.bf16.mxu0 %v7637_v54 }
 0xbe1   :  { %5310 = vmatpush3.bf16.msra.mxu1 %v7637_v54  ;;  %5322 = vmatpush3.bf16.msra.mxu0 %v7637_v54 }
 0xbe2   :  { %5327 = vmatprep.subr.bf16.mxu1 %v7629_v25 }
 0xbe4   :  { %5312 = vmatmul.mubr.msk.bf16.vlgmr.msra.gmra.mrb[92].mxu1 %vm55_vm0, %v5399_v18  ;;  %5324 = vmatmul.mubr.msk.bf16.vlgmr.msra.gmra.mrb[112].mxu0 %vm55_vm0, %v5401_v44 }
 0xbe5   :  { %5328 = vmatpush3.bf16.msra.mxu1 %v7629_v25  ;;  %5335 = vmatprep.mubr.msk.bf16.mxu1 %vm55_vm0, %v5402_v35 }
 0xbe6   :  { %5329 = vmatprep.subr.bf16.mxu1 %v7635_v13 }
 0xbe9   :  { %5330 = vmatpush3.bf16.msra.mxu1 %v7635_v13  ;;  %v7819_v13 = vpop.permute.xlu1 %4299 }
 0xbea   :  { %5331 = vmatprep.subr.bf16.mxu1 %v7631_v55 }
 0xbed   :  { %5332 = vmatpush3.bf16.msra.mxu1 %v7631_v55  ;;  %v7823_v59 = vpop.permute.xlu1 %4309 }
 0xbee   :  { %5333 = vmatprep.subr.bf16.mxu1 %v7637_v54 }
 0xbf1   :  { %5334 = vmatpush3.bf16.msra.mxu1 %v7637_v54  ;;  %v7821_v54 = vpop.permute.xlu0 %4304  ;;  %v7827_v34 = vpop.permute.xlu1 %4323 }
 0xbf4   :  { %5336 = vmatmul.mubr.msk.bf16.vlgmr.msra.gmra.mrb[96].mxu1 %vm55_vm0, %v5403_v22 }
 0xbf5   :  { %v7825_v45 = vpop.permute.xlu0 %4314 }
 0xbf9   :  { %v7829_v36 = vpop.permute.xlu0 %4328 }
 0xc87   :  { %v5241_v42 = vpop.f32.mrb[80].mxu1  ;;  %v7773_v6 = vpop.f32.mrb[100].mxu0 }
 0xc88   :  { %3622 = vrot.lane.b32.xlu1 %v5241_v42, %s5705_s24  ;;  %v3603_v16 = vpop.f32.mrb[81].mxu1  ;;  %v7776_v2 = vpop.f32.mrb[101].mxu0 }
 0xc89   :  { %v5242_v61 = vpop.f32.mrb[82].mxu1  ;;  %v7778_v1 = vpop.f32.mrb[102].mxu0 }
 0xc8a   :  { %3624 = vrot.lane.b32.xlu0 %v5242_v61, %s5705_s24  ;;  %v3606_v24 = vpop.f32.mrb[83].mxu1  ;;  %v7781_v38 = vpop.f32.mrb[103].mxu0 }
 0xc8c   :  { %3618 = vrot.lane.b32.xlu1 %v3603_v16, %s5705_s24 }
 0xc8e   :  { %3620 = vrot.lane.b32.xlu0 %v3606_v24, %s5705_s24 }
 0xc97   :  { %v5265_v19 = vpop.f32.mrb[84].mxu1  ;;  %v5277_v5 = vpop.f32.mrb[104].mxu0 }
 0xc98   :  { %3769 = vrot.lane.b32.xlu1 %v5265_v19, %s5706_s9  ;;  %v3750_v60 = vpop.f32.mrb[85].mxu1  ;;  %v3836_v8 = vpop.f32.mrb[105].mxu0 }
 0xc99   :  { %v5266_v62 = vpop.f32.mrb[86].mxu1  ;;  %v5278_v47 = vpop.f32.mrb[106].mxu0 }
 0xc9a   :  { %3771 = vrot.lane.b32.xlu0 %v5266_v62, %s5706_s9  ;;  %v3753_v51 = vpop.f32.mrb[87].mxu1  ;;  %v3839_v41 = vpop.f32.mrb[107].mxu0 }
 0xc9c   :  { %3855 = vrot.lane.b32.xlu1 %v5277_v5, %s5707_s8 }
 0xc9e   :  { %3857 = vrot.lane.b32.xlu0 %v5278_v47, %s5707_s8 }
 0xca0   :  { %3765 = vrot.lane.b32.xlu1 %v3750_v60, %s5706_s9 }
 0xca2   :  { %3767 = vrot.lane.b32.xlu0 %v3753_v51, %s5706_s9 }
 0xca4   :  { %3851 = vrot.lane.b32.xlu1 %v3836_v8, %s5707_s8 }
 0xca6   :  { %3853 = vrot.lane.b32.xlu0 %v3839_v41, %s5707_s8 }
 0xca7   :  { %v5289_v12 = vpop.f32.mrb[88].mxu1  ;;  %v5301_v10 = vpop.f32.mrb[108].mxu0 }
 0xca8   :  { %3941 = vrot.lane.b32.xlu1 %v5289_v12, %s5708_s25  ;;  %v3922_v26 = vpop.f32.mrb[89].mxu1  ;;  %v4008_v23 = vpop.f32.mrb[109].mxu0 }
 0xca9   :  { %v5290_v53 = vpop.f32.mrb[90].mxu1  ;;  %v5302_v33 = vpop.f32.mrb[110].mxu0 }
 0xcaa   :  { %3943 = vrot.lane.b32.xlu0 %v5290_v53, %s5708_s25  ;;  %v3925_v21 = vpop.f32.mrb[91].mxu1  ;;  %v4011_v52 = vpop.f32.mrb[111].mxu0 }
 0xcac   :  { %4027 = vrot.lane.b32.xlu1 %v5301_v10, %s5709_s26 }
 0xcae   :  { %4029 = vrot.lane.b32.xlu0 %v5302_v33, %s5709_s26 }
 0xcb0   :  { %3937 = vrot.lane.b32.xlu1 %v3922_v26, %s5708_s25 }
 0xcb2   :  { %3939 = vrot.lane.b32.xlu0 %v3925_v21, %s5708_s25 }
 0xcb4   :  { %4023 = vrot.lane.b32.xlu1 %v4008_v23, %s5709_s26 }
 0xcb6   :  { %4025 = vrot.lane.b32.xlu0 %v4011_v52, %s5709_s26 }
 0xcb7   :  { %v5313_v50 = vpop.f32.mrb[92].mxu1  ;;  %v5325_v56 = vpop.f32.mrb[112].mxu0 }
 0xcb8   :  { %4113 = vrot.lane.b32.xlu1 %v5313_v50, %s5710_s27  ;;  %v4094_v40 = vpop.f32.mrb[93].mxu1  ;;  %v4180_v43 = vpop.f32.mrb[113].mxu0 }
 0xcb9   :  { %v5314_v31 = vpop.f32.mrb[94].mxu1  ;;  %v5326_v49 = vpop.f32.mrb[114].mxu0 }
 0xcba   :  { %4115 = vrot.lane.b32.xlu0 %v5314_v31, %s5710_s27  ;;  %v4097_v57 = vpop.f32.mrb[95].mxu1  ;;  %v4183_v9 = vpop.f32.mrb[115].mxu0 }
 0xcbc   :  { %4199 = vrot.lane.b32.xlu1 %v5325_v56, %s5711_s6 }
 0xcbe   :  { %4201 = vrot.lane.b32.xlu0 %v5326_v49, %s5711_s6 }
 0xcc0   :  { %4109 = vrot.lane.b32.xlu1 %v4094_v40, %s5710_s27 }
 0xcc2   :  { %4111 = vrot.lane.b32.xlu0 %v4097_v57, %s5710_s27 }
 0xcc4   :  { %4195 = vrot.lane.b32.xlu1 %v4180_v43, %s5711_s6 }
 0xcc6   :  { %4197 = vrot.lane.b32.xlu0 %v4183_v9, %s5711_s6 }
 0xcc7   :  { %v5337_v25 = vpop.f32.mrb[96].mxu1 }
 0xcc8   :  { %4285 = vrot.lane.b32.xlu1 %v5337_v25, %s5712_s28  ;;  %v4266_v55 = vpop.f32.mrb[97].mxu1 }
 0xcc9   :  { %v5338_v30 = vpop.f32.mrb[98].mxu1 }
 0xcca   :  { %4287 = vrot.lane.b32.xlu0 %v5338_v30, %s5712_s28  ;;  %v4269_v28 = vpop.f32.mrb[99].mxu1 }
 0xccc   :  { %4281 = vrot.lane.b32.xlu1 %v4266_v55, %s5712_s28 }
 0xcce   :  { %4283 = vrot.lane.b32.xlu0 %v4269_v28, %s5712_s28 }
 0xcd0   :  { %4333 = vperm.xlu1 %5358, %v3542_v3  }
 0xcd2   :  { %4338 = vperm.xlu0 %5357, %v3543_v32  }
 0xcfa   :  { %v3623_v48 = vpop.permute.xlu1 %3622 }
 0xcfc   :  { %v3625_v58 = vpop.permute.xlu0 %3624 }
 0xcfd   :  { %v3629_v32 = vmul.f32 %v3625_v58, %v7543_v7 }
 0xcfe   :  { %v3619_v15 = vpop.permute.xlu1 %3618 }
 0xcff   :  { %v3626_v41 = vmul.f32 %v3619_v15, %v7543_v7  ;;  %v3692_v58 = vadd.f32 %v7778_v1, %v3629_v32 }
 0xd00   :  { %v3621_v20 = vpop.permute.xlu0 %3620 }
 0xd01   :  { %v3627_v10 = vmul.f32 %v3621_v20, %v7543_v7  ;;  %v3681_v53 = vadd.f32 %v7776_v2, %v3626_v41  ;;  %v3628_v2 = vmul.f32 %v3623_v48, %v7543_v7 }
 0xd03   :  { %v3684_v50 = vadd.f32 %v7781_v38, %v3627_v10  ;;  %v3689_v48 = vadd.f32 %v7773_v6, %v3628_v2 }
 0xd0a   :  { %v3770_v4 = vpop.permute.xlu1 %3769 }
 0xd0b   :  { %v3775_v15 = vmul.f32 %v3770_v4, %v7548_v29 }
 0xd0c   :  { %v3772_v17 = vpop.permute.xlu0 %3771 }
 0xd0d   :  { %v3779_v4 = vadd.f32 %v3775_v15, %v3689_v48 }
 0xd0e   :  { %v3856_v39 = vpop.permute.xlu1 %3855 }
 0xd10   :  { %v3858_v11 = vpop.permute.xlu0 %3857 }
 0xd11   :  { %v3862_v10 = vmul.f32 %v3858_v11, %v7551_v63 }
 0xd12   :  { %v3766_v18 = vpop.permute.xlu1 %3765 }
 0xd13   :  { %v3773_v26 = vmul.f32 %v3766_v18, %v7548_v29 }
 0xd14   :  { %v3768_v44 = vpop.permute.xlu0 %3767 }
 0xd15   :  { %v3774_v33 = vmul.f32 %v3768_v44, %v7548_v29  ;;  %v3777_v56 = vadd.f32 %v3773_v26, %v3681_v53 }
 0xd16   :  { %v3852_v35 = vpop.permute.xlu1 %3851 }
 0xd17   :  { %v3859_v21 = vmul.f32 %v3852_v35, %v7551_v63  ;;  %v3778_v49 = vadd.f32 %v3774_v33, %v3684_v50 }
 0xd18   :  { %v3854_v22 = vpop.permute.xlu0 %3853 }
 0xd19   :  { %v3860_v40 = vmul.f32 %v3854_v22, %v7551_v63  ;;  %v3863_v57 = vadd.f32 %v3859_v21, %v3777_v56 }
 0xd1a   :  { %v3942_v42 = vpop.permute.xlu1 %3941 }
 0xd1b   :  { %v3864_v30 = vadd.f32 %v3860_v40, %v3778_v49  ;;  %v3947_v26 = vmul.f32 %v3942_v42, %v7558_v37 }
 0xd1c   :  { %v3944_v16 = vpop.permute.xlu0 %3943 }
 0xd1e   :  { %v4028_v61 = vpop.permute.xlu1 %4027 }
 0xd1f   :  { %v4033_v21 = vmul.f32 %v4028_v61, %v7562_v0 }
 0xd20   :  { %v7831_v24 = vpop.permute.xlu0 %4029 }
 0xd21   :  { %v4034_v11 = vmul.f32 %v7831_v24, %v7562_v0 }
 0xd22   :  { %v3938_v19 = vpop.permute.xlu1 %3937 }
 0xd23   :  { %v3945_v43 = vmul.f32 %v3938_v19, %v7558_v37  ;;  %v3776_v19 = vmul.f32 %v3772_v17, %v7548_v29 }
 0xd24   :  { %v3940_v5 = vpop.permute.xlu0 %3939 }
 0xd25   :  { %v3946_v9 = vmul.f32 %v3940_v5, %v7558_v37  ;;  %v3949_v28 = vadd.f32 %v3945_v43, %v3863_v57  ;;  %v3861_v5 = vmul.f32 %v3856_v39, %v7551_v63  ;;  %v3780_v29 = vadd.f32 %v3776_v19, %v3692_v58 }
 0xd26   :  { %v4024_v60 = vpop.permute.xlu1 %4023  ;;  %v3948_v39 = vmul.f32 %v3944_v16, %v7558_v37 }
 0xd27   :  { %v4031_v25 = vmul.f32 %v4024_v60, %v7562_v0  ;;  %v3950_v18 = vadd.f32 %v3946_v9, %v3864_v30  ;;  %v3865_v17 = vadd.f32 %v3861_v5, %v3779_v4  ;;  %v3866_v40 = vadd.f32 %v3862_v10, %v3780_v29 }
 0xd28   :  { %v4026_v8 = vpop.permute.xlu0 %4025 }
 0xd29   :  { %v4032_v3 = vmul.f32 %v4026_v8, %v7562_v0  ;;  %v4035_v44 = vadd.f32 %v4031_v25, %v3949_v28  ;;  %v3951_v63 = vadd.f32 %v3947_v26, %v3865_v17  ;;  %v3952_v49 = vadd.f32 %v3948_v39, %v3866_v40 }
 0xd2a   :  { %v4114_v62 = vpop.permute.xlu1 %4113 }
 0xd2b   :  { %v4036_v8 = vadd.f32 %v4032_v3, %v3950_v18  ;;  %v4119_v42 = vmul.f32 %v4114_v62, %v7564_v46  ;;  %v4037_v57 = vadd.f32 %v4033_v21, %v3951_v63  ;;  %v4038_v25 = vadd.f32 %v4034_v11, %v3952_v49 }
 0xd2c   :  { %v7833_v47 = vpop.permute.xlu0 %4115 }
 0xd2d   :  { %v4120_v37 = vmul.f32 %v7833_v47, %v7564_v46  ;;  %v4123_v2 = vadd.f32 %v4119_v42, %v4037_v57 }
 0xd2e   :  { %v7835_v51 = vpop.permute.xlu1 %4199 }
 0xd2f   :  { %v4205_v16 = vmul.f32 %v7835_v51, %v7572_v27 }
 0xd30   :  { %v7838_v12 = vpop.permute.xlu0 %4201 }
 0xd31   :  { %v4206_v0 = vmul.f32 %v7838_v12, %v7572_v27  ;;  %v4209_v30 = vadd.f32 %v4205_v16, %v4123_v2 }
 0xd32   :  { %v4110_v23 = vpop.permute.xlu1 %4109 }
 0xd33   :  { %v4117_v38 = vmul.f32 %v4110_v23, %v7564_v46 }
 0xd34   :  { %v4112_v52 = vpop.permute.xlu0 %4111 }
 0xd35   :  { %v4118_v35 = vmul.f32 %v4112_v52, %v7564_v46  ;;  %v4121_v41 = vadd.f32 %v4117_v38, %v4035_v44 }
 0xd36   :  { %v4196_v31 = vpop.permute.xlu1 %4195 }
 0xd37   :  { %v4203_v22 = vmul.f32 %v4196_v31, %v7572_v27  ;;  %v4122_v53 = vadd.f32 %v4118_v35, %v4036_v8 }
 0xd38   :  { %v4198_v55 = vpop.permute.xlu0 %4197 }
 0xd39   :  { %v4204_v7 = vmul.f32 %v4198_v55, %v7572_v27  ;;  %v4207_v33 = vadd.f32 %v4203_v22, %v4121_v41  ;;  %v4124_v55 = vadd.f32 %v4120_v37, %v4038_v25 }
 0xd3a   :  { %v4286_v20 = vpop.permute.xlu1 %4285 }
 0xd3b   :  { %v4208_v50 = vadd.f32 %v4204_v7, %v4122_v53 }
 0xd3c   :  { %v4288_v60 = vpop.permute.xlu0 %4287 }
 0xd3d   :  { %v4292_v46 = vmul.f32 %v7590_v14, %v4288_v60 }
 0xd3e   :  { %v4282_v23 = vpop.permute.xlu1 %4281 }
 0xd3f   :  { %v4289_v6 = vmul.f32 %v7590_v14, %v4282_v23 }
 0xd40   :  { %v4284_v52 = vpop.permute.xlu0 %4283 }
 0xd41   :  { %v4293_v56 = vadd.f32 %v4289_v6, %v4207_v33  ;;  %v4290_v1 = vmul.f32 %v7590_v14, %v4284_v52 }
 0xd43   :  { %v4317_v43 = vmul.f32 %v7819_v13, %v4293_v56  ;;  %v4294_v31 = vadd.f32 %v4290_v1, %v4208_v50  ;;  %v4291_v13 = vmul.f32 %v7590_v14, %v4286_v20 }
 0xd45   :  { %v4341_v61 = vadd.f32 %v7827_v34, %v4317_v43  ;;  %v4318_v9 = vmul.f32 %v7821_v54, %v4294_v31  ;;  %v4210_v54 = vadd.f32 %v4206_v0, %v4124_v55  ;;  %v4295_v34 = vadd.f32 %v4291_v13, %v4209_v30 }
 0xd47   :  { %v4345_v24 = vmax.f32 %v4341_v61, 0.0  ;;  %v4342_v62 = vadd.f32 %v7829_v36, %v4318_v9  ;;  %v4296_v27 = vadd.f32 %v4292_v46, %v4210_v54  ;;  %v4319_v51 = vmul.f32 %v7823_v59, %v4295_v34 }
 0xd49   :  { %v4346_v47 = vmax.f32 %v4342_v62, 0.0  ;;  %4349 = vst [vmem:[%s7912_s15] sm:$0xff] %v4345_v24  ;;  %v4320_v28 = vmul.f32 %v7825_v45, %v4296_v27 }
 0xd4b   :  { %4350 = vst [vmem:[%s7912_s15 + $0x8] sm:$0xff] %v4346_v47 }
 0xd4f   :  { %v4334_v12 = vpop.permute.xlu1 %4333 }
 0xd50   :  { %v4343_v36 = vadd.f32 %v4334_v12, %v4319_v51 }
 0xd51   :  { %v4339_v3 = vpop.permute.xlu0 %4338 }
 0xd52   :  { %v4347_v14 = vmax.f32 %v4343_v36, 0.0  ;;  %v4344_v38 = vadd.f32 %v4339_v3, %v4320_v28 }
 0xd54   :  { %4351 = vst [vmem:[%s7912_s15 + $0x10] sm:$0xff] %v4347_v14  ;;  %v4348_v32 = vmax.f32 %v4344_v38, 0.0 }
 0xd56   :  { %4352 = vst [vmem:[%s7912_s15 + $0x18] sm:$0xff] %v4348_v32 }

</bundles_post_ra>
